<compile_context>
chip_gen: v7x
topology: tpu7x:2x2x1
jax: 0.10.0
libtpu: 0.0.40
codegen_flags: <defaults>
</compile_context>

<pallas_src>
import math
from functools import partial

import jax
import jax.numpy as jnp
from jax import lax
from jax.experimental import pallas as pl
from jax.experimental.pallas import tpu as pltpu

_BIG_NEG = -1e30          # additive-mask value for "no edge"
_VALID_THRESH = -1e29     # running max above this <=> row has >=1 in-edge


# ------------------------------ fused kernel ------------------------------- #

def _flash_transconv_kernel(xq_ref, xkv_ref, wqs_ref, bqs_ref, wkv_ref, bkv_ref,
                            mask_ref, wfc_ref, bfc_ref, o_ref,
                            qs_sc, m_sc, l_sc, acc_sc, *, H, Cp):
    """One (query-tile, kv-tile) step of the fused TransConv forward.

    xq_ref   : (TQ, D)   query-side rows of x
    xkv_ref  : (TK, D)   key/value-side rows of x
    wqs_ref  : (D, (H+1)*Cp)   [wq*1/sqrt(C) per head (padded) | wskip (padded)]
    bqs_ref  : (1, (H+1)*Cp)
    wkv_ref  : (D, 2*H*Cp)     [wk (padded) | wv*(1/H) (padded)]
    bkv_ref  : (1, 2*H*Cp)
    mask_ref : (TQ, TK)  bf16 additive mask tile: 0 on edges, -1e30 elsewhere
    wfc_ref  : (Cp, NCLS_PAD)  zero-padded, lane-dense fc weight
    bfc_ref  : (1, NCLS_PAD)
    o_ref    : (TQ, NCLS_PAD)
    qs_sc    : (TQ, (H+1)*Cp) f32 scratch  (q per head + skip projections)
    m_sc     : (H, TQ, 1) f32 running max
    l_sc     : (H, TQ, 1) f32 running softmax denominator
    acc_sc   : (H, TQ, Cp) f32 unnormalized attention output
    """
    ki = pl.program_id(1)
    nk = pl.num_programs(1)
    HCp = H * Cp

    @pl.when(ki == 0)
    def _init():
        # q (already scaled by 1/sqrt(C)) and skip projections: one MXU pass per
        # row tile, reused across every KV step.
        qs_sc[...] = (jnp.dot(xq_ref[...], wqs_ref[...],
                              preferred_element_type=jnp.float32) + bqs_ref[...])
        m_sc[...] = jnp.full_like(m_sc, -jnp.inf)
        l_sc[...] = jnp.zeros_like(l_sc)
        acc_sc[...] = jnp.zeros_like(acc_sc)

    # k / v projections for this KV tile (head-mean 1/H already folded into wv).
    kv = (jnp.dot(xkv_ref[...], wkv_ref[...],
                  preferred_element_type=jnp.float32) + bkv_ref[...])     # (TK, 2HCp)
    am = mask_ref[...].astype(jnp.float32)                                # (TQ, TK)

    # TODO(synk): on v6e/v7x with large D/C, cast x and projection weights to bf16
    # for the MXU (keep f32 accumulation) after gating on the 1e-4 tolerance.
    for h in range(H):                                  # static unroll, H is tiny
        q = qs_sc[:, h * Cp:(h + 1) * Cp]               # lane-aligned slab views
        k = kv[:, h * Cp:(h + 1) * Cp]
        v = kv[:, HCp + h * Cp: HCp + (h + 1) * Cp]

        # contract on the last dims directly -> no k.T materialization.
        s = lax.dot_general(q, k, (((1,), (1,)), ((), ())),
                            preferred_element_type=jnp.float32) + am      # (TQ, TK)

        m_prev = m_sc[h]
        m_new = jnp.maximum(m_prev, jnp.max(s, axis=-1, keepdims=True))
        alpha = jnp.exp(m_prev - m_new)
        p = jnp.exp(s - m_new)                          # masked entries underflow to 0
        l_sc[h] = alpha * l_sc[h] + jnp.sum(p, axis=-1, keepdims=True)
        acc_sc[h] = alpha * acc_sc[h] + jnp.dot(p, v,
                                                preferred_element_type=jnp.float32)
        m_sc[h] = m_new

    @pl.when(ki == nk - 1)
    def _finalize():
        hfeat = qs_sc[:, HCp:]                          # skip projection (TQ, Cp)
        for h in range(H):
            # rows whose running max is ~-1e30 had no in-edges -> zero attention
            # output (matches the reference's denom>0 guard).
            valid = m_sc[h] > _VALID_THRESH
            inv = jnp.where(valid, 1.0 / jnp.maximum(l_sc[h], 1e-30), 0.0)
            hfeat = hfeat + acc_sc[h] * inv             # normalize AFTER PV matmul
        o_ref[...] = (jnp.dot(hfeat, wfc_ref[...],
                              preferred_element_type=jnp.float32) + bfc_ref[...])


# ------------------------------ model wrapper ------------------------------ #

def _round_up(a, b):
    return (a + b - 1) // b * b


def _pad_head_cols(w, H, C, Cp):
    """(D, H*C) -> (D, H*Cp): zero-pad each head's slab to Cp columns."""
    D = w.shape[0]
    return jnp.pad(w.reshape(D, H, C), ((0, 0), (0, 0), (0, Cp - C))).reshape(D, H * Cp)


def _pad_head_bias(b, H, C, Cp):
    return jnp.pad(b.reshape(H, C), ((0, 0), (0, Cp - C))).reshape(H * Cp)


def init_params(key, input_dim, hidden_dim, n_classes, heads):
    def dense(k, din, dout):
        kw, kb = jax.random.split(k)
        lim = 1.0 / math.sqrt(din)
        w = jax.random.uniform(kw, (din, dout), jnp.float32, -lim, lim)
        b = jax.random.uniform(kb, (dout,), jnp.float32, -lim, lim)
        return w, b

    kq, kk, kv, ks, kf = jax.random.split(key, 5)
    p = {}
    p["wq"], p["bq"] = dense(kq, input_dim, heads * hidden_dim)   # lin_query
    p["wk"], p["bk"] = dense(kk, input_dim, heads * hidden_dim)   # lin_key
    p["wv"], p["bv"] = dense(kv, input_dim, heads * hidden_dim)   # lin_value
    p["wskip"], p["bskip"] = dense(ks, input_dim, hidden_dim)     # lin_skip (concat=False)
    p["wfc"], p["bfc"] = dense(kf, hidden_dim, n_classes)         # self.fc
    return p


def trans_conv_forward(params, x, edge_index, heads, hidden_dim, *, tq=128, tk=128):
    """TransformerConv(heads, concat=False) + fc as one flash-tiled Pallas call."""
    N, D = x.shape
    H, C = heads, hidden_dim
    Cp = _round_up(C, 128)                       # lane-aligned per-head slab width
    NCLS = params["wfc"].shape[1]
    ncls_pad = _round_up(NCLS, 128)              # lane-dense output width

    TQ, TK = tq, tk
    Np = _round_up(N, math.lcm(TQ, TK))          # pad rows so tiles divide evenly
    nq, nk = Np // TQ, Np // TK

    # ---- host-side weight prep (scale / head-mean folding, lane-aligned slabs) ----
    scale = 1.0 / math.sqrt(C)
    inv_h = 1.0 / H
    w_qs = jnp.concatenate(
        [_pad_head_cols(params["wq"] * scale, H, C, Cp),
         jnp.pad(params["wskip"], ((0, 0), (0, Cp - C)))], axis=1)       # (D,(H+1)Cp)
    b_qs = jnp.concatenate(
        [_pad_head_bias(params["bq"] * scale, H, C, Cp),
         jnp.pad(params["bskip"], (0, Cp - C))]).reshape(1, (H + 1) * Cp)
    w_kv = jnp.concatenate(
        [_pad_head_cols(params["wk"], H, C, Cp),
         _pad_head_cols(params["wv"] * inv_h, H, C, Cp)], axis=1)        # (D,2HCp)
    b_kv = jnp.concatenate(
        [_pad_head_bias(params["bk"], H, C, Cp),
         _pad_head_bias(params["bv"] * inv_h, H, C, Cp)]).reshape(1, 2 * H * Cp)

    wfc_p = jnp.zeros((Cp, ncls_pad), jnp.float32).at[:C, :NCLS].set(params["wfc"])
    bfc_p = jnp.zeros((1, ncls_pad), jnp.float32).at[0, :NCLS].set(params["bfc"])

    xp = jnp.zeros((Np, D), x.dtype).at[:N].set(x)

    # additive bf16 mask: 0 on edges (src -> dst), -1e30 elsewhere / on padding.
    # NOTE: duplicate edges collapse in the dense-mask formulation (inputs unique here).
    src = edge_index[:, 0]
    dst = edge_index[:, 1]
    addmask = (jnp.full((Np, Np), _BIG_NEG, jnp.float32)
               .at[dst, src].set(0.0).astype(jnp.bfloat16))
    # TODO(synk): for large graphs, drop the dense O(N^2) mask and build each
    # (TQ,TK) tile in-kernel from CSR neighbor lists via PrefetchScalarGridSpec.

    out_pad = pl.pallas_call(
        partial(_flash_transconv_kernel, H=H, Cp=Cp),
        out_shape=jax.ShapeDtypeStruct((Np, ncls_pad), jnp.float32),
        grid=(nq, nk),
        in_specs=[
            pl.BlockSpec((TQ, D), lambda qi, ki: (qi, 0)),             # x (query rows)
            pl.BlockSpec((TK, D), lambda qi, ki: (ki, 0)),             # x (kv rows)
            pl.BlockSpec((D, (H + 1) * Cp), lambda qi, ki: (0, 0)),    # [wq*s | wskip]
            pl.BlockSpec((1, (H + 1) * Cp), lambda qi, ki: (0, 0)),
            pl.BlockSpec((D, 2 * H * Cp), lambda qi, ki: (0, 0)),      # [wk | wv/H]
            pl.BlockSpec((1, 2 * H * Cp), lambda qi, ki: (0, 0)),
            pl.BlockSpec((TQ, TK), lambda qi, ki: (qi, ki)),           # mask tile
            pl.BlockSpec((Cp, ncls_pad), lambda qi, ki: (0, 0)),       # fc weight
            pl.BlockSpec((1, ncls_pad), lambda qi, ki: (0, 0)),        # fc bias
        ],
        out_specs=pl.BlockSpec((TQ, ncls_pad), lambda qi, ki: (qi, 0)),
        scratch_shapes=[
            pltpu.VMEM((TQ, (H + 1) * Cp), jnp.float32),   # q + skip projections
            pltpu.VMEM((H, TQ, 1), jnp.float32),           # running max
            pltpu.VMEM((H, TQ, 1), jnp.float32),           # running denominator
            pltpu.VMEM((H, TQ, Cp), jnp.float32),          # unnormalized attn output
        ],
        compiler_params=pltpu.CompilerParams(
            dimension_semantics=("parallel", "arbitrary"),   # rows split across TCs
            vmem_limit_bytes=48 * 1024 * 1024),              # headroom within v7x 64MiB
    )(xp, xp, w_qs, b_qs, w_kv, b_kv, addmask, wfc_p, bfc_p)

    return out_pad[:N, :NCLS]


def trans_conv_apply(params, data, heads, hidden_dim):
    """Mirrors TransConv.forward for centroid_layer=False: returns (h, exps, None, exps_c)."""
    (x, edge_index), exps, exps_c = data
    h = trans_conv_forward(params, x, edge_index, heads, hidden_dim)
    h_c = None
    # TODO(synk): centroid_layer=True branch references self.gat_conv_centroid /
    # edge_index_centroid which are undefined in the source module; only the
    # centroid_layer=False path is implemented.
    return (h, exps, h_c, exps_c)


# ------------------------------ pure-JAX ref -------------------------------- #

def reference_forward(params, x, edge_index, heads, hidden_dim):
    N = x.shape[0]
    H, C = heads, hidden_dim
    src, dst = edge_index[:, 0], edge_index[:, 1]
    mask = jnp.zeros((N, N), jnp.float32).at[dst, src].set(1.0)
    q = (x @ params["wq"] + params["bq"]).reshape(N, H, C).transpose(1, 0, 2)
    k = (x @ params["wk"] + params["bk"]).reshape(N, H, C).transpose(1, 0, 2)
    v = (x @ params["wv"] + params["bv"]).reshape(N, H, C).transpose(1, 0, 2)
    skip = x @ params["wskip"] + params["bskip"]
    s = jnp.einsum("hnc,hmc->hnm", q, k) / math.sqrt(C)
    s_m = jnp.where(mask[None] > 0, s, -1e30)
    p = jnp.exp(s_m - jnp.max(s_m, axis=-1, keepdims=True)) * mask[None]
    denom = jnp.sum(p, axis=-1, keepdims=True)
    attn = jnp.where(denom > 0, p / jnp.maximum(denom, 1e-30), 0.0)
    out = jnp.einsum("hnm,hmc->hnc", attn, v).mean(axis=0) + skip
    return out @ params["wfc"] + params["bfc"]


# ---------------------------------- main ------------------------------------ #

if __name__ == "__main__":
    N, D, HID, HEADS, NCLS = 16, 32, 32, 3, 10
    key = jax.random.PRNGKey(0)
    kx, kp, ke1, ke2 = jax.random.split(key, 4)

    x = jax.random.normal(kx, (N, D), dtype=jnp.float32)

    # deterministic, duplicate-free edge list: each node i receives edges from
    # (i+1)%N, (i+3)%N, (i+7)%N.  Shape [E, 2] like emb_data.edge_index.
    dst = jnp.repeat(jnp.arange(N), 3)
    src = jnp.concatenate(
        [(jnp.arange(N) + o) % N for o in (1, 3, 7)]
    ).reshape(3, N).T.reshape(-1)
    edge_index = jnp.stack([src, dst], axis=1).astype(jnp.int32)   # [48, 2]

    exps = jax.random.normal(ke1, (N, NCLS), dtype=jnp.float32)
    exps_c = jax.random.normal(ke2, (4, NCLS), dtype=jnp.float32)

    params = init_params(kp, D, HID, NCLS, HEADS)

    h, exps_out, h_c, exps_c_out = trans_conv_apply(
        params, ((x, edge_index), exps, exps_c), HEADS, HID
    )
    jax.block_until_ready(h)

    ref = reference_forward(params, x, edge_index, HEADS, HID)
    assert h.shape == (N, NCLS) and h.dtype == jnp.float32
    assert h_c is None
    assert jnp.allclose(h, ref, rtol=1e-4, atol=1e-4), "mismatch vs pure-JAX reference"

    print("KERNEL_OK")
</pallas_src>

<mosaic_0001>
module attributes {stable_mosaic.version = 11 : i64} {
  func.func @_flash_transconv_kernel(%arg0: i32, %arg1: i32, %arg2: memref<128x32xf32, #tpu.memory_space<vmem>>, %arg3: memref<128x32xf32, #tpu.memory_space<vmem>>, %arg4: memref<32x512xf32, #tpu.memory_space<vmem>>, %arg5: memref<1x512xf32, #tpu.memory_space<vmem>>, %arg6: memref<32x768xf32, #tpu.memory_space<vmem>>, %arg7: memref<1x768xf32, #tpu.memory_space<vmem>>, %arg8: memref<128x128xbf16, #tpu.memory_space<vmem>>, %arg9: memref<128x128xf32, #tpu.memory_space<vmem>>, %arg10: memref<1x128xf32, #tpu.memory_space<vmem>>, %arg11: memref<128x128xf32, #tpu.memory_space<vmem>>, %arg12: memref<128x512xf32, #tpu.memory_space<vmem>>, %arg13: memref<3x128x1xf32, #tpu.memory_space<vmem>>, %arg14: memref<3x128x1xf32, #tpu.memory_space<vmem>>, %arg15: memref<3x128x128xf32, #tpu.memory_space<vmem>>) attributes {dimension_semantics = [#tpu.dimension_semantics<parallel>, #tpu.dimension_semantics<arbitrary>], iteration_bounds = array<i64: 1, 1>, scalar_prefetch = 0 : i64, scratch_operands = 4 : i64, tpu.core_type = #tpu.core_type<tc>, window_params = [{transform_indices = @transform_0, window_bounds = array<i64: 128, 32>}, {transform_indices = @transform_1, window_bounds = array<i64: 128, 32>}, {pipeline_mode = #tpu.pipeline_mode<synchronous>, transform_indices = @transform_2, window_bounds = array<i64: 32, 512>}, {pipeline_mode = #tpu.pipeline_mode<synchronous>, transform_indices = @transform_3, window_bounds = array<i64: 1, 512>}, {pipeline_mode = #tpu.pipeline_mode<synchronous>, transform_indices = @transform_4, window_bounds = array<i64: 32, 768>}, {pipeline_mode = #tpu.pipeline_mode<synchronous>, transform_indices = @transform_5, window_bounds = array<i64: 1, 768>}, {transform_indices = @transform_6, window_bounds = array<i64: 128, 128>}, {pipeline_mode = #tpu.pipeline_mode<synchronous>, transform_indices = @transform_7, window_bounds = array<i64: 128, 128>}, {pipeline_mode = #tpu.pipeline_mode<synchronous>, transform_indices = @transform_8, window_bounds = array<i64: 1, 128>}, {transform_indices = @transform_9, window_bounds = array<i64: 128, 128>}]} {
    %c0_i32 = arith.constant 0 : i32
    %0 = arith.cmpi eq, %arg1, %c0_i32 : i32
    %1 = arith.extui %0 : i1 to i32
    %c0_i32_0 = arith.constant 0 : i32
    %2 = arith.cmpi ne, %1, %c0_i32_0 : i32
    scf.if %2 {
      %c0_78 = arith.constant 0 : index
      %c0_79 = arith.constant 0 : index
      %122 = vector.load %arg2[%c0_78, %c0_79] : memref<128x32xf32, #tpu.memory_space<vmem>>, vector<128x32xf32>
      %c0_80 = arith.constant 0 : index
      %c0_81 = arith.constant 0 : index
      %123 = vector.load %arg4[%c0_80, %c0_81] : memref<32x512xf32, #tpu.memory_space<vmem>>, vector<32x512xf32>
      %cst_82 = arith.constant dense<0.000000e+00> : vector<128x512xf32>
      %124 = tpu.matmul %122, %123, %cst_82 {dimension_numbers = #tpu.dot_dimension_numbers<[1], [0], [0], [1], [0, 0, 1, 1], [], []>} : vector<128x32xf32>, vector<32x512xf32>, vector<128x512xf32> -> vector<128x512xf32>
      %c0_83 = arith.constant 0 : index
      %c0_84 = arith.constant 0 : index
      %125 = vector.load %arg5[%c0_83, %c0_84] : memref<1x512xf32, #tpu.memory_space<vmem>>, vector<1x512xf32>
      %126 = vector.broadcast %125 : vector<1x512xf32> to vector<128x512xf32>
      %127 = arith.addf %124, %126 : vector<128x512xf32>
      %c0_85 = arith.constant 0 : index
      %c0_86 = arith.constant 0 : index
      %128 = vector.load %arg12[%c0_85, %c0_86] : memref<128x512xf32, #tpu.memory_space<vmem>>, vector<128x512xf32>
      tpu.vector_store %arg12[%c0_85, %c0_86], %127 {strides = array<i32>} : memref<128x512xf32, #tpu.memory_space<vmem>>, vector<128x512xf32>,
      %cst_87 = arith.constant 0xFF800000 : f32
      %129 = vector.broadcast %cst_87 : f32 to vector<3x128x1xf32>
      %c0_88 = arith.constant 0 : index
      %c0_89 = arith.constant 0 : index
      %c0_90 = arith.constant 0 : index
      %130 = vector.load %arg13[%c0_88, %c0_89, %c0_90] : memref<3x128x1xf32, #tpu.memory_space<vmem>>, vector<3x128x1xf32>
      tpu.vector_store %arg13[%c0_88, %c0_89, %c0_90], %129 {strides = array<i32>} : memref<3x128x1xf32, #tpu.memory_space<vmem>>, vector<3x128x1xf32>,
      %cst_91 = arith.constant 0.000000e+00 : f32
      %131 = vector.broadcast %cst_91 : f32 to vector<3x128x1xf32>
      %c0_92 = arith.constant 0 : index
      %c0_93 = arith.constant 0 : index
      %c0_94 = arith.constant 0 : index
      %132 = vector.load %arg14[%c0_92, %c0_93, %c0_94] : memref<3x128x1xf32, #tpu.memory_space<vmem>>, vector<3x128x1xf32>
      tpu.vector_store %arg14[%c0_92, %c0_93, %c0_94], %131 {strides = array<i32>} : memref<3x128x1xf32, #tpu.memory_space<vmem>>, vector<3x128x1xf32>,
      %cst_95 = arith.constant 0.000000e+00 : f32
      %133 = vector.broadcast %cst_95 : f32 to vector<3x128x128xf32>
      %c0_96 = arith.constant 0 : index
      %c0_97 = arith.constant 0 : index
      %c0_98 = arith.constant 0 : index
      %134 = vector.load %arg15[%c0_96, %c0_97, %c0_98] : memref<3x128x128xf32, #tpu.memory_space<vmem>>, vector<3x128x128xf32>
      tpu.vector_store %arg15[%c0_96, %c0_97, %c0_98], %133 {strides = array<i32>} : memref<3x128x128xf32, #tpu.memory_space<vmem>>, vector<3x128x128xf32>,
    } else {
    }
    %c0 = arith.constant 0 : index
    %c0_1 = arith.constant 0 : index
    %3 = vector.load %arg3[%c0, %c0_1] : memref<128x32xf32, #tpu.memory_space<vmem>>, vector<128x32xf32>
    %c0_2 = arith.constant 0 : index
    %c0_3 = arith.constant 0 : index
    %4 = vector.load %arg6[%c0_2, %c0_3] : memref<32x768xf32, #tpu.memory_space<vmem>>, vector<32x768xf32>
    %cst = arith.constant dense<0.000000e+00> : vector<128x768xf32>
    %5 = tpu.matmul %3, %4, %cst {dimension_numbers = #tpu.dot_dimension_numbers<[1], [0], [0], [1], [0, 0, 1, 1], [], []>} : vector<128x32xf32>, vector<32x768xf32>, vector<128x768xf32> -> vector<128x768xf32>
    %c0_4 = arith.constant 0 : index
    %c0_5 = arith.constant 0 : index
    %6 = vector.load %arg7[%c0_4, %c0_5] : memref<1x768xf32, #tpu.memory_space<vmem>>, vector<1x768xf32>
    %7 = vector.broadcast %6 : vector<1x768xf32> to vector<128x768xf32>
    %8 = arith.addf %5, %7 : vector<128x768xf32>
    %c0_6 = arith.constant 0 : index
    %c0_7 = arith.constant 0 : index
    %9 = vector.load %arg8[%c0_6, %c0_7] : memref<128x128xbf16, #tpu.memory_space<vmem>>, vector<128x128xbf16>
    %10 = arith.extf %9 : vector<128x128xbf16> to vector<128x128xf32>
    %c0_8 = arith.constant 0 : index
    %c0_9 = arith.constant 0 : index
    %11 = vector.load %arg12[%c0_8, %c0_9] : memref<128x512xf32, #tpu.memory_space<vmem>>, vector<128x128xf32>
    %12 = vector.extract_strided_slice %8 {offsets = [0, 0], sizes = [128, 128], strides = [1, 1]} : vector<128x768xf32> to vector<128x128xf32>
    %13 = vector.extract_strided_slice %8 {offsets = [0, 384], sizes = [128, 128], strides = [1, 1]} : vector<128x768xf32> to vector<128x128xf32>
    %cst_10 = arith.constant dense<0.000000e+00> : vector<128x128xf32>
    %14 = tpu.matmul %11, %12, %cst_10 {dimension_numbers = #tpu.dot_dimension_numbers<[1], [1], [0], [0], [0, 0, 1, 0], [], []>} : vector<128x128xf32>, vector<128x128xf32>, vector<128x128xf32> -> vector<128x128xf32>
    %15 = arith.addf %14, %10 : vector<128x128xf32>
    %c0_11 = arith.constant 0 : index
    %c0_12 = arith.constant 0 : index
    %c0_13 = arith.constant 0 : index
    %16 = vector.load %arg13[%c0_11, %c0_12, %c0_13] : memref<3x128x1xf32, #tpu.memory_space<vmem>>, vector<1x128x1xf32>
    %17 = vector.shape_cast %16 : vector<1x128x1xf32> to vector<128x1xf32>
    %cst_14 = arith.constant dense<0xFF800000> : vector<128xf32>
    %18 = vector.multi_reduction <maximumf>, %15, %cst_14 [1] : vector<128x128xf32> to vector<128xf32>
    %19 = vector.shape_cast %18 : vector<128xf32> to vector<128x1xf32>
    %20 = arith.maximumf %17, %19 : vector<128x1xf32>
    %21 = arith.subf %17, %20 : vector<128x1xf32>
    %22 = math.exp %21 : vector<128x1xf32>
    %23 = vector.broadcast %20 : vector<128x1xf32> to vector<128x128xf32>
    %24 = arith.subf %15, %23 : vector<128x128xf32>
    %25 = math.exp %24 : vector<128x128xf32>
    %c0_15 = arith.constant 0 : index
    %c0_16 = arith.constant 0 : index
    %c0_17 = arith.constant 0 : index
    %26 = vector.load %arg14[%c0_15, %c0_16, %c0_17] : memref<3x128x1xf32, #tpu.memory_space<vmem>>, vector<1x128x1xf32>
    %27 = vector.shape_cast %26 : vector<1x128x1xf32> to vector<128x1xf32>
    %28 = arith.mulf %22, %27 : vector<128x1xf32>
    %cst_18 = arith.constant dense<0.000000e+00> : vector<128xf32>
    %29 = vector.multi_reduction <add>, %25, %cst_18 [1] : vector<128x128xf32> to vector<128xf32>
    %30 = vector.shape_cast %29 : vector<128xf32> to vector<128x1xf32>
    %31 = arith.addf %28, %30 : vector<128x1xf32>
    %c0_19 = arith.constant 0 : index
    %c0_20 = arith.constant 0 : index
    %c0_21 = arith.constant 0 : index
    %32 = vector.load %arg14[%c0_19, %c0_20, %c0_21] : memref<3x128x1xf32, #tpu.memory_space<vmem>>, vector<1x128x1xf32>
    %33 = vector.shape_cast %32 : vector<1x128x1xf32> to vector<128x1xf32>
    %34 = vector.shape_cast %31 : vector<128x1xf32> to vector<1x128x1xf32>
    tpu.vector_store %arg14[%c0_19, %c0_20, %c0_21], %34 {strides = array<i32>} : memref<3x128x1xf32, #tpu.memory_space<vmem>>, vector<1x128x1xf32>,
    %c0_22 = arith.constant 0 : index
    %c0_23 = arith.constant 0 : index
    %c0_24 = arith.constant 0 : index
    %35 = vector.load %arg15[%c0_22, %c0_23, %c0_24] : memref<3x128x128xf32, #tpu.memory_space<vmem>>, vector<1x128x128xf32>
    %36 = vector.shape_cast %35 : vector<1x128x128xf32> to vector<128x128xf32>
    %37 = vector.broadcast %22 : vector<128x1xf32> to vector<128x128xf32>
    %38 = arith.mulf %37, %36 : vector<128x128xf32>
    %cst_25 = arith.constant dense<0.000000e+00> : vector<128x128xf32>
    %39 = tpu.matmul %25, %13, %cst_25 {dimension_numbers = #tpu.dot_dimension_numbers<[1], [0], [0], [1], [0, 0, 1, 1], [], []>} : vector<128x128xf32>, vector<128x128xf32>, vector<128x128xf32> -> vector<128x128xf32>
    %40 = arith.addf %38, %39 : vector<128x128xf32>
    %c0_26 = arith.constant 0 : index
    %c0_27 = arith.constant 0 : index
    %c0_28 = arith.constant 0 : index
    %41 = vector.load %arg15[%c0_26, %c0_27, %c0_28] : memref<3x128x128xf32, #tpu.memory_space<vmem>>, vector<1x128x128xf32>
    %42 = vector.shape_cast %41 : vector<1x128x128xf32> to vector<128x128xf32>
    %43 = vector.shape_cast %40 : vector<128x128xf32> to vector<1x128x128xf32>
    tpu.vector_store %arg15[%c0_26, %c0_27, %c0_28], %43 {strides = array<i32>} : memref<3x128x128xf32, #tpu.memory_space<vmem>>, vector<1x128x128xf32>,
    %c0_29 = arith.constant 0 : index
    %c0_30 = arith.constant 0 : index
    %c0_31 = arith.constant 0 : index
    %44 = vector.load %arg13[%c0_29, %c0_30, %c0_31] : memref<3x128x1xf32, #tpu.memory_space<vmem>>, vector<1x128x1xf32>
    %45 = vector.shape_cast %44 : vector<1x128x1xf32> to vector<128x1xf32>
    %46 = vector.shape_cast %20 : vector<128x1xf32> to vector<1x128x1xf32>
    tpu.vector_store %arg13[%c0_29, %c0_30, %c0_31], %46 {strides = array<i32>} : memref<3x128x1xf32, #tpu.memory_space<vmem>>, vector<1x128x1xf32>,
    %c0_32 = arith.constant 0 : index
    %c128 = arith.constant 128 : index
    %47 = vector.load %arg12[%c0_32, %c128] : memref<128x512xf32, #tpu.memory_space<vmem>>, vector<128x128xf32>
    %48 = vector.extract_strided_slice %8 {offsets = [0, 128], sizes = [128, 128], strides = [1, 1]} : vector<128x768xf32> to vector<128x128xf32>
    %49 = vector.extract_strided_slice %8 {offsets = [0, 512], sizes = [128, 128], strides = [1, 1]} : vector<128x768xf32> to vector<128x128xf32>
    %cst_33 = arith.constant dense<0.000000e+00> : vector<128x128xf32>
    %50 = tpu.matmul %47, %48, %cst_33 {dimension_numbers = #tpu.dot_dimension_numbers<[1], [1], [0], [0], [0, 0, 1, 0], [], []>} : vector<128x128xf32>, vector<128x128xf32>, vector<128x128xf32> -> vector<128x128xf32>
    %51 = arith.addf %50, %10 : vector<128x128xf32>
    %c1 = arith.constant 1 : index
    %c0_34 = arith.constant 0 : index
    %c0_35 = arith.constant 0 : index
    %52 = vector.load %arg13[%c1, %c0_34, %c0_35] : memref<3x128x1xf32, #tpu.memory_space<vmem>>, vector<1x128x1xf32>
    %53 = vector.shape_cast %52 : vector<1x128x1xf32> to vector<128x1xf32>
    %cst_36 = arith.constant dense<0xFF800000> : vector<128xf32>
    %54 = vector.multi_reduction <maximumf>, %51, %cst_36 [1] : vector<128x128xf32> to vector<128xf32>
    %55 = vector.shape_cast %54 : vector<128xf32> to vector<128x1xf32>
    %56 = arith.maximumf %53, %55 : vector<128x1xf32>
    %57 = arith.subf %53, %56 : vector<128x1xf32>
    %58 = math.exp %57 : vector<128x1xf32>
    %59 = vector.broadcast %56 : vector<128x1xf32> to vector<128x128xf32>
    %60 = arith.subf %51, %59 : vector<128x128xf32>
    %61 = math.exp %60 : vector<128x128xf32>
    %c1_37 = arith.constant 1 : index
    %c0_38 = arith.constant 0 : index
    %c0_39 = arith.constant 0 : index
    %62 = vector.load %arg14[%c1_37, %c0_38, %c0_39] : memref<3x128x1xf32, #tpu.memory_space<vmem>>, vector<1x128x1xf32>
    %63 = vector.shape_cast %62 : vector<1x128x1xf32> to vector<128x1xf32>
    %64 = arith.mulf %58, %63 : vector<128x1xf32>
    %cst_40 = arith.constant dense<0.000000e+00> : vector<128xf32>
    %65 = vector.multi_reduction <add>, %61, %cst_40 [1] : vector<128x128xf32> to vector<128xf32>
    %66 = vector.shape_cast %65 : vector<128xf32> to vector<128x1xf32>
    %67 = arith.addf %64, %66 : vector<128x1xf32>
    %c1_41 = arith.constant 1 : index
    %c0_42 = arith.constant 0 : index
    %c0_43 = arith.constant 0 : index
    %68 = vector.load %arg14[%c1_41, %c0_42, %c0_43] : memref<3x128x1xf32, #tpu.memory_space<vmem>>, vector<1x128x1xf32>
    %69 = vector.shape_cast %68 : vector<1x128x1xf32> to vector<128x1xf32>
    %70 = vector.shape_cast %67 : vector<128x1xf32> to vector<1x128x1xf32>
    tpu.vector_store %arg14[%c1_41, %c0_42, %c0_43], %70 {strides = array<i32>} : memref<3x128x1xf32, #tpu.memory_space<vmem>>, vector<1x128x1xf32>,
    %c1_44 = arith.constant 1 : index
    %c0_45 = arith.constant 0 : index
    %c0_46 = arith.constant 0 : index
    %71 = vector.load %arg15[%c1_44, %c0_45, %c0_46] : memref<3x128x128xf32, #tpu.memory_space<vmem>>, vector<1x128x128xf32>
    %72 = vector.shape_cast %71 : vector<1x128x128xf32> to vector<128x128xf32>
    %73 = vector.broadcast %58 : vector<128x1xf32> to vector<128x128xf32>
    %74 = arith.mulf %73, %72 : vector<128x128xf32>
    %cst_47 = arith.constant dense<0.000000e+00> : vector<128x128xf32>
    %75 = tpu.matmul %61, %49, %cst_47 {dimension_numbers = #tpu.dot_dimension_numbers<[1], [0], [0], [1], [0, 0, 1, 1], [], []>} : vector<128x128xf32>, vector<128x128xf32>, vector<128x128xf32> -> vector<128x128xf32>
    %76 = arith.addf %74, %75 : vector<128x128xf32>
    %c1_48 = arith.constant 1 : index
    %c0_49 = arith.constant 0 : index
    %c0_50 = arith.constant 0 : index
    %77 = vector.load %arg15[%c1_48, %c0_49, %c0_50] : memref<3x128x128xf32, #tpu.memory_space<vmem>>, vector<1x128x128xf32>
    %78 = vector.shape_cast %77 : vector<1x128x128xf32> to vector<128x128xf32>
    %79 = vector.shape_cast %76 : vector<128x128xf32> to vector<1x128x128xf32>
    tpu.vector_store %arg15[%c1_48, %c0_49, %c0_50], %79 {strides = array<i32>} : memref<3x128x128xf32, #tpu.memory_space<vmem>>, vector<1x128x128xf32>,
    %c1_51 = arith.constant 1 : index
    %c0_52 = arith.constant 0 : index
    %c0_53 = arith.constant 0 : index
    %80 = vector.load %arg13[%c1_51, %c0_52, %c0_53] : memref<3x128x1xf32, #tpu.memory_space<vmem>>, vector<1x128x1xf32>
    %81 = vector.shape_cast %80 : vector<1x128x1xf32> to vector<128x1xf32>
    %82 = vector.shape_cast %56 : vector<128x1xf32> to vector<1x128x1xf32>
    tpu.vector_store %arg13[%c1_51, %c0_52, %c0_53], %82 {strides = array<i32>} : memref<3x128x1xf32, #tpu.memory_space<vmem>>, vector<1x128x1xf32>,
    %c0_54 = arith.constant 0 : index
    %c256 = arith.constant 256 : index
    %83 = vector.load %arg12[%c0_54, %c256] : memref<128x512xf32, #tpu.memory_space<vmem>>, vector<128x128xf32>
    %84 = vector.extract_strided_slice %8 {offsets = [0, 256], sizes = [128, 128], strides = [1, 1]} : vector<128x768xf32> to vector<128x128xf32>
    %85 = vector.extract_strided_slice %8 {offsets = [0, 640], sizes = [128, 128], strides = [1, 1]} : vector<128x768xf32> to vector<128x128xf32>
    %cst_55 = arith.constant dense<0.000000e+00> : vector<128x128xf32>
    %86 = tpu.matmul %83, %84, %cst_55 {dimension_numbers = #tpu.dot_dimension_numbers<[1], [1], [0], [0], [0, 0, 1, 0], [], []>} : vector<128x128xf32>, vector<128x128xf32>, vector<128x128xf32> -> vector<128x128xf32>
    %87 = arith.addf %86, %10 : vector<128x128xf32>
    %c2 = arith.constant 2 : index
    %c0_56 = arith.constant 0 : index
    %c0_57 = arith.constant 0 : index
    %88 = vector.load %arg13[%c2, %c0_56, %c0_57] : memref<3x128x1xf32, #tpu.memory_space<vmem>>, vector<1x128x1xf32>
    %89 = vector.shape_cast %88 : vector<1x128x1xf32> to vector<128x1xf32>
    %cst_58 = arith.constant dense<0xFF800000> : vector<128xf32>
    %90 = vector.multi_reduction <maximumf>, %87, %cst_58 [1] : vector<128x128xf32> to vector<128xf32>
    %91 = vector.shape_cast %90 : vector<128xf32> to vector<128x1xf32>
    %92 = arith.maximumf %89, %91 : vector<128x1xf32>
    %93 = arith.subf %89, %92 : vector<128x1xf32>
    %94 = math.exp %93 : vector<128x1xf32>
    %95 = vector.broadcast %92 : vector<128x1xf32> to vector<128x128xf32>
    %96 = arith.subf %87, %95 : vector<128x128xf32>
    %97 = math.exp %96 : vector<128x128xf32>
    %c2_59 = arith.constant 2 : index
    %c0_60 = arith.constant 0 : index
    %c0_61 = arith.constant 0 : index
    %98 = vector.load %arg14[%c2_59, %c0_60, %c0_61] : memref<3x128x1xf32, #tpu.memory_space<vmem>>, vector<1x128x1xf32>
    %99 = vector.shape_cast %98 : vector<1x128x1xf32> to vector<128x1xf32>
    %100 = arith.mulf %94, %99 : vector<128x1xf32>
    %cst_62 = arith.constant dense<0.000000e+00> : vector<128xf32>
    %101 = vector.multi_reduction <add>, %97, %cst_62 [1] : vector<128x128xf32> to vector<128xf32>
    %102 = vector.shape_cast %101 : vector<128xf32> to vector<128x1xf32>
    %103 = arith.addf %100, %102 : vector<128x1xf32>
    %c2_63 = arith.constant 2 : index
    %c0_64 = arith.constant 0 : index
    %c0_65 = arith.constant 0 : index
    %104 = vector.load %arg14[%c2_63, %c0_64, %c0_65] : memref<3x128x1xf32, #tpu.memory_space<vmem>>, vector<1x128x1xf32>
    %105 = vector.shape_cast %104 : vector<1x128x1xf32> to vector<128x1xf32>
    %106 = vector.shape_cast %103 : vector<128x1xf32> to vector<1x128x1xf32>
    tpu.vector_store %arg14[%c2_63, %c0_64, %c0_65], %106 {strides = array<i32>} : memref<3x128x1xf32, #tpu.memory_space<vmem>>, vector<1x128x1xf32>,
    %c2_66 = arith.constant 2 : index
    %c0_67 = arith.constant 0 : index
    %c0_68 = arith.constant 0 : index
    %107 = vector.load %arg15[%c2_66, %c0_67, %c0_68] : memref<3x128x128xf32, #tpu.memory_space<vmem>>, vector<1x128x128xf32>
    %108 = vector.shape_cast %107 : vector<1x128x128xf32> to vector<128x128xf32>
    %109 = vector.broadcast %94 : vector<128x1xf32> to vector<128x128xf32>
    %110 = arith.mulf %109, %108 : vector<128x128xf32>
    %cst_69 = arith.constant dense<0.000000e+00> : vector<128x128xf32>
    %111 = tpu.matmul %97, %85, %cst_69 {dimension_numbers = #tpu.dot_dimension_numbers<[1], [0], [0], [1], [0, 0, 1, 1], [], []>} : vector<128x128xf32>, vector<128x128xf32>, vector<128x128xf32> -> vector<128x128xf32>
    %112 = arith.addf %110, %111 : vector<128x128xf32>
    %c2_70 = arith.constant 2 : index
    %c0_71 = arith.constant 0 : index
    %c0_72 = arith.constant 0 : index
    %113 = vector.load %arg15[%c2_70, %c0_71, %c0_72] : memref<3x128x128xf32, #tpu.memory_space<vmem>>, vector<1x128x128xf32>
    %114 = vector.shape_cast %113 : vector<1x128x128xf32> to vector<128x128xf32>
    %115 = vector.shape_cast %112 : vector<128x128xf32> to vector<1x128x128xf32>
    tpu.vector_store %arg15[%c2_70, %c0_71, %c0_72], %115 {strides = array<i32>} : memref<3x128x128xf32, #tpu.memory_space<vmem>>, vector<1x128x128xf32>,
    %c2_73 = arith.constant 2 : index
    %c0_74 = arith.constant 0 : index
    %c0_75 = arith.constant 0 : index
    %116 = vector.load %arg13[%c2_73, %c0_74, %c0_75] : memref<3x128x1xf32, #tpu.memory_space<vmem>>, vector<1x128x1xf32>
    %117 = vector.shape_cast %116 : vector<1x128x1xf32> to vector<128x1xf32>
    %118 = vector.shape_cast %92 : vector<128x1xf32> to vector<1x128x1xf32>
    tpu.vector_store %arg13[%c2_73, %c0_74, %c0_75], %118 {strides = array<i32>} : memref<3x128x1xf32, #tpu.memory_space<vmem>>, vector<1x128x1xf32>,
    %c0_i32_76 = arith.constant 0 : i32
    %119 = arith.cmpi eq, %arg1, %c0_i32_76 : i32
    %120 = arith.extui %119 : i1 to i32
    %c0_i32_77 = arith.constant 0 : i32
    %121 = arith.cmpi ne, %120, %c0_i32_77 : i32
    scf.if %121 {
      %c0_78 = arith.constant 0 : index
      %c384 = arith.constant 384 : index
      %122 = vector.load %arg12[%c0_78, %c384] : memref<128x512xf32, #tpu.memory_space<vmem>>, vector<128x128xf32>
      %c0_79 = arith.constant 0 : index
      %c0_80 = arith.constant 0 : index
      %c0_81 = arith.constant 0 : index
      %123 = vector.load %arg13[%c0_79, %c0_80, %c0_81] : memref<3x128x1xf32, #tpu.memory_space<vmem>>, vector<1x128x1xf32>
      %124 = vector.shape_cast %123 : vector<1x128x1xf32> to vector<128x1xf32>
      %cst_82 = arith.constant -1.000000e+29 : f32
      %125 = vector.broadcast %cst_82 : f32 to vector<128x1xf32>
      %126 = arith.cmpf ogt, %124, %125 : vector<128x1xf32>
      %c0_83 = arith.constant 0 : index
      %c0_84 = arith.constant 0 : index
      %c0_85 = arith.constant 0 : index
      %127 = vector.load %arg14[%c0_83, %c0_84, %c0_85] : memref<3x128x1xf32, #tpu.memory_space<vmem>>, vector<1x128x1xf32>
      %128 = vector.shape_cast %127 : vector<1x128x1xf32> to vector<128x1xf32>
      %cst_86 = arith.constant 1.000000e-30 : f32
      %129 = vector.broadcast %cst_86 : f32 to vector<128x1xf32>
      %130 = arith.maximumf %128, %129 : vector<128x1xf32>
      %cst_87 = arith.constant 1.000000e+00 : f32
      %131 = vector.broadcast %cst_87 : f32 to vector<128x1xf32>
      %132 = arith.divf %131, %130 : vector<128x1xf32>
      %cst_88 = arith.constant 0.000000e+00 : f32
      %133 = vector.broadcast %cst_88 : f32 to vector<128x1xf32>
      %134 = arith.select %126, %132, %133 : vector<128x1xi1>, vector<128x1xf32>
      %c0_89 = arith.constant 0 : index
      %c0_90 = arith.constant 0 : index
      %c0_91 = arith.constant 0 : index
      %135 = vector.load %arg15[%c0_89, %c0_90, %c0_91] : memref<3x128x128xf32, #tpu.memory_space<vmem>>, vector<1x128x128xf32>
      %136 = vector.shape_cast %135 : vector<1x128x128xf32> to vector<128x128xf32>
      %137 = vector.broadcast %134 : vector<128x1xf32> to vector<128x128xf32>
      %138 = arith.mulf %136, %137 : vector<128x128xf32>
      %139 = arith.addf %122, %138 : vector<128x128xf32>
      %c1_92 = arith.constant 1 : index
      %c0_93 = arith.constant 0 : index
      %c0_94 = arith.constant 0 : index
      %140 = vector.load %arg13[%c1_92, %c0_93, %c0_94] : memref<3x128x1xf32, #tpu.memory_space<vmem>>, vector<1x128x1xf32>
      %141 = vector.shape_cast %140 : vector<1x128x1xf32> to vector<128x1xf32>
      %cst_95 = arith.constant -1.000000e+29 : f32
      %142 = vector.broadcast %cst_95 : f32 to vector<128x1xf32>
      %143 = arith.cmpf ogt, %141, %142 : vector<128x1xf32>
      %c1_96 = arith.constant 1 : index
      %c0_97 = arith.constant 0 : index
      %c0_98 = arith.constant 0 : index
      %144 = vector.load %arg14[%c1_96, %c0_97, %c0_98] : memref<3x128x1xf32, #tpu.memory_space<vmem>>, vector<1x128x1xf32>
      %145 = vector.shape_cast %144 : vector<1x128x1xf32> to vector<128x1xf32>
      %cst_99 = arith.constant 1.000000e-30 : f32
      %146 = vector.broadcast %cst_99 : f32 to vector<128x1xf32>
      %147 = arith.maximumf %145, %146 : vector<128x1xf32>
      %cst_100 = arith.constant 1.000000e+00 : f32
      %148 = vector.broadcast %cst_100 : f32 to vector<128x1xf32>
      %149 = arith.divf %148, %147 : vector<128x1xf32>
      %cst_101 = arith.constant 0.000000e+00 : f32
      %150 = vector.broadcast %cst_101 : f32 to vector<128x1xf32>
      %151 = arith.select %143, %149, %150 : vector<128x1xi1>, vector<128x1xf32>
      %c1_102 = arith.constant 1 : index
      %c0_103 = arith.constant 0 : index
      %c0_104 = arith.constant 0 : index
      %152 = vector.load %arg15[%c1_102, %c0_103, %c0_104] : memref<3x128x128xf32, #tpu.memory_space<vmem>>, vector<1x128x128xf32>
      %153 = vector.shape_cast %152 : vector<1x128x128xf32> to vector<128x128xf32>
      %154 = vector.broadcast %151 : vector<128x1xf32> to vector<128x128xf32>
      %155 = arith.mulf %153, %154 : vector<128x128xf32>
      %156 = arith.addf %139, %155 : vector<128x128xf32>
      %c2_105 = arith.constant 2 : index
      %c0_106 = arith.constant 0 : index
      %c0_107 = arith.constant 0 : index
      %157 = vector.load %arg13[%c2_105, %c0_106, %c0_107] : memref<3x128x1xf32, #tpu.memory_space<vmem>>, vector<1x128x1xf32>
      %158 = vector.shape_cast %157 : vector<1x128x1xf32> to vector<128x1xf32>
      %cst_108 = arith.constant -1.000000e+29 : f32
      %159 = vector.broadcast %cst_108 : f32 to vector<128x1xf32>
      %160 = arith.cmpf ogt, %158, %159 : vector<128x1xf32>
      %c2_109 = arith.constant 2 : index
      %c0_110 = arith.constant 0 : index
      %c0_111 = arith.constant 0 : index
      %161 = vector.load %arg14[%c2_109, %c0_110, %c0_111] : memref<3x128x1xf32, #tpu.memory_space<vmem>>, vector<1x128x1xf32>
      %162 = vector.shape_cast %161 : vector<1x128x1xf32> to vector<128x1xf32>
      %cst_112 = arith.constant 1.000000e-30 : f32
      %163 = vector.broadcast %cst_112 : f32 to vector<128x1xf32>
      %164 = arith.maximumf %162, %163 : vector<128x1xf32>
      %cst_113 = arith.constant 1.000000e+00 : f32
      %165 = vector.broadcast %cst_113 : f32 to vector<128x1xf32>
      %166 = arith.divf %165, %164 : vector<128x1xf32>
      %cst_114 = arith.constant 0.000000e+00 : f32
      %167 = vector.broadcast %cst_114 : f32 to vector<128x1xf32>
      %168 = arith.select %160, %166, %167 : vector<128x1xi1>, vector<128x1xf32>
      %c2_115 = arith.constant 2 : index
      %c0_116 = arith.constant 0 : index
      %c0_117 = arith.constant 0 : index
      %169 = vector.load %arg15[%c2_115, %c0_116, %c0_117] : memref<3x128x128xf32, #tpu.memory_space<vmem>>, vector<1x128x128xf32>
      %170 = vector.shape_cast %169 : vector<1x128x128xf32> to vector<128x128xf32>
      %171 = vector.broadcast %168 : vector<128x1xf32> to vector<128x128xf32>
      %172 = arith.mulf %170, %171 : vector<128x128xf32>
      %173 = arith.addf %156, %172 : vector<128x128xf32>
      %c0_118 = arith.constant 0 : index
      %c0_119 = arith.constant 0 : index
      %174 = vector.load %arg9[%c0_118, %c0_119] : memref<128x128xf32, #tpu.memory_space<vmem>>, vector<128x128xf32>
      %cst_120 = arith.constant dense<0.000000e+00> : vector<128x128xf32>
      %175 = tpu.matmul %173, %174, %cst_120 {dimension_numbers = #tpu.dot_dimension_numbers<[1], [0], [0], [1], [0, 0, 1, 1], [], []>} : vector<128x128xf32>, vector<128x128xf32>, vector<128x128xf32> -> vector<128x128xf32>
      %c0_121 = arith.constant 0 : index
      %c0_122 = arith.constant 0 : index
      %176 = vector.load %arg10[%c0_121, %c0_122] : memref<1x128xf32, #tpu.memory_space<vmem>>, vector<1x128xf32>
      %177 = vector.broadcast %176 : vector<1x128xf32> to vector<128x128xf32>
      %178 = arith.addf %175, %177 : vector<128x128xf32>
      %c0_123 = arith.constant 0 : index
      %c0_124 = arith.constant 0 : index
      %179 = vector.load %arg11[%c0_123, %c0_124] : memref<128x128xf32, #tpu.memory_space<vmem>>, vector<128x128xf32>
      tpu.vector_store %arg11[%c0_123, %c0_124], %178 {strides = array<i32>} : memref<128x128xf32, #tpu.memory_space<vmem>>, vector<128x128xf32>,
    } else {
    }
    return
  }
  func.func @transform_0(%arg0: i32, %arg1: i32) -> (i32, i32) {
    %c0_i32 = arith.constant 0 : i32
    %c0_i32_0 = arith.constant 0 : i32
    return %arg0, %c0_i32 : i32, i32
  }
  func.func @transform_1(%arg0: i32, %arg1: i32) -> (i32, i32) {
    %c0_i32 = arith.constant 0 : i32
    %c0_i32_0 = arith.constant 0 : i32
    return %arg1, %c0_i32 : i32, i32
  }
  func.func @transform_2(%arg0: i32, %arg1: i32) -> (i32, i32) {
    %c0_i32 = arith.constant 0 : i32
    %c0_i32_0 = arith.constant 0 : i32
    %c0_i32_1 = arith.constant 0 : i32
    return %c0_i32, %c0_i32_0 : i32, i32
  }
  func.func @transform_3(%arg0: i32, %arg1: i32) -> (i32, i32) {
    %c0_i32 = arith.constant 0 : i32
    %c0_i32_0 = arith.constant 0 : i32
    %c0_i32_1 = arith.constant 0 : i32
    return %c0_i32, %c0_i32_0 : i32, i32
  }
  func.func @transform_4(%arg0: i32, %arg1: i32) -> (i32, i32) {
    %c0_i32 = arith.constant 0 : i32
    %c0_i32_0 = arith.constant 0 : i32
    %c0_i32_1 = arith.constant 0 : i32
    return %c0_i32, %c0_i32_0 : i32, i32
  }
  func.func @transform_5(%arg0: i32, %arg1: i32) -> (i32, i32) {
    %c0_i32 = arith.constant 0 : i32
    %c0_i32_0 = arith.constant 0 : i32
    %c0_i32_1 = arith.constant 0 : i32
    return %c0_i32, %c0_i32_0 : i32, i32
  }
  func.func @transform_6(%arg0: i32, %arg1: i32) -> (i32, i32) {
    %c0_i32 = arith.constant 0 : i32
    return %arg0, %arg1 : i32, i32
  }
  func.func @transform_7(%arg0: i32, %arg1: i32) -> (i32, i32) {
    %c0_i32 = arith.constant 0 : i32
    %c0_i32_0 = arith.constant 0 : i32
    %c0_i32_1 = arith.constant 0 : i32
    return %c0_i32, %c0_i32_0 : i32, i32
  }
  func.func @transform_8(%arg0: i32, %arg1: i32) -> (i32, i32) {
    %c0_i32 = arith.constant 0 : i32
    %c0_i32_0 = arith.constant 0 : i32
    %c0_i32_1 = arith.constant 0 : i32
    return %c0_i32, %c0_i32_0 : i32, i32
  }
  func.func @transform_9(%arg0: i32, %arg1: i32) -> (i32, i32) {
    %c0_i32 = arith.constant 0 : i32
    %c0_i32_0 = arith.constant 0 : i32
    return %arg0, %c0_i32 : i32, i32
  }
}

</mosaic_0001>

<bundles_post_ra>
// kernel: tpu_custom_call.1
= control target key start
LH: loop header
LB: loop body
LE: loop exit
PB: predicated region body
PF: predicated region fallthrough
CT: control target
= control target key end

     0   :  { %14 = vsyncpa [#allocation7], 0  ;;  %s8760_s0 = inlined_call_operand.vmem [shape: f32[128,32], index: 0, kind: input, shape index: {}]   ;;  %s8761_s1 = inlined_call_operand.vmem [shape: f32[128,32], index: 1, kind: input, shape index: {}]   ;;  %s8762_s2 = inlined_call_operand.vmem [shape: f32[32,512], index: 2, kind: input, shape index: {}]   ;;  %s8763_s3 = inlined_call_operand.vmem [shape: f32[1,512], index: 3, kind: input, shape index: {}]   ;;  %s8764_s4 = inlined_call_operand.vmem [shape: f32[32,768], index: 4, kind: input, shape index: {}]   ;;  %s8765_s5 = inlined_call_operand.vmem [shape: f32[1,768], index: 5, kind: input, shape index: {}]   ;;  %s8766_s6 = inlined_call_operand.hbm [shape: bf16[128,128], index: 6, kind: input, shape index: {}]   ;;  %s8767_s7 = inlined_call_operand.hbm [shape: f32[128,128], index: 7, kind: input, shape index: {}]   ;;  %s8768_s8 = inlined_call_operand.vmem [shape: f32[1,128], index: 8, kind: input, shape index: {}]   ;;  %s8769_s9 = inlined_call_operand.hbm [shape: f32[128,128], index: 9, kind: output, shape index: {}]  }
   0x1   :  { %15 = vsyncpa [#allocation10], 0 }
   0x2   :  { %16 = vsyncpa [#allocation8], 0  ;;  %s6061_s30 = smov [#allocation6]   ;;  %s5989_s13 = scalar_lea.hbm %s8766_s6, 1024 }
   0x3   :  { %s34_s10 = sshll.u32 %s6061_s30, 4  ;;  %p5990_p0 = scmp.ne.s32.totalorder %s8766_s6, %s5989_s13  ;;  %s35_s10 = int_to_ptr.vmem [resolvable:$true] %s34_s10 }
   0x4   :  { %p5993_p1 = scmp.lt.u32.totalorder %s5989_s13, %s8766_s6 }
   0x6   :  { %p5995_p2 = pnand %p5993_p1, %p5990_p0 }
   0x8   :  { %5998 = shalt.err (!%p5995_p2)
}
   0x9   :  { %s5999_s18 = scalar_lea.vmem %s35_s10, 1024  ;;  %p6004_p4 = scmp.lt.s32.totalorder %s35_s10, %s35_s10 }
   0xa   :  { %p6000_p3 = scmp.ne.s32.totalorder %s35_s10, %s5999_s18  ;;  %p6005_p5 = scmp.lt.s32.totalorder %s5999_s18, %s5999_s18 }
   0xc   :  { %p6006_p6 = por %p6005_p5, %p6004_p4 }
   0xe   :  { %p6007_p7 = pnand %p6006_p6, %p6000_p3 }
  0x10   :  { %6010 = shalt.err (!%p6007_p7)
}
  0x11   :  { %s6062_s19 = smov 64   ;;  %s6063_s20 = smov 4  }
  0x12   :  { %40 = dma.hbm_to_vmem [thread:$0]  %s8766_s6, 1024, %s35_s10, [#allocation7], %s6062_s19, %s6062_s19, %s6063_s20  }
  0x13   :  { %s6064_s23 = smov [#allocation9]   ;;  %s6011_s27 = scalar_lea.hbm %s8767_s7, 2048 }
  0x14   :  { %s46_s24 = sshll.u32 %s6064_s23, 4  ;;  %p6012_p8 = scmp.ne.s32.totalorder %s8767_s7, %s6011_s27  ;;  %s47_s24 = int_to_ptr.vmem [resolvable:$true] %s46_s24 }
  0x15   :  { %p6015_p9 = scmp.lt.u32.totalorder %s6011_s27, %s8767_s7 }
  0x17   :  { %p6017_p10 = pnand %p6015_p9, %p6012_p8 }
  0x19   :  { %6020 = shalt.err (!%p6017_p10)
}
  0x1a   :  { %s6021_s12 = scalar_lea.vmem %s47_s24, 2048  ;;  %p6026_p12 = scmp.lt.s32.totalorder %s47_s24, %s47_s24 }
  0x1b   :  { %p6022_p11 = scmp.ne.s32.totalorder %s47_s24, %s6021_s12  ;;  %p6027_p13 = scmp.lt.s32.totalorder %s6021_s12, %s6021_s12 }
  0x1d   :  { %p6028_p0 = por %p6027_p13, %p6026_p12 }
  0x1f   :  { %p6029_p1 = pnand %p6028_p0, %p6022_p11 }
  0x21   :  { %6032 = shalt.err (!%p6029_p1)
}
  0x22   :  { %s6065_s6 = smov 128   ;;  %s6066_s10 = smov 8  }
  0x23   :  { %52 = dma.hbm_to_vmem [thread:$0]  %s8767_s7, 2048, %s47_s24, [#allocation10], %s6065_s6, %s6065_s6, %s6066_s10  }
  0x24   :  { %6055 = dma.done.wait [#allocation7], 1024  }
  0x25   :  { %6056 = vsyncadd [#allocation7], 4294966272 }
  0x26   :  { %6057 = dma.done.wait [#allocation10], 2048  }
  0x27   :  { %6058 = vsyncadd [#allocation10], 4294965248  ;;  %v8770_v0 = vmov 0.0   ;;  %v82_v1 = vld [vmem:[%s8762_s2 + $0x8] sm:$0xff]  ;;  %v81_v3 = vld [vmem:[%s8762_s2] sm:$0xff]  ;;  %vm119_vm0 = vcmask 261120  }
  0x28   :  { %232 = vmatprep.mubr.f32.mxu0 %v8770_v0  ;;  %393 = vmatprep.mubr.f32.mxu1 %v8770_v0  ;;  %v86_v2 = vld [vmem:[%s8762_s2 + $0x28] sm:$0xff]  ;;  %v85_v5 = vld [vmem:[%s8762_s2 + $0x20] sm:$0xff]  ;;  %v722_v13 = vld [vmem:[%s8764_s4 + $0x38] sm:$0xff]  ;;  %vm554_vm1 = vcmask 7168  }
  0x29   :  { %v5425_v4 = vpack.c.bf16 %v86_v2, %v82_v1  ;;  %v90_v6 = vld [vmem:[%s8762_s2 + $0x48] sm:$0xff]  ;;  %v5427_v8 = vpack.c.bf16 %v85_v5, %v81_v3  ;;  %v89_v10 = vld [vmem:[%s8762_s2 + $0x40] sm:$0xff]  ;;  %v721_v17 = vld [vmem:[%s8764_s4 + $0x30] sm:$0xff] }
  0x2a   :  { %v94_v7 = vld [vmem:[%s8762_s2 + $0x68] sm:$0xff]  ;;  %v93_v11 = vld [vmem:[%s8762_s2 + $0x60] sm:$0xff]  ;;  %v734_v19 = vld [vmem:[%s8764_s4 + $0x98] sm:$0xff] }
  0x2b   :  { %v5429_v9 = vpack.c.bf16 %v94_v7, %v90_v6  ;;  %5426 = vmatprep.subr.bf16.mxu0 %v5425_v4  ;;  %v716_v12 = vld [vmem:[%s8764_s4 + $0x8] sm:$0xff]  ;;  %v5431_v14 = vpack.c.bf16 %v93_v11, %v89_v10  ;;  %v715_v16 = vld [vmem:[%s8764_s4] sm:$0xff]  ;;  %v733_v24 = vld [vmem:[%s8764_s4 + $0x90] sm:$0xff] }
  0x2c   :  { %5428 = vmatpush1.bf16.msra.mxu0 %v5427_v8  ;;  %v5441_v15 = vpack.c.bf16 %v722_v13, %v716_v12  ;;  %v728_v18 = vld [vmem:[%s8764_s4 + $0x68] sm:$0xff]  ;;  %v65_v20 = vld [vmem:[%s8760_s0] sm:$0xff]  ;;  %v5443_v21 = vpack.c.bf16 %v721_v17, %v715_v16  ;;  %v84_v25 = vld [vmem:[%s8762_s2 + $0x18] sm:$0xff] }
  0x2d   :  { %5430 = vmatprep.subr.bf16.mxu0 %v5429_v9  ;;  %v5445_v22 = vpack.c.bf16 %v734_v19, %v728_v18  ;;  %v727_v23 = vld [vmem:[%s8764_s4 + $0x60] sm:$0xff]  ;;  %v88_v26 = vld [vmem:[%s8762_s2 + $0x38] sm:$0xff]  ;;  %v66_v27 = vld [vmem:[%s8760_s0 + $0x8] sm:$0xff] }
  0x2e   :  { %v5433_v28 = vpack.c.bf16 %v88_v26, %v84_v25  ;;  %v83_v29 = vld [vmem:[%s8762_s2 + $0x10] sm:$0xff]  ;;  %v5447_v31 = vpack.c.bf16 %v733_v24, %v727_v23  ;;  %v92_v33 = vld [vmem:[%s8762_s2 + $0x58] sm:$0xff]  ;;  %v724_v41 = vld [vmem:[%s8764_s4 + $0x48] sm:$0xff] }
  0x2f   :  { %v87_v30 = vld [vmem:[%s8762_s2 + $0x30] sm:$0xff]  ;;  %v96_v34 = vld [vmem:[%s8762_s2 + $0x78] sm:$0xff]  ;;  %v723_v43 = vld [vmem:[%s8764_s4 + $0x40] sm:$0xff] }
  0x30   :  { %5432 = vmatpush1.bf16.msra.mxu0 %v5431_v14  ;;  %v5435_v32 = vpack.c.bf16 %v87_v30, %v83_v29  ;;  %v91_v35 = vld [vmem:[%s8762_s2 + $0x50] sm:$0xff]  ;;  %5434 = vmatprep.subr.bf16.mxu1 %v5433_v28  ;;  %v5437_v36 = vpack.c.bf16 %v96_v34, %v92_v33  ;;  %v718_v40 = vld [vmem:[%s8764_s4 + $0x18] sm:$0xff]  ;;  %v736_v48 = vld [vmem:[%s8764_s4 + $0xa8] sm:$0xff]  ;;  %v99_v30 = vlaneseq }
  0x31   :  { %5442 = vmatprep.subr.bf16.mxu0 %v5441_v15  ;;  %v95_v37 = vld [vmem:[%s8762_s2 + $0x70] sm:$0xff]  ;;  %v5449_v44 = vpack.c.bf16 %v724_v41, %v718_v40  ;;  %v68_v46 = vld [vmem:[%s8760_s0 + $0x18] sm:$0xff]  ;;  %v735_v51 = vld [vmem:[%s8764_s4 + $0xa0] sm:$0xff] }
  0x32   :  { %5436 = vmatpush1.bf16.msra.mxu1 %v5435_v32  ;;  %v5439_v38 = vpack.c.bf16 %v95_v37, %v91_v35  ;;  %v67_v39 = vld [vmem:[%s8760_s0 + $0x10] sm:$0xff]  ;;  %v730_v47 = vld [vmem:[%s8764_s4 + $0x78] sm:$0xff]  ;;  %v720_v52 = vld [vmem:[%s8764_s4 + $0x28] sm:$0xff] }
  0x33   :  { %4689 = vmatmul.mubr.msk.f32.vlgmr.msra.gmra.mrb[0].mxu0 %vm119_vm0, %v65_v20  ;;  %5438 = vmatprep.subr.bf16.mxu1 %v5437_v36  ;;  %v717_v42 = vld [vmem:[%s8764_s4 + $0x10] sm:$0xff]  ;;  %v5453_v50 = vpack.c.bf16 %v736_v48, %v730_v47  ;;  %v726_v53 = vld [vmem:[%s8764_s4 + $0x58] sm:$0xff]  ;;  %v69_v56 = vld [vmem:[%s8760_s0 + $0x20] sm:$0xff] }
  0x34   :  { %5444 = vmatpush1.bf16.msra.mxu0 %v5443_v21  ;;  %238 = vmatprep.mubr.f32.mxu0 %v8770_v0  ;;  %v5451_v45 = vpack.c.bf16 %v723_v43, %v717_v42  ;;  %v729_v49 = vld [vmem:[%s8764_s4 + $0x70] sm:$0xff]  ;;  %v5457_v55 = vpack.c.bf16 %v726_v53, %v720_v52  ;;  %v70_v57 = vld [vmem:[%s8760_s0 + $0x28] sm:$0xff]  ;;  %v72_v59 = vld [vmem:[%s8760_s0 + $0x38] sm:$0xff] }
  0x35   :  { %5446 = vmatprep.subr.bf16.mxu0 %v5445_v22  ;;  %v5455_v54 = vpack.c.bf16 %v735_v51, %v729_v49  ;;  %v71_v58 = vld [vmem:[%s8760_s0 + $0x30] sm:$0xff]  ;;  %v73_v60 = vld [vmem:[%s8760_s0 + $0x40] sm:$0xff]  ;;  %v74_v61 = vld [vmem:[%s8760_s0 + $0x48] sm:$0xff] }
  0x36   :  { %5440 = vmatpush1.bf16.msra.mxu1 %v5439_v38  ;;  %v75_v62 = vld [vmem:[%s8760_s0 + $0x50] sm:$0xff]  ;;  %v76_v63 = vld [vmem:[%s8760_s0 + $0x58] sm:$0xff]  ;;  %v77_v1 = vld [vmem:[%s8760_s0 + $0x60] sm:$0xff] }
  0x37   :  { %4690 = vmatmul.mubr.msk.f32.gmra.mrb[2].mxu0 %vm119_vm0, %v66_v27  ;;  %5450 = vmatprep.subr.bf16.mxu1 %v5449_v44  ;;  %v78_v2 = vld [vmem:[%s8760_s0 + $0x68] sm:$0xff]  ;;  %v79_v3 = vld [vmem:[%s8760_s0 + $0x70] sm:$0xff]  ;;  %v80_v4 = vld [vmem:[%s8760_s0 + $0x78] sm:$0xff] }
  0x38   :  { %244 = vmatprep.mubr.f32.mxu0 %v8770_v0  ;;  %5448 = vmatpush1.bf16.msra.mxu0 %v5447_v31  ;;  %v719_v5 = vld [vmem:[%s8764_s4 + $0x20] sm:$0xff]  ;;  %v725_v6 = vld [vmem:[%s8764_s4 + $0x50] sm:$0xff]  ;;  %v732_v7 = vld [vmem:[%s8764_s4 + $0x88] sm:$0xff]  ;;  %v6564_v31 = vshrl.u32 %v99_v30, 7 }
  0x39   :  { %4705 = vmatmul.mubr.msk.f32.vlgmr.msra.gmra.mrb[0].mxu1 %vm119_vm0, %v65_v20  ;;  %5458 = vmatprep.subr.bf16.mxu0 %v5457_v55  ;;  %v738_v8 = vld [vmem:[%s8764_s4 + $0xb8] sm:$0xff]  ;;  %v6373_v9 = vld [vmem:[%s8761_s1] sm:$0xff]  ;;  %v5459_v10 = vpack.c.bf16 %v725_v6, %v719_v5  ;;  %v737_v13 = vld [vmem:[%s8764_s4 + $0xb0] sm:$0xff] }
  0x3a   :  { %399 = vmatprep.mubr.f32.mxu1 %v8770_v0  ;;  %5452 = vmatpush1.bf16.msra.mxu1 %v5451_v45  ;;  %v5461_v11 = vpack.c.bf16 %v738_v8, %v732_v7  ;;  %v731_v12 = vld [vmem:[%s8764_s4 + $0x80] sm:$0xff]  ;;  %v6389_v14 = vld [vmem:[%s8761_s1 + $0x8] sm:$0xff]  ;;  %v6399_v16 = vld [vmem:[%s8761_s1 + $0x10] sm:$0xff]  ;;  %v8773_v32 = vsub.s32 0, %v6564_v31  ;;  %v8774_v34 = vsub.s32 1, %v6564_v31  ;;  %v8772_v42 = vsub.s32 3, %v6564_v31 }
  0x3b   :  { %4691 = vmatmul.mubr.msk.f32.gmra.mrb[4].mxu0 %vm119_vm0, %v67_v39  ;;  %5454 = vmatprep.subr.bf16.mxu1 %v5453_v50  ;;  %v5463_v15 = vpack.c.bf16 %v737_v13, %v731_v12  ;;  %v6409_v17 = vld [vmem:[%s8761_s1 + $0x18] sm:$0xff]  ;;  %v6420_v18 = vld [vmem:[%s8761_s1 + $0x20] sm:$0xff]  ;;  %v6431_v19 = vld [vmem:[%s8761_s1 + $0x28] sm:$0xff] }
  0x3c   :  { %250 = vmatprep.mubr.f32.mxu0 %v8770_v0  ;;  %v6442_v20 = vld [vmem:[%s8761_s1 + $0x30] sm:$0xff]  ;;  %v6453_v21 = vld [vmem:[%s8761_s1 + $0x38] sm:$0xff]  ;;  %v707_v22 = vld [vmem:[%s8761_s1 + $0x40] sm:$0xff] }
  0x3d   :  { %4706 = vmatmul.mubr.msk.f32.gmra.mrb[2].mxu1 %vm119_vm0, %v66_v27  ;;  %v708_v23 = vld [vmem:[%s8761_s1 + $0x48] sm:$0xff]  ;;  %v709_v24 = vld [vmem:[%s8761_s1 + $0x50] sm:$0xff]  ;;  %v710_v25 = vld [vmem:[%s8761_s1 + $0x58] sm:$0xff] }
  0x3e   :  { %405 = vmatprep.mubr.f32.mxu1 %v8770_v0  ;;  %5456 = vmatpush1.bf16.msra.mxu1 %v5455_v54  ;;  %v711_v26 = vld [vmem:[%s8761_s1 + $0x60] sm:$0xff]  ;;  %v712_v27 = vld [vmem:[%s8761_s1 + $0x68] sm:$0xff]  ;;  %v713_v28 = vld [vmem:[%s8761_s1 + $0x70] sm:$0xff] }
  0x3f   :  { %4692 = vmatmul.mubr.msk.f32.gmra.mrb[6].mxu0 %vm119_vm0, %v68_v46  ;;  %v714_v29 = vld [vmem:[%s8761_s1 + $0x78] sm:$0xff]  ;;  %v6570_v33 = vld [vmem:[%s8763_s3] sm:$0xf] }
  0x40   :  { %256 = vmatprep.mubr.f32.mxu0 %v8770_v0  ;;  %v6576_v35 = vrot.slane %v6570_v33, %v8773_v32  ;;  %v6581_v36 = vrot.slane %v6570_v33, %v8774_v34  ;;  %v6595_v47 = vrot.slane %v6570_v33, %v8772_v42 }
  0x41   :  { %4707 = vmatmul.mubr.msk.f32.gmra.mrb[4].mxu1 %vm119_vm0, %v67_v39 }
  0x42   :  { %411 = vmatprep.mubr.f32.mxu1 %v8770_v0 }
  0x43   :  { %4693 = vmatmul.mubr.msk.f32.gmra.mrb[8].mxu0 %vm119_vm0, %v69_v56 }
  0x44   :  { %262 = vmatprep.mubr.f32.mxu0 %v8770_v0 }
  0x45   :  { %4708 = vmatmul.mubr.msk.f32.gmra.mrb[6].mxu1 %vm119_vm0, %v68_v46 }
  0x46   :  { %417 = vmatprep.mubr.f32.mxu1 %v8770_v0 }
  0x47   :  { %4694 = vmatmul.mubr.msk.f32.gmra.mrb[10].mxu0 %vm119_vm0, %v70_v57 }
  0x48   :  { %268 = vmatprep.mubr.f32.mxu0 %v8770_v0 }
  0x49   :  { %4709 = vmatmul.mubr.msk.f32.gmra.mrb[8].mxu1 %vm119_vm0, %v69_v56 }
  0x4a   :  { %423 = vmatprep.mubr.f32.mxu1 %v8770_v0 }
  0x4b   :  { %4695 = vmatmul.mubr.msk.f32.gmra.mrb[12].mxu0 %vm119_vm0, %v71_v58 }
  0x4c   :  { %274 = vmatprep.mubr.f32.mxu0 %v8770_v0 }
  0x4d   :  { %4710 = vmatmul.mubr.msk.f32.gmra.mrb[10].mxu1 %vm119_vm0, %v70_v57 }
  0x4e   :  { %429 = vmatprep.mubr.f32.mxu1 %v8770_v0 }
  0x4f   :  { %4696 = vmatmul.mubr.msk.f32.gmra.mrb[14].mxu0 %vm119_vm0, %v72_v59 }
  0x50   :  { %280 = vmatprep.mubr.f32.mxu0 %v8770_v0 }
  0x51   :  { %4711 = vmatmul.mubr.msk.f32.gmra.mrb[12].mxu1 %vm119_vm0, %v71_v58 }
  0x52   :  { %435 = vmatprep.mubr.f32.mxu1 %v8770_v0 }
  0x53   :  { %4697 = vmatmul.mubr.msk.f32.gmra.mrb[16].mxu0 %vm119_vm0, %v73_v60 }
  0x54   :  { %286 = vmatprep.mubr.f32.mxu0 %v8770_v0 }
  0x55   :  { %4712 = vmatmul.mubr.msk.f32.gmra.mrb[14].mxu1 %vm119_vm0, %v72_v59 }
  0x56   :  { %441 = vmatprep.mubr.f32.mxu1 %v8770_v0 }
  0x57   :  { %4698 = vmatmul.mubr.msk.f32.gmra.mrb[18].mxu0 %vm119_vm0, %v74_v61 }
  0x58   :  { %292 = vmatprep.mubr.f32.mxu0 %v8770_v0 }
  0x59   :  { %4713 = vmatmul.mubr.msk.f32.gmra.mrb[16].mxu1 %vm119_vm0, %v73_v60 }
  0x5a   :  { %447 = vmatprep.mubr.f32.mxu1 %v8770_v0 }
  0x5b   :  { %4699 = vmatmul.mubr.msk.f32.gmra.mrb[20].mxu0 %vm119_vm0, %v75_v62 }
  0x5c   :  { %298 = vmatprep.mubr.f32.mxu0 %v8770_v0 }
  0x5d   :  { %4714 = vmatmul.mubr.msk.f32.gmra.mrb[18].mxu1 %vm119_vm0, %v74_v61 }
  0x5e   :  { %453 = vmatprep.mubr.f32.mxu1 %v8770_v0 }
  0x5f   :  { %4700 = vmatmul.mubr.msk.f32.gmra.mrb[22].mxu0 %vm119_vm0, %v76_v63 }
  0x60   :  { %304 = vmatprep.mubr.f32.mxu0 %v8770_v0 }
  0x61   :  { %4715 = vmatmul.mubr.msk.f32.gmra.mrb[20].mxu1 %vm119_vm0, %v75_v62 }
  0x62   :  { %459 = vmatprep.mubr.f32.mxu1 %v8770_v0 }
  0x63   :  { %4701 = vmatmul.mubr.msk.f32.gmra.mrb[24].mxu0 %vm119_vm0, %v77_v1 }
  0x64   :  { %310 = vmatprep.mubr.f32.mxu0 %v8770_v0 }
  0x65   :  { %4716 = vmatmul.mubr.msk.f32.gmra.mrb[22].mxu1 %vm119_vm0, %v76_v63 }
  0x66   :  { %465 = vmatprep.mubr.f32.mxu1 %v8770_v0 }
  0x67   :  { %4702 = vmatmul.mubr.msk.f32.gmra.mrb[26].mxu0 %vm119_vm0, %v78_v2 }
  0x68   :  { %316 = vmatprep.mubr.f32.mxu0 %v8770_v0 }
  0x69   :  { %4717 = vmatmul.mubr.msk.f32.gmra.mrb[24].mxu1 %vm119_vm0, %v77_v1 }
  0x6a   :  { %471 = vmatprep.mubr.f32.mxu1 %v8770_v0 }
  0x6b   :  { %4703 = vmatmul.mubr.msk.f32.gmra.mrb[28].mxu0 %vm119_vm0, %v79_v3 }
  0x6c   :  { %322 = vmatprep.mubr.f32.mxu0 %v8770_v0 }
  0x6d   :  { %4718 = vmatmul.mubr.msk.f32.gmra.mrb[26].mxu1 %vm119_vm0, %v78_v2 }
  0x6e   :  { %477 = vmatprep.mubr.f32.mxu1 %v8770_v0 }
  0x6f   :  { %4704 = vmatmul.mubr.msk.f32.gmra.mrb[30].mxu0 %vm119_vm0, %v80_v4 }
  0x70   :  { %884 = vmatprep.mubr.f32.mxu0 %v8770_v0 }
  0x71   :  { %4719 = vmatmul.mubr.msk.f32.gmra.mrb[28].mxu1 %vm119_vm0, %v79_v3 }
  0x72   :  { %483 = vmatprep.mubr.f32.mxu1 %v8770_v0 }
  0x73   :  { %4721 = vmatmul.mubr.msk.f32.vlgmr.msra.gmra.mrb[32].mxu0 %vm119_vm0, %v6373_v9 }
  0x74   :  { %890 = vmatprep.mubr.f32.mxu0 %v8770_v0  ;;  %5460 = vmatpush1.bf16.msra.mxu0 %v5459_v10 }
  0x75   :  { %5462 = vmatprep.subr.bf16.mxu0 %v5461_v11  ;;  %4720 = vmatmul.mubr.msk.f32.gmra.mrb[30].mxu1 %vm119_vm0, %v80_v4 }
  0x76   :  { %1045 = vmatprep.mubr.f32.mxu1 %v8770_v0 }
  0x77   :  { %4722 = vmatmul.mubr.msk.f32.gmra.mrb[34].mxu0 %vm119_vm0, %v6389_v14 }
  0x78   :  { %896 = vmatprep.mubr.f32.mxu0 %v8770_v0  ;;  %5464 = vmatpush1.bf16.msra.mxu0 %v5463_v15 }
  0x79   :  { %4737 = vmatmul.mubr.msk.f32.vlgmr.msra.gmra.mrb[32].mxu1 %vm119_vm0, %v6373_v9 }
  0x7a   :  { %1051 = vmatprep.mubr.f32.mxu1 %v8770_v0 }
  0x7b   :  { %4723 = vmatmul.mubr.msk.f32.gmra.mrb[36].mxu0 %vm119_vm0, %v6399_v16 }
  0x7c   :  { %902 = vmatprep.mubr.f32.mxu0 %v8770_v0 }
  0x7d   :  { %4738 = vmatmul.mubr.msk.f32.gmra.mrb[34].mxu1 %vm119_vm0, %v6389_v14 }
  0x7e   :  { %1057 = vmatprep.mubr.f32.mxu1 %v8770_v0 }
  0x7f   :  { %4724 = vmatmul.mubr.msk.f32.gmra.mrb[38].mxu0 %vm119_vm0, %v6409_v17 }
  0x80   :  { %908 = vmatprep.mubr.f32.mxu0 %v8770_v0 }
  0x81   :  { %4739 = vmatmul.mubr.msk.f32.gmra.mrb[36].mxu1 %vm119_vm0, %v6399_v16 }
  0x82   :  { %1063 = vmatprep.mubr.f32.mxu1 %v8770_v0 }
  0x83   :  { %4725 = vmatmul.mubr.msk.f32.gmra.mrb[40].mxu0 %vm119_vm0, %v6420_v18 }
  0x84   :  { %914 = vmatprep.mubr.f32.mxu0 %v8770_v0 }
  0x85   :  { %4740 = vmatmul.mubr.msk.f32.gmra.mrb[38].mxu1 %vm119_vm0, %v6409_v17 }
  0x86   :  { %1069 = vmatprep.mubr.f32.mxu1 %v8770_v0 }
  0x87   :  { %4726 = vmatmul.mubr.msk.f32.gmra.mrb[42].mxu0 %vm119_vm0, %v6431_v19 }
  0x88   :  { %920 = vmatprep.mubr.f32.mxu0 %v8770_v0 }
  0x89   :  { %4741 = vmatmul.mubr.msk.f32.gmra.mrb[40].mxu1 %vm119_vm0, %v6420_v18 }
  0x8a   :  { %1075 = vmatprep.mubr.f32.mxu1 %v8770_v0 }
  0x8b   :  { %4727 = vmatmul.mubr.msk.f32.gmra.mrb[44].mxu0 %vm119_vm0, %v6442_v20 }
  0x8c   :  { %926 = vmatprep.mubr.f32.mxu0 %v8770_v0 }
  0x8d   :  { %4742 = vmatmul.mubr.msk.f32.gmra.mrb[42].mxu1 %vm119_vm0, %v6431_v19 }
  0x8e   :  { %1081 = vmatprep.mubr.f32.mxu1 %v8770_v0 }
  0x8f   :  { %4728 = vmatmul.mubr.msk.f32.gmra.mrb[46].mxu0 %vm119_vm0, %v6453_v21 }
  0x90   :  { %932 = vmatprep.mubr.f32.mxu0 %v8770_v0 }
  0x91   :  { %4743 = vmatmul.mubr.msk.f32.gmra.mrb[44].mxu1 %vm119_vm0, %v6442_v20 }
  0x92   :  { %1087 = vmatprep.mubr.f32.mxu1 %v8770_v0 }
  0x93   :  { %4729 = vmatmul.mubr.msk.f32.gmra.mrb[48].mxu0 %vm119_vm0, %v707_v22 }
  0x94   :  { %938 = vmatprep.mubr.f32.mxu0 %v8770_v0 }
  0x95   :  { %4744 = vmatmul.mubr.msk.f32.gmra.mrb[46].mxu1 %vm119_vm0, %v6453_v21 }
  0x96   :  { %1093 = vmatprep.mubr.f32.mxu1 %v8770_v0 }
  0x97   :  { %4730 = vmatmul.mubr.msk.f32.gmra.mrb[50].mxu0 %vm119_vm0, %v708_v23 }
  0x98   :  { %944 = vmatprep.mubr.f32.mxu0 %v8770_v0 }
  0x99   :  { %4745 = vmatmul.mubr.msk.f32.gmra.mrb[48].mxu1 %vm119_vm0, %v707_v22 }
  0x9a   :  { %1099 = vmatprep.mubr.f32.mxu1 %v8770_v0 }
  0x9b   :  { %4731 = vmatmul.mubr.msk.f32.gmra.mrb[52].mxu0 %vm119_vm0, %v709_v24 }
  0x9c   :  { %950 = vmatprep.mubr.f32.mxu0 %v8770_v0 }
  0x9d   :  { %4746 = vmatmul.mubr.msk.f32.gmra.mrb[50].mxu1 %vm119_vm0, %v708_v23 }
  0x9e   :  { %1105 = vmatprep.mubr.f32.mxu1 %v8770_v0 }
  0x9f   :  { %4732 = vmatmul.mubr.msk.f32.gmra.mrb[54].mxu0 %vm119_vm0, %v710_v25 }
  0xa0   :  { %956 = vmatprep.mubr.f32.mxu0 %v8770_v0 }
  0xa1   :  { %4747 = vmatmul.mubr.msk.f32.gmra.mrb[52].mxu1 %vm119_vm0, %v709_v24 }
  0xa2   :  { %1111 = vmatprep.mubr.f32.mxu1 %v8770_v0 }
  0xa3   :  { %4733 = vmatmul.mubr.msk.f32.gmra.mrb[56].mxu0 %vm119_vm0, %v711_v26 }
  0xa4   :  { %962 = vmatprep.mubr.f32.mxu0 %v8770_v0 }
  0xa5   :  { %4748 = vmatmul.mubr.msk.f32.gmra.mrb[54].mxu1 %vm119_vm0, %v710_v25 }
  0xa6   :  { %1117 = vmatprep.mubr.f32.mxu1 %v8770_v0 }
  0xa7   :  { %4734 = vmatmul.mubr.msk.f32.gmra.mrb[58].mxu0 %vm119_vm0, %v712_v27 }
  0xa8   :  { %968 = vmatprep.mubr.f32.mxu0 %v8770_v0 }
  0xa9   :  { %4749 = vmatmul.mubr.msk.f32.gmra.mrb[56].mxu1 %vm119_vm0, %v711_v26 }
  0xaa   :  { %1123 = vmatprep.mubr.f32.mxu1 %v8770_v0 }
  0xab   :  { %4735 = vmatmul.mubr.msk.f32.gmra.mrb[60].mxu0 %vm119_vm0, %v713_v28 }
  0xac   :  { %974 = vmatprep.mubr.f32.mxu0 %v8770_v0 }
  0xad   :  { %4750 = vmatmul.mubr.msk.f32.gmra.mrb[58].mxu1 %vm119_vm0, %v712_v27 }
  0xae   :  { %1129 = vmatprep.mubr.f32.mxu1 %v8770_v0 }
  0xaf   :  { %4736 = vmatmul.mubr.msk.f32.gmra.mrb[62].mxu0 %vm119_vm0, %v714_v29 }
  0xb0   :  { %1206 = vmatprep.mubr.f32.mxu0 %v8770_v0 }
  0xb1   :  { %4751 = vmatmul.mubr.msk.f32.gmra.mrb[60].mxu1 %vm119_vm0, %v713_v28 }
  0xb2   :  { %1135 = vmatprep.mubr.f32.mxu1 %v8770_v0 }
  0xb3   :  { %4753 = vmatmul.mubr.msk.f32.vlgmr.msra.gmra.mrb[64].mxu0 %vm119_vm0, %v6373_v9 }
  0xb4   :  { %1212 = vmatprep.mubr.f32.mxu0 %v8770_v0 }
  0xb5   :  { %4752 = vmatmul.mubr.msk.f32.gmra.mrb[62].mxu1 %vm119_vm0, %v714_v29 }
  0xb7   :  { %4754 = vmatmul.mubr.msk.f32.gmra.mrb[66].mxu0 %vm119_vm0, %v6389_v14 }
  0xb8   :  { %1218 = vmatprep.mubr.f32.mxu0 %v8770_v0 }
  0xbb   :  { %4755 = vmatmul.mubr.msk.f32.gmra.mrb[68].mxu0 %vm119_vm0, %v6399_v16 }
  0xbc   :  { %1224 = vmatprep.mubr.f32.mxu0 %v8770_v0 }
  0xbf   :  { %4756 = vmatmul.mubr.msk.f32.gmra.mrb[70].mxu0 %vm119_vm0, %v6409_v17 }
  0xc0   :  { %1230 = vmatprep.mubr.f32.mxu0 %v8770_v0 }
  0xc3   :  { %4757 = vmatmul.mubr.msk.f32.gmra.mrb[72].mxu0 %vm119_vm0, %v6420_v18 }
  0xc4   :  { %1236 = vmatprep.mubr.f32.mxu0 %v8770_v0 }
  0xc7   :  { %4758 = vmatmul.mubr.msk.f32.gmra.mrb[74].mxu0 %vm119_vm0, %v6431_v19 }
  0xc8   :  { %1242 = vmatprep.mubr.f32.mxu0 %v8770_v0 }
  0xcb   :  { %4759 = vmatmul.mubr.msk.f32.gmra.mrb[76].mxu0 %vm119_vm0, %v6442_v20 }
  0xcc   :  { %1248 = vmatprep.mubr.f32.mxu0 %v8770_v0 }
  0xcf   :  { %4760 = vmatmul.mubr.msk.f32.gmra.mrb[78].mxu0 %vm119_vm0, %v6453_v21 }
  0xd0   :  { %1254 = vmatprep.mubr.f32.mxu0 %v8770_v0 }
  0xd3   :  { %4761 = vmatmul.mubr.msk.f32.gmra.mrb[80].mxu0 %vm119_vm0, %v707_v22 }
  0xd4   :  { %1260 = vmatprep.mubr.f32.mxu0 %v8770_v0 }
  0xd7   :  { %4762 = vmatmul.mubr.msk.f32.gmra.mrb[82].mxu0 %vm119_vm0, %v708_v23 }
  0xd8   :  { %1266 = vmatprep.mubr.f32.mxu0 %v8770_v0 }
  0xdb   :  { %4763 = vmatmul.mubr.msk.f32.gmra.mrb[84].mxu0 %vm119_vm0, %v709_v24 }
  0xdc   :  { %1272 = vmatprep.mubr.f32.mxu0 %v8770_v0 }
  0xdf   :  { %4764 = vmatmul.mubr.msk.f32.gmra.mrb[86].mxu0 %vm119_vm0, %v710_v25 }
  0xe0   :  { %1278 = vmatprep.mubr.f32.mxu0 %v8770_v0 }
  0xe3   :  { %4765 = vmatmul.mubr.msk.f32.gmra.mrb[88].mxu0 %vm119_vm0, %v711_v26 }
  0xe4   :  { %1284 = vmatprep.mubr.f32.mxu0 %v8770_v0 }
  0xe7   :  { %4766 = vmatmul.mubr.msk.f32.gmra.mrb[90].mxu0 %vm119_vm0, %v712_v27 }
  0xe8   :  { %1290 = vmatprep.mubr.f32.mxu0 %v8770_v0 }
  0xeb   :  { %4767 = vmatmul.mubr.msk.f32.gmra.mrb[92].mxu0 %vm119_vm0, %v713_v28 }
  0xec   :  { %1296 = vmatprep.mubr.f32.mxu0 %v8770_v0 }
  0xef   :  { %4768 = vmatmul.mubr.msk.f32.gmra.mrb[94].mxu0 %vm119_vm0, %v714_v29 }
 0x106   :  { %v234_v37 = vpop.f32.mrb[0].mxu0 }
 0x107   :  { %v235_v38 = vadd.f32 %v234_v37, %v6576_v35  ;;  %v236_v39 = vpop.f32.mrb[1].mxu0 }
 0x108   :  { %v237_v40 = vadd.f32 %v236_v39, %v6581_v36 }
 0x109   :  { %5065 = vmatprep.mubr.f32.mxu1 %v235_v38 }
 0x10a   :  { %v240_v41 = vpop.f32.mrb[2].mxu0  ;;  %5177 = vmatprep.mubr.f32.mxu0 %v237_v40 }
 0x10b   :  { %v6587_v43 = vadd.f32 %v240_v41, %v6576_v35  ;;  %v242_v44 = vpop.f32.mrb[3].mxu0 }
 0x10c   :  { %v6590_v45 = vadd.f32 %v242_v44, %v6581_v36  ;;  %v6603_v51 = vpop.f32.mrb[0].mxu1 }
 0x10d   :  { %8868 = vst [vmem:[#allocation15_spill] sm:$0xff] %v6603_v51  ;;  %v397_v52 = vpop.f32.mrb[1].mxu1 }
 0x10e   :  { %v246_v46 = vpop.f32.mrb[4].mxu0  ;;  %v6606_v54 = vadd.f32 %v397_v52, %v6595_v47 }
 0x10f   :  { %v6598_v48 = vadd.f32 %v246_v46, %v6576_v35  ;;  %v248_v49 = vpop.f32.mrb[5].mxu0 }
 0x110   :  { %v6601_v50 = vadd.f32 %v248_v49, %v6581_v36  ;;  %8869 = vst [vmem:[#allocation16_spill] sm:$0xff] %v6606_v54  ;;  %v6614_v58 = vpop.f32.mrb[2].mxu1 }
 0x111   :  { %8870 = vst [vmem:[#allocation17_spill] sm:$0xff] %v6614_v58  ;;  %v403_v59 = vpop.f32.mrb[3].mxu1 }
 0x112   :  { %v252_v53 = vpop.f32.mrb[6].mxu0  ;;  %v6617_v61 = vadd.f32 %v403_v59, %v6595_v47 }
 0x113   :  { %v6609_v55 = vadd.f32 %v252_v53, %v6576_v35  ;;  %v254_v56 = vpop.f32.mrb[7].mxu0 }
 0x114   :  { %v6612_v57 = vadd.f32 %v254_v56, %v6581_v36  ;;  %8871 = vst [vmem:[#allocation18_spill] sm:$0xff] %v6617_v61  ;;  %v6625_v2 = vpop.f32.mrb[4].mxu1 }
 0x115   :  { %8872 = vst [vmem:[#allocation19_spill] sm:$0xff] %v6625_v2  ;;  %v409_v3 = vpop.f32.mrb[5].mxu1 }
 0x116   :  { %v258_v60 = vpop.f32.mrb[8].mxu0  ;;  %v6628_v5 = vadd.f32 %v409_v3, %v6595_v47 }
 0x117   :  { %v6620_v62 = vadd.f32 %v258_v60, %v6576_v35  ;;  %v260_v63 = vpop.f32.mrb[9].mxu0 }
 0x118   :  { %v6623_v1 = vadd.f32 %v260_v63, %v6581_v36  ;;  %8873 = vst [vmem:[#allocation20_spill] sm:$0xff] %v6628_v5  ;;  %v6636_v9 = vpop.f32.mrb[6].mxu1 }
 0x119   :  { %8874 = vst [vmem:[#allocation21_spill] sm:$0xff] %v6636_v9  ;;  %v415_v10 = vpop.f32.mrb[7].mxu1 }
 0x11a   :  { %v264_v4 = vpop.f32.mrb[10].mxu0  ;;  %v6639_v12 = vadd.f32 %v415_v10, %v6595_v47 }
 0x11b   :  { %v6631_v6 = vadd.f32 %v264_v4, %v6576_v35  ;;  %v266_v7 = vpop.f32.mrb[11].mxu0 }
 0x11c   :  { %v6634_v8 = vadd.f32 %v266_v7, %v6581_v36  ;;  %8875 = vst [vmem:[#allocation22_spill] sm:$0xff] %v6639_v12  ;;  %v6647_v16 = vpop.f32.mrb[8].mxu1 }
 0x11d   :  { %8876 = vst [vmem:[#allocation23_spill] sm:$0xff] %v6647_v16  ;;  %v421_v17 = vpop.f32.mrb[9].mxu1 }
 0x11e   :  { %v270_v11 = vpop.f32.mrb[12].mxu0  ;;  %v6650_v19 = vadd.f32 %v421_v17, %v6595_v47 }
 0x11f   :  { %v6642_v13 = vadd.f32 %v270_v11, %v6576_v35  ;;  %v272_v14 = vpop.f32.mrb[13].mxu0 }
 0x120   :  { %v6645_v15 = vadd.f32 %v272_v14, %v6581_v36  ;;  %8877 = vst [vmem:[#allocation24_spill] sm:$0xff] %v6650_v19  ;;  %v6658_v23 = vpop.f32.mrb[10].mxu1 }
 0x121   :  { %8878 = vst [vmem:[#allocation25_spill] sm:$0xff] %v6658_v23  ;;  %v427_v24 = vpop.f32.mrb[11].mxu1 }
 0x122   :  { %v276_v18 = vpop.f32.mrb[14].mxu0  ;;  %v6661_v26 = vadd.f32 %v427_v24, %v6595_v47 }
 0x123   :  { %v6653_v20 = vadd.f32 %v276_v18, %v6576_v35  ;;  %v278_v21 = vpop.f32.mrb[15].mxu0 }
 0x124   :  { %v6656_v22 = vadd.f32 %v278_v21, %v6581_v36  ;;  %8879 = vst [vmem:[#allocation26_spill] sm:$0xff] %v6661_v26  ;;  %v6669_v30 = vpop.f32.mrb[12].mxu1 }
 0x125   :  { %8880 = vst [vmem:[#allocation27_spill] sm:$0xff] %v6669_v30  ;;  %v433_v37 = vpop.f32.mrb[13].mxu1 }
 0x126   :  { %v282_v25 = vpop.f32.mrb[16].mxu0  ;;  %v6672_v39 = vadd.f32 %v433_v37, %v6595_v47 }
 0x127   :  { %v6664_v27 = vadd.f32 %v282_v25, %v6576_v35  ;;  %v284_v28 = vpop.f32.mrb[17].mxu0 }
 0x128   :  { %v6667_v29 = vadd.f32 %v284_v28, %v6581_v36  ;;  %8881 = vst [vmem:[#allocation28_spill] sm:$0xff] %v6672_v39  ;;  %v6680_v46 = vpop.f32.mrb[14].mxu1 }
 0x129   :  { %8882 = vst [vmem:[#allocation29_spill] sm:$0xff] %v6680_v46  ;;  %v439_v49 = vpop.f32.mrb[15].mxu1 }
 0x12a   :  { %v288_v38 = vpop.f32.mrb[18].mxu0  ;;  %v6683_v53 = vadd.f32 %v439_v49, %v6595_v47 }
 0x12b   :  { %v6675_v40 = vadd.f32 %v288_v38, %v6576_v35  ;;  %v290_v41 = vpop.f32.mrb[19].mxu0 }
 0x12c   :  { %v6678_v44 = vadd.f32 %v290_v41, %v6581_v36  ;;  %8883 = vst [vmem:[#allocation30_spill] sm:$0xff] %v6683_v53  ;;  %v6691_v63 = vpop.f32.mrb[16].mxu1 }
 0x12d   :  { %8884 = vst [vmem:[#allocation31_spill] sm:$0xff] %v6691_v63  ;;  %v445_v3 = vpop.f32.mrb[17].mxu1 }
 0x12e   :  { %v294_v52 = vpop.f32.mrb[20].mxu0  ;;  %v6694_v7 = vadd.f32 %v445_v3, %v6595_v47 }
 0x12f   :  { %v6686_v56 = vadd.f32 %v294_v52, %v6576_v35  ;;  %v296_v59 = vpop.f32.mrb[21].mxu0 }
 0x130   :  { %v6689_v60 = vadd.f32 %v296_v59, %v6581_v36  ;;  %8885 = vst [vmem:[#allocation32_spill] sm:$0xff] %v6694_v7  ;;  %v6702_v17 = vpop.f32.mrb[18].mxu1 }
 0x131   :  { %8886 = vst [vmem:[#allocation33_spill] sm:$0xff] %v6702_v17  ;;  %v451_v18 = vpop.f32.mrb[19].mxu1 }
 0x132   :  { %v300_v4 = vpop.f32.mrb[22].mxu0  ;;  %v6705_v24 = vadd.f32 %v451_v18, %v6595_v47 }
 0x133   :  { %v6697_v10 = vadd.f32 %v300_v4, %v6576_v35  ;;  %v302_v11 = vpop.f32.mrb[23].mxu0 }
 0x134   :  { %v6700_v14 = vadd.f32 %v302_v11, %v6581_v36  ;;  %8887 = vst [vmem:[#allocation34_spill] sm:$0xff] %v6705_v24  ;;  %v6713_v38 = vpop.f32.mrb[20].mxu1 }
 0x135   :  { %8888 = vst [vmem:[#allocation35_spill] sm:$0xff] %v6713_v38  ;;  %v457_v41 = vpop.f32.mrb[21].mxu1 }
 0x136   :  { %v306_v21 = vpop.f32.mrb[24].mxu0  ;;  %v6716_v52 = vadd.f32 %v457_v41, %v6595_v47 }
 0x137   :  { %v6708_v25 = vadd.f32 %v306_v21, %v6576_v35  ;;  %v308_v28 = vpop.f32.mrb[25].mxu0 }
 0x138   :  { %v6711_v37 = vadd.f32 %v308_v28, %v6581_v36  ;;  %8889 = vst [vmem:[#allocation36_spill] sm:$0xff] %v6716_v52  ;;  %v6724_v11 = vpop.f32.mrb[22].mxu1 }
 0x139   :  { %8890 = vst [vmem:[#allocation37_spill] sm:$0xff] %v6724_v11  ;;  %v463_v18 = vpop.f32.mrb[23].mxu1 }
 0x13a   :  { %v312_v49 = vpop.f32.mrb[26].mxu0  ;;  %v6727_v28 = vadd.f32 %v463_v18, %v6595_v47 }
 0x13b   :  { %v6719_v59 = vadd.f32 %v312_v49, %v6576_v35  ;;  %v314_v3 = vpop.f32.mrb[27].mxu0 }
 0x13c   :  { %v6722_v4 = vadd.f32 %v314_v3, %v6581_v36  ;;  %8891 = vst [vmem:[#allocation38_spill] sm:$0xff] %v6727_v28  ;;  %v6735_v49 = vpop.f32.mrb[24].mxu1  ;;  %v6740_v3 = vld [vmem:[%s8765_s5] sm:$0x3f] }
 0x13d   :  { %8892 = vst [vmem:[#allocation39_spill] sm:$0xff] %v6735_v49  ;;  %v469_v32 = vpop.f32.mrb[25].mxu1 }
 0x13e   :  { %v318_v21 = vpop.f32.mrb[28].mxu0  ;;  %v6743_v52 = vadd.f32 %v469_v32, %v6595_v47  ;;  %v8899_v32 = vsub.s32 0, %v6564_v31 }
 0x13f   :  { %v6730_v0 = vadd.f32 %v318_v21, %v6576_v35  ;;  %v320_v42 = vpop.f32.mrb[29].mxu0 }
 0x140   :  { %v6733_v41 = vadd.f32 %v320_v42, %v6581_v36  ;;  %8893 = vst [vmem:[#allocation40_spill] sm:$0xff] %v6743_v52  ;;  %v8896_v42 = vsub.s32 1, %v6564_v31  ;;  %v6756_v24 = vpop.f32.mrb[26].mxu1 }
 0x141   :  { %8897 = vst [vmem:[#allocation43_spill] sm:$0xff] %v6756_v24  ;;  %v475_v53 = vpop.f32.mrb[27].mxu1 }
 0x142   :  { %v324_v34 = vpop.f32.mrb[30].mxu0  ;;  %v6754_v7 = vrot.slane %v6740_v3, %v8896_v42  ;;  %v6759_v26 = vadd.f32 %v475_v53, %v6595_v47 }
 0x143   :  { %v6746_v18 = vadd.f32 %v324_v34, %v6576_v35  ;;  %v326_v21 = vpop.f32.mrb[31].mxu0  ;;  %v6764_v34 = vrot.slane %v6740_v3, %v8899_v32 }
 0x144   :  { %v6749_v28 = vadd.f32 %v326_v21, %v6581_v36  ;;  %8898 = vst [vmem:[#allocation44_spill] sm:$0xff] %v6759_v26  ;;  %v109_v36 = vsub.s32 2, %v6564_v31  ;;  %v6768_v52 = vpop.f32.mrb[28].mxu1 }
 0x145   :  { %8894 = vst [vmem:[#allocation41_spill] sm:$0xff] %v6746_v18  ;;  %8900 = vst [vmem:[#allocation45_spill] sm:$0xff] %v6768_v52  ;;  %v481_v42 = vpop.f32.mrb[29].mxu1 }
 0x146   :  { %8895 = vst [vmem:[#allocation42_spill] sm:$0xff] %v6749_v28  ;;  %v886_v39 = vpop.f32.mrb[32].mxu0  ;;  %v6771_v12 = vadd.f32 %v481_v42, %v6595_v47  ;;  %v6776_v32 = vrot.slane %v6570_v33, %v109_v36 }
 0x147   :  { %v888_v35 = vpop.f32.mrb[33].mxu0  ;;  %v887_v53 = vadd.f32 %v886_v39, %v6764_v34 }
 0x148   :  { %v889_v21 = vadd.f32 %v888_v35, %v6754_v7  ;;  %8901 = vst [vmem:[#allocation46_spill] sm:$0xff] %v6771_v12  ;;  %8902 = vst [vmem:[#allocation47_spill] sm:$0xff] %v6776_v32  ;;  %v485_v61 = vpop.f32.mrb[30].mxu1 }
 0x149   :  { %v6780_v35 = vadd.f32 %v485_v61, %v6776_v32  ;;  %v487_v52 = vpop.f32.mrb[31].mxu1 }
 0x14a   :  { %v892_v19 = vpop.f32.mrb[34].mxu0  ;;  %v6783_v42 = vadd.f32 %v487_v52, %v6595_v47 }
 0x14b   :  { %v893_v26 = vadd.f32 %v892_v19, %v6764_v34  ;;  %v894_v5 = vpop.f32.mrb[35].mxu0  ;;  %8903 = vst [vmem:[#allocation48_spill] sm:$0xff] %v6780_v35  ;;  %v6786_v19 = vrot.slane %v6740_v3, %v109_v36 }
 0x14c   :  { %v895_v54 = vadd.f32 %v894_v5, %v6754_v7  ;;  %8904 = vst [vmem:[#allocation49_spill] sm:$0xff] %v6783_v42  ;;  %v1047_v5 = vpop.f32.mrb[32].mxu1 }
 0x14d   :  { %v5465_v24 = vpack.c.bf16 %v893_v26, %v887_v53  ;;  %v8905_v26 = vsub.s32 3, %v6564_v31  ;;  %v1048_v36 = vadd.f32 %v1047_v5, %v6786_v19 }
 0x14e   :  { %v5529_v49 = vpack.c.bf16 %v895_v54, %v889_v21  ;;  %v898_v11 = vpop.f32.mrb[36].mxu0  ;;  %v1049_v54 = vpop.f32.mrb[33].mxu1 }
 0x14f   :  { %v900_v39 = vpop.f32.mrb[37].mxu0  ;;  %5466 = vmatprep.subr.bf16.mxu1 %v5465_v24  ;;  %v6792_v61 = vrot.slane %v6740_v3, %v8905_v26  ;;  %v899_v47 = vadd.f32 %v898_v11, %v6764_v34 }
 0x150   :  { %v901_v33 = vadd.f32 %v900_v39, %v6754_v7  ;;  %5468 = vmatpush3.bf16.xpose.msra.mxu1 %v5465_v24  ;;  %5530 = vmatprep.subr.bf16.mxu0 %v5529_v49  ;;  %v1053_v12 = vpop.f32.mrb[34].mxu1 }
 0x151   :  { %5532 = vmatpush3.bf16.xpose.msra.mxu0 %v5529_v49  ;;  %v1050_v24 = vadd.f32 %v1049_v54, %v6792_v61  ;;  %v1054_v35 = vadd.f32 %v1053_v12, %v6786_v19  ;;  %v1055_v26 = vpop.f32.mrb[35].mxu1 }
 0x152   :  { %v904_v21 = vpop.f32.mrb[38].mxu0  ;;  %v1056_v17 = vadd.f32 %v1055_v26, %v6792_v61 }
 0x153   :  { %v905_v52 = vadd.f32 %v904_v21, %v6764_v34  ;;  %v906_v53 = vpop.f32.mrb[39].mxu0  ;;  %v6801_v11 = vpack.c.bf16 %v1054_v35, %v1048_v36 }
 0x154   :  { %v907_v39 = vadd.f32 %v906_v53, %v6754_v7  ;;  %v6804_v5 = vpack.c.bf16 %v1056_v17, %v1050_v24  ;;  %v1059_v54 = vpop.f32.mrb[36].mxu1 }
 0x155   :  { %v5469_v42 = vpack.c.bf16 %v905_v52, %v899_v47  ;;  %v1061_v47 = vpop.f32.mrb[37].mxu1 }
 0x156   :  { %v5533_v38 = vpack.c.bf16 %v907_v39, %v901_v33  ;;  %v910_v49 = vpop.f32.mrb[40].mxu0  ;;  %v1060_v39 = vadd.f32 %v1059_v54, %v6786_v19  ;;  %v1062_v36 = vadd.f32 %v1061_v47, %v6792_v61 }
 0x157   :  { %v912_v63 = vpop.f32.mrb[41].mxu0  ;;  %5470 = vmatprep.subr.bf16.mxu1 %v5469_v42  ;;  %v911_v12 = vadd.f32 %v910_v49, %v6764_v34 }
 0x158   :  { %v913_v21 = vadd.f32 %v912_v63, %v6754_v7  ;;  %5472 = vmatpush3.bf16.xpose.msra.mxu1 %v5469_v42  ;;  %5534 = vmatprep.subr.bf16.mxu0 %v5533_v38  ;;  %v1065_v63 = vpop.f32.mrb[38].mxu1 }
 0x159   :  { %5536 = vmatpush3.bf16.xpose.msra.mxu0 %v5533_v38  ;;  %v1066_v17 = vadd.f32 %v1065_v63, %v6786_v19  ;;  %v1067_v24 = vpop.f32.mrb[39].mxu1 }
 0x15a   :  { %v916_v52 = vpop.f32.mrb[42].mxu0  ;;  %v1068_v46 = vadd.f32 %v1067_v24, %v6792_v61 }
 0x15b   :  { %v917_v33 = vadd.f32 %v916_v52, %v6764_v34  ;;  %v918_v53 = vpop.f32.mrb[43].mxu0  ;;  %v6813_v49 = vpack.c.bf16 %v1066_v17, %v1060_v39 }
 0x15c   :  { %v919_v35 = vadd.f32 %v918_v53, %v6754_v7  ;;  %v6816_v54 = vpack.c.bf16 %v1068_v46, %v1062_v36  ;;  %v1071_v47 = vpop.f32.mrb[40].mxu1 }
 0x15d   :  { %v5473_v42 = vpack.c.bf16 %v917_v33, %v911_v12  ;;  %v1073_v12 = vpop.f32.mrb[41].mxu1  ;;  %v1072_v63 = vadd.f32 %v1071_v47, %v6786_v19 }
 0x15e   :  { %v5537_v26 = vpack.c.bf16 %v919_v35, %v913_v21  ;;  %v922_v38 = vpop.f32.mrb[44].mxu0  ;;  %v1074_v17 = vadd.f32 %v1073_v12, %v6792_v61 }
 0x15f   :  { %v924_v30 = vpop.f32.mrb[45].mxu0  ;;  %5474 = vmatprep.subr.bf16.mxu1 %v5473_v42  ;;  %v923_v53 = vadd.f32 %v922_v38, %v6764_v34 }
 0x160   :  { %v925_v52 = vadd.f32 %v924_v30, %v6754_v7  ;;  %5476 = vmatpush3.bf16.xpose.msra.mxu1 %v5473_v42  ;;  %5538 = vmatprep.subr.bf16.mxu0 %v5537_v26  ;;  %v1077_v30 = vpop.f32.mrb[42].mxu1 }
 0x161   :  { %5540 = vmatpush3.bf16.xpose.msra.mxu0 %v5537_v26  ;;  %v1078_v46 = vadd.f32 %v1077_v30, %v6786_v19  ;;  %v1079_v36 = vpop.f32.mrb[43].mxu1 }
 0x162   :  { %v928_v33 = vpop.f32.mrb[46].mxu0  ;;  %v1080_v23 = vadd.f32 %v1079_v36, %v6792_v61 }
 0x163   :  { %v929_v21 = vadd.f32 %v928_v33, %v6764_v34  ;;  %v930_v35 = vpop.f32.mrb[47].mxu0  ;;  %v6825_v38 = vpack.c.bf16 %v1078_v46, %v1072_v63 }
 0x164   :  { %v931_v39 = vadd.f32 %v930_v35, %v6754_v7  ;;  %v6828_v47 = vpack.c.bf16 %v1080_v23, %v1074_v17  ;;  %v1083_v12 = vpop.f32.mrb[44].mxu1 }
 0x165   :  { %v5477_v42 = vpack.c.bf16 %v929_v21, %v923_v53  ;;  %v1085_v53 = vpop.f32.mrb[45].mxu1  ;;  %v1084_v30 = vadd.f32 %v1083_v12, %v6786_v19 }
 0x166   :  { %v5541_v24 = vpack.c.bf16 %v931_v39, %v925_v52  ;;  %v934_v26 = vpop.f32.mrb[48].mxu0  ;;  %v1086_v46 = vadd.f32 %v1085_v53, %v6792_v61 }
 0x167   :  { %v936_v16 = vpop.f32.mrb[49].mxu0  ;;  %5478 = vmatprep.subr.bf16.mxu1 %v5477_v42  ;;  %v935_v35 = vadd.f32 %v934_v26, %v6764_v34 }
 0x168   :  { %v937_v33 = vadd.f32 %v936_v16, %v6754_v7  ;;  %5480 = vmatpush3.bf16.xpose.msra.mxu1 %v5477_v42  ;;  %5542 = vmatprep.subr.bf16.mxu0 %v5541_v24  ;;  %v1089_v16 = vpop.f32.mrb[46].mxu1 }
 0x169   :  { %5544 = vmatpush3.bf16.xpose.msra.mxu0 %v5541_v24  ;;  %v1090_v23 = vadd.f32 %v1089_v16, %v6786_v19  ;;  %v1091_v17 = vpop.f32.mrb[47].mxu1 }
 0x16a   :  { %v940_v21 = vpop.f32.mrb[50].mxu0  ;;  %v1092_v9 = vadd.f32 %v1091_v17, %v6792_v61 }
 0x16b   :  { %v941_v52 = vadd.f32 %v940_v21, %v6764_v34  ;;  %v942_v39 = vpop.f32.mrb[51].mxu0  ;;  %v6837_v26 = vpack.c.bf16 %v1090_v23, %v1084_v30 }
 0x16c   :  { %v943_v63 = vadd.f32 %v942_v39, %v6754_v7  ;;  %v6840_v12 = vpack.c.bf16 %v1092_v9, %v1086_v46  ;;  %v1095_v53 = vpop.f32.mrb[48].mxu1 }
 0x16d   :  { %v5481_v42 = vpack.c.bf16 %v941_v52, %v935_v35  ;;  %v1097_v35 = vpop.f32.mrb[49].mxu1  ;;  %v1096_v16 = vadd.f32 %v1095_v53, %v6786_v19 }
 0x16e   :  { %v5545_v36 = vpack.c.bf16 %v943_v63, %v937_v33  ;;  %v946_v24 = vpop.f32.mrb[52].mxu0  ;;  %v1098_v23 = vadd.f32 %v1097_v35, %v6792_v61 }
 0x16f   :  { %v948_v2 = vpop.f32.mrb[53].mxu0  ;;  %5482 = vmatprep.subr.bf16.mxu1 %v5481_v42  ;;  %v947_v39 = vadd.f32 %v946_v24, %v6764_v34 }
 0x170   :  { %v949_v21 = vadd.f32 %v948_v2, %v6754_v7  ;;  %5484 = vmatpush3.bf16.xpose.msra.mxu1 %v5481_v42  ;;  %5546 = vmatprep.subr.bf16.mxu0 %v5545_v36  ;;  %v1101_v2 = vpop.f32.mrb[50].mxu1 }
 0x171   :  { %5548 = vmatpush3.bf16.xpose.msra.mxu0 %v5545_v36  ;;  %v1102_v9 = vadd.f32 %v1101_v2, %v6786_v19  ;;  %v1103_v46 = vpop.f32.mrb[51].mxu1 }
 0x172   :  { %v952_v52 = vpop.f32.mrb[54].mxu0  ;;  %v1104_v58 = vadd.f32 %v1103_v46, %v6792_v61 }
 0x173   :  { %v953_v33 = vadd.f32 %v952_v52, %v6764_v34  ;;  %v954_v63 = vpop.f32.mrb[55].mxu0  ;;  %v6849_v24 = vpack.c.bf16 %v1102_v9, %v1096_v16 }
 0x174   :  { %v955_v30 = vadd.f32 %v954_v63, %v6754_v7  ;;  %v6852_v53 = vpack.c.bf16 %v1104_v58, %v1098_v23  ;;  %v1107_v35 = vpop.f32.mrb[52].mxu1 }
 0x175   :  { %v5485_v42 = vpack.c.bf16 %v953_v33, %v947_v39  ;;  %v1109_v39 = vpop.f32.mrb[53].mxu1  ;;  %v1108_v2 = vadd.f32 %v1107_v35, %v6786_v19 }
 0x176   :  { %v5549_v17 = vpack.c.bf16 %v955_v30, %v949_v21  ;;  %v958_v36 = vpop.f32.mrb[56].mxu0  ;;  %v1110_v9 = vadd.f32 %v1109_v39, %v6792_v61 }
 0x177   :  { %v960_v28 = vpop.f32.mrb[57].mxu0  ;;  %5486 = vmatprep.subr.bf16.mxu1 %v5485_v42  ;;  %v959_v63 = vadd.f32 %v958_v36, %v6764_v34 }
 0x178   :  { %v961_v52 = vadd.f32 %v960_v28, %v6754_v7  ;;  %5488 = vmatpush3.bf16.xpose.msra.mxu1 %v5485_v42  ;;  %5550 = vmatprep.subr.bf16.mxu0 %v5549_v17  ;;  %v1113_v28 = vpop.f32.mrb[54].mxu1 }
 0x179   :  { %5552 = vmatpush3.bf16.xpose.msra.mxu0 %v5549_v17  ;;  %v1114_v58 = vadd.f32 %v1113_v28, %v6786_v19  ;;  %v1115_v23 = vpop.f32.mrb[55].mxu1 }
 0x17a   :  { %v964_v33 = vpop.f32.mrb[58].mxu0  ;;  %v1116_v18 = vadd.f32 %v1115_v23, %v6792_v61 }
 0x17b   :  { %v965_v21 = vadd.f32 %v964_v33, %v6764_v34  ;;  %v966_v30 = vpop.f32.mrb[59].mxu0  ;;  %v6861_v36 = vpack.c.bf16 %v1114_v58, %v1108_v2 }
 0x17c   :  { %v967_v16 = vadd.f32 %v966_v30, %v6754_v7  ;;  %v6864_v35 = vpack.c.bf16 %v1116_v18, %v1110_v9  ;;  %v1119_v39 = vpop.f32.mrb[56].mxu1 }
 0x17d   :  { %v5489_v42 = vpack.c.bf16 %v965_v21, %v959_v63  ;;  %8906 = vst [vmem:[#allocation50_spill] sm:$0xff] %v6861_v36  ;;  %v1121_v63 = vpop.f32.mrb[57].mxu1  ;;  %v759_v21 = vsub.s32 4, %v6564_v31  ;;  %v1120_v58 = vadd.f32 %v1119_v39, %v6786_v19 }
 0x17e   :  { %v5553_v46 = vpack.c.bf16 %v967_v16, %v961_v52  ;;  %v970_v17 = vpop.f32.mrb[60].mxu0  ;;  %v763_v52 = vsub.s32 5, %v6564_v31  ;;  %v1122_v18 = vadd.f32 %v1121_v63, %v6792_v61 }
 0x17f   :  { %v972_v51 = vpop.f32.mrb[61].mxu0  ;;  %5490 = vmatprep.subr.bf16.mxu1 %v5489_v42  ;;  %v971_v16 = vadd.f32 %v970_v17, %v6764_v34  ;;  %v6875_v36 = vrot.slane %v6740_v3, %v759_v21 }
 0x180   :  { %v973_v33 = vadd.f32 %v972_v51, %v6754_v7  ;;  %5492 = vmatpush3.bf16.xpose.msra.mxu1 %v5489_v42  ;;  %5554 = vmatprep.subr.bf16.mxu0 %v5553_v46  ;;  %v1125_v9 = vpop.f32.mrb[58].mxu1 }
 0x181   :  { %5556 = vmatpush3.bf16.xpose.msra.mxu0 %v5553_v46  ;;  %v1126_v23 = vadd.f32 %v1125_v9, %v6786_v19  ;;  %v1127_v46 = vpop.f32.mrb[59].mxu1 }
 0x182   :  { %v976_v30 = vpop.f32.mrb[62].mxu0  ;;  %v1128_v17 = vadd.f32 %v1127_v46, %v6792_v61 }
 0x183   :  { %v977_v28 = vadd.f32 %v976_v30, %v6764_v34  ;;  %v978_v2 = vpop.f32.mrb[63].mxu0  ;;  %v6879_v34 = vrot.slane %v6740_v3, %v763_v52  ;;  %v6881_v39 = vpack.c.bf16 %v1126_v23, %v1120_v58 }
 0x184   :  { %v979_v51 = vadd.f32 %v978_v2, %v6754_v7  ;;  %v6883_v63 = vpack.c.bf16 %v1128_v17, %v1122_v18  ;;  %v1131_v30 = vpop.f32.mrb[60].mxu1 }
 0x185   :  { %v5493_v42 = vpack.c.bf16 %v977_v28, %v971_v16  ;;  %v1133_v21 = vpop.f32.mrb[61].mxu1  ;;  %v1132_v16 = vadd.f32 %v1131_v30, %v6786_v19 }
 0x186   :  { %v5557_v31 = vpack.c.bf16 %v979_v51, %v973_v33  ;;  %v1208_v32 = vpop.f32.mrb[64].mxu0  ;;  %v1134_v58 = vadd.f32 %v1133_v21, %v6792_v61 }
 0x187   :  { %5494 = vmatprep.subr.bf16.mxu1 %v5493_v42  ;;  %v1210_v7 = vpop.f32.mrb[65].mxu0  ;;  %v1209_v33 = vadd.f32 %v1208_v32, %v6875_v36 }
 0x188   :  { %5496 = vmatpush3.bf16.xpose.msra.mxu1 %v5493_v42  ;;  %5558 = vmatprep.subr.bf16.mxu0 %v5557_v31  ;;  %v1211_v3 = vadd.f32 %v1210_v7, %v6879_v34  ;;  %v1137_v51 = vpop.f32.mrb[62].mxu1 }
 0x189   :  { %5560 = vmatpush3.bf16.xpose.msra.mxu0 %v5557_v31  ;;  %5498 = vmatprep.subr.bf16.mxu1 %v6804_v5  ;;  %v1138_v9 = vadd.f32 %v1137_v51, %v6786_v19  ;;  %v1139_v42 = vpop.f32.mrb[63].mxu1 }
 0x18a   :  { %5594 = vmatprep.subr.bf16.mxu0 %v6801_v11  ;;  %v1214_v52 = vpop.f32.mrb[66].mxu0  ;;  %v1140_v32 = vadd.f32 %v1139_v42, %v6792_v61 }
 0x18b   :  { %v1215_v28 = vadd.f32 %v1214_v52, %v6875_v36  ;;  %v1216_v2 = vpop.f32.mrb[67].mxu0  ;;  %v6900_v17 = vpack.c.bf16 %v1138_v9, %v1132_v16 }
 0x18c   :  { %v1217_v18 = vadd.f32 %v1216_v2, %v6879_v34  ;;  %v6905_v19 = vpack.c.bf16 %v1140_v32, %v1134_v58  ;;  %v8921_v2 = vld [vmem:[#allocation50_spill] sm:$0xff] }
 0x18d   :  { %v6894_v23 = vpack.c.bf16 %v1215_v28, %v1209_v33  ;;  %v8918_v33 = vld [vmem:[#allocation42_spill] sm:$0xff] }
 0x18e   :  { %v6897_v46 = vpack.c.bf16 %v1217_v18, %v1211_v3  ;;  %v1220_v31 = vpop.f32.mrb[68].mxu0 }
 0x18f   :  { %8907 = vst [vmem:[#allocation51_spill] sm:$0xff] %v6894_v23  ;;  %5066 = vmatmul.mubr.f32.vlgmr.msra.gmra.mrb[64].mxu1 %v6587_v43  ;;  %v1221_v7 = vadd.f32 %v1220_v31, %v6875_v36  ;;  %v1222_v30 = vpop.f32.mrb[69].mxu0 }
 0x190   :  { %8908 = vst [vmem:[#allocation52_spill] sm:$0xff] %v6897_v46  ;;  %5068 = vmatprep.mubr.f32.mxu1 %v6598_v48  ;;  %5178 = vmatmul.mubr.f32.vlgmr.msra.gmra.mrb[96].mxu0 %v6590_v45  ;;  %v1223_v21 = vadd.f32 %v1222_v30, %v6879_v34 }
 0x191   :  { %5180 = vmatprep.mubr.f32.mxu0 %v6601_v50  ;;  %5596 = vmatpush3.bf16.xpose.msra.mxu0 %v6801_v11 }
 0x192   :  { %5598 = vmatprep.subr.bf16.mxu0 %v6813_v49  ;;  %5500 = vmatpush3.bf16.msra.mxu1 %v6804_v5  ;;  %v1226_v43 = vpop.f32.mrb[70].mxu0 }
 0x193   :  { %5069 = vmatmul.mubr.f32.gmra.mrb[66].mxu1 %v6609_v55  ;;  %5502 = vmatprep.subr.bf16.mxu1 %v6816_v54  ;;  %v1227_v48 = vadd.f32 %v1226_v43, %v6875_v36  ;;  %v1228_v45 = vpop.f32.mrb[71].mxu0 }
 0x194   :  { %5071 = vmatprep.mubr.f32.mxu1 %v6620_v62  ;;  %5181 = vmatmul.mubr.f32.gmra.mrb[98].mxu0 %v6612_v57  ;;  %v1229_v50 = vadd.f32 %v1228_v45, %v6879_v34 }
 0x195   :  { %5183 = vmatprep.mubr.f32.mxu0 %v6623_v1  ;;  %v6919_v61 = vpack.c.bf16 %v1227_v48, %v1221_v7 }
 0x196   :  { %5504 = vmatpush3.bf16.msra.mxu1 %v6816_v54  ;;  %v6922_v11 = vpack.c.bf16 %v1229_v50, %v1223_v21  ;;  %v1232_v55 = vpop.f32.mrb[72].mxu0 }
 0x197   :  { %8909 = vst [vmem:[#allocation53_spill] sm:$0xff] %v6919_v61  ;;  %5072 = vmatmul.mubr.f32.gmra.mrb[68].mxu1 %v6631_v6  ;;  %5506 = vmatprep.subr.bf16.mxu1 %v6828_v47  ;;  %v1233_v5 = vadd.f32 %v1232_v55, %v6875_v36  ;;  %v1234_v62 = vpop.f32.mrb[73].mxu0 }
 0x198   :  { %8910 = vst [vmem:[#allocation54_spill] sm:$0xff] %v6922_v11  ;;  %5074 = vmatprep.mubr.f32.mxu1 %v6642_v13  ;;  %5184 = vmatmul.mubr.f32.gmra.mrb[100].mxu0 %v6634_v8  ;;  %v1235_v57 = vadd.f32 %v1234_v62, %v6879_v34 }
 0x199   :  { %5186 = vmatprep.mubr.f32.mxu0 %v6645_v15  ;;  %5600 = vmatpush3.bf16.xpose.msra.mxu0 %v6813_v49 }
 0x19a   :  { %5602 = vmatprep.subr.bf16.mxu0 %v6825_v38  ;;  %5508 = vmatpush3.bf16.msra.mxu1 %v6828_v47  ;;  %v1238_v1 = vpop.f32.mrb[74].mxu0 }
 0x19b   :  { %5075 = vmatmul.mubr.f32.gmra.mrb[70].mxu1 %v6653_v20  ;;  %5510 = vmatprep.subr.bf16.mxu1 %v6840_v12  ;;  %v1239_v6 = vadd.f32 %v1238_v1, %v6875_v36  ;;  %v1240_v13 = vpop.f32.mrb[75].mxu0 }
 0x19c   :  { %5077 = vmatprep.mubr.f32.mxu1 %v6664_v27  ;;  %5187 = vmatmul.mubr.f32.gmra.mrb[102].mxu0 %v6656_v22  ;;  %v1241_v8 = vadd.f32 %v1240_v13, %v6879_v34 }
 0x19d   :  { %5189 = vmatprep.mubr.f32.mxu0 %v6667_v29  ;;  %v6941_v15 = vpack.c.bf16 %v1239_v6, %v1233_v5 }
 0x19e   :  { %5512 = vmatpush3.bf16.msra.mxu1 %v6840_v12  ;;  %v6944_v49 = vpack.c.bf16 %v1241_v8, %v1235_v57  ;;  %v1244_v20 = vpop.f32.mrb[76].mxu0  ;;  %v8916_v12 = vld [vmem:[#allocation15_spill] sm:$0xff] }
 0x19f   :  { %8911 = vst [vmem:[#allocation55_spill] sm:$0xff] %v6941_v15  ;;  %5078 = vmatmul.mubr.f32.gmra.mrb[72].mxu1 %v6675_v40  ;;  %5514 = vmatprep.subr.bf16.mxu1 %v6852_v53  ;;  %v1245_v54 = vadd.f32 %v1244_v20, %v6875_v36  ;;  %v1246_v27 = vpop.f32.mrb[77].mxu0 }
 0x1a0   :  { %8912 = vst [vmem:[#allocation56_spill] sm:$0xff] %v6944_v49  ;;  %5080 = vmatprep.mubr.f32.mxu1 %v6686_v56  ;;  %5190 = vmatmul.mubr.f32.gmra.mrb[104].mxu0 %v6678_v44  ;;  %v1247_v22 = vadd.f32 %v1246_v27, %v6879_v34  ;;  %v8928_v27 = vld [vmem:[#allocation17_spill] sm:$0xff] }
 0x1a1   :  { %5192 = vmatprep.mubr.f32.mxu0 %v6689_v60  ;;  %5604 = vmatpush3.bf16.xpose.msra.mxu0 %v6825_v38 }
 0x1a2   :  { %5606 = vmatprep.subr.bf16.mxu0 %v6837_v26  ;;  %5516 = vmatpush3.bf16.msra.mxu1 %v6852_v53  ;;  %v1250_v29 = vpop.f32.mrb[78].mxu0 }
 0x1a3   :  { %5081 = vmatmul.mubr.f32.gmra.mrb[74].mxu1 %v6697_v10  ;;  %5518 = vmatprep.subr.bf16.mxu1 %v6864_v35  ;;  %v1251_v40 = vadd.f32 %v1250_v29, %v6875_v36  ;;  %v1252_v56 = vpop.f32.mrb[79].mxu0  ;;  %v8929_v29 = vld [vmem:[#allocation19_spill] sm:$0xff] }
 0x1a4   :  { %5083 = vmatprep.mubr.f32.mxu1 %v6708_v25  ;;  %5193 = vmatmul.mubr.f32.gmra.mrb[106].mxu0 %v6700_v14  ;;  %v1253_v44 = vadd.f32 %v1252_v56, %v6879_v34  ;;  %v8931_v56 = vld [vmem:[#allocation23_spill] sm:$0xff] }
 0x1a5   :  { %5195 = vmatprep.mubr.f32.mxu0 %v6711_v37  ;;  %v6963_v60 = vpack.c.bf16 %v1251_v40, %v1245_v54  ;;  %v8930_v40 = vld [vmem:[#allocation21_spill] sm:$0xff] }
 0x1a6   :  { %5520 = vmatpush3.bf16.msra.mxu1 %v6864_v35  ;;  %v6966_v38 = vpack.c.bf16 %v1253_v44, %v1247_v22  ;;  %v1256_v10 = vpop.f32.mrb[80].mxu0  ;;  %v8917_v35 = vld [vmem:[#allocation41_spill] sm:$0xff] }
 0x1a7   :  { %8913 = vst [vmem:[#allocation57_spill] sm:$0xff] %v6963_v60  ;;  %5084 = vmatmul.mubr.f32.gmra.mrb[76].mxu1 %v6719_v59  ;;  %5522 = vmatprep.subr.bf16.mxu1 %v6883_v63  ;;  %v1257_v47 = vadd.f32 %v1256_v10, %v6875_v36  ;;  %v1258_v25 = vpop.f32.mrb[81].mxu0  ;;  %v8915_v59 = vld [vmem:[#allocation47_spill] sm:$0xff]  ;;  %v8932_v44 = vld [vmem:[#allocation25_spill] sm:$0xff] }
 0x1a8   :  { %8914 = vst [vmem:[#allocation58_spill] sm:$0xff] %v6966_v38  ;;  %5086 = vmatprep.mubr.f32.mxu1 %v6730_v0  ;;  %5196 = vmatmul.mubr.f32.gmra.mrb[108].mxu0 %v6722_v4  ;;  %v1259_v14 = vadd.f32 %v1258_v25, %v6879_v34  ;;  %v396_v53 = vadd.f32 %v8916_v12, %v8915_v59  ;;  %v8934_v25 = vld [vmem:[#allocation29_spill] sm:$0xff] }
 0x1a9   :  { %5198 = vmatprep.mubr.f32.mxu0 %v6733_v41  ;;  %5608 = vmatpush3.bf16.xpose.msra.mxu0 %v6837_v26  ;;  %v402_v22 = vadd.f32 %v8928_v27, %v8915_v59  ;;  %v426_v10 = vadd.f32 %v8932_v44, %v8915_v59 }
 0x1aa   :  { %5610 = vmatprep.subr.bf16.mxu0 %v6849_v24  ;;  %5524 = vmatpush3.bf16.msra.mxu1 %v6883_v63  ;;  %v1262_v37 = vpop.f32.mrb[82].mxu0 }
 0x1ab   :  { %5087 = vmatmul.mubr.f32.gmra.mrb[78].mxu1 %v8917_v35  ;;  %5526 = vmatprep.subr.bf16.mxu1 %v6905_v19  ;;  %v1263_v0 = vadd.f32 %v1262_v37, %v6875_v36  ;;  %v1264_v4 = vpop.f32.mrb[83].mxu0  ;;  %v8935_v37 = vld [vmem:[#allocation31_spill] sm:$0xff] }
 0x1ac   :  { %5199 = vmatmul.mubr.f32.gmra.mrb[110].mxu0 %v8918_v33  ;;  %v1265_v41 = vadd.f32 %v1264_v4, %v6879_v34  ;;  %v444_v12 = vadd.f32 %v8935_v37, %v8915_v59  ;;  %v8938_v33 = vld [vmem:[#allocation37_spill] sm:$0xff] }
 0x1ad   :  { %5289 = vmatprep.mubr.f32.mxu0 %v396_v53  ;;  %v6985_v26 = vpack.c.bf16 %v1263_v0, %v1257_v47  ;;  %v8936_v53 = vld [vmem:[#allocation33_spill] sm:$0xff]  ;;  %v8937_v0 = vld [vmem:[#allocation35_spill] sm:$0xff] }
 0x1ae   :  { %5528 = vmatpush3.bf16.msra.mxu1 %v6905_v19  ;;  %v6988_v63 = vpack.c.bf16 %v1265_v41, %v1259_v14  ;;  %v1268_v3 = vpop.f32.mrb[84].mxu0  ;;  %v438_v14 = vadd.f32 %v8934_v25, %v8915_v59  ;;  %v450_v35 = vadd.f32 %v8936_v53, %v8915_v59  ;;  %v456_v4 = vadd.f32 %v8937_v0, %v8915_v59 }
 0x1af   :  { %8919 = vst [vmem:[#allocation47_spill] sm:$0xff] %v6985_v26  ;;  %5562 = vmatprep.subr.bf16.mxu1 %v6894_v23  ;;  %v1269_v52 = vadd.f32 %v1268_v3, %v6875_v36  ;;  %v1270_v16 = vpop.f32.mrb[85].mxu0  ;;  %v462_v41 = vadd.f32 %v8938_v33, %v8915_v59  ;;  %v8939_v3 = vld [vmem:[#allocation39_spill] sm:$0xff]  ;;  %v4804_v33 = vld [vmem:[#allocation6 + $0x18] sm:$0xff]  }
 0x1b0   :  { %8920 = vst [vmem:[#allocation15_spill] sm:$0xff] %v6988_v63  ;;  %v1271_v28 = vadd.f32 %v1270_v16, %v6879_v34  ;;  %v8940_v16 = vld [vmem:[#allocation43_spill] sm:$0xff] }
 0x1b1   :  { %5612 = vmatpush3.bf16.xpose.msra.mxu0 %v6849_v24 }
 0x1b2   :  { %5614 = vmatprep.subr.bf16.mxu0 %v8921_v2  ;;  %v1274_v58 = vpop.f32.mrb[86].mxu0 }
 0x1b3   :  { %v1275_v51 = vadd.f32 %v1274_v58, %v6875_v36  ;;  %v1276_v18 = vpop.f32.mrb[87].mxu0 }
 0x1b4   :  { %v1277_v9 = vadd.f32 %v1276_v18, %v6879_v34  ;;  %v6068_v18 = vmov -inf  }
 0x1b5   :  { %v6997_v42 = vpack.c.bf16 %v1275_v51, %v1269_v52  ;;  %v468_v52 = vadd.f32 %v8939_v3, %v8915_v59  ;;  %v8942_v51 = vld [vmem:[#allocation48_spill] sm:$0xff]  ;;  %556 = vst.msk [vmem:[#allocation3 + $0x8] sm:$0xff] %vm554_vm1, %v6068_v18  ;;  %555 = vst.msk [vmem:[#allocation3] sm:$0xff] %vm554_vm1, %v6068_v18  ;;  %v6069_v3 = vmov 0  }
 0x1b6   :  { %v6999_v32 = vpack.c.bf16 %v1277_v9, %v1271_v28  ;;  %v1280_v31 = vpop.f32.mrb[88].mxu0  ;;  %v474_v28 = vadd.f32 %v8940_v16, %v8915_v59  ;;  %557 = vst.msk [vmem:[#allocation3 + $0x10] sm:$0xff] %vm554_vm1, %v6068_v18  ;;  %558 = vst.msk [vmem:[#allocation3 + $0x18] sm:$0xff] %vm554_vm1, %v6068_v18  ;;  %v4771_v9 = vld [vmem:[#allocation6] sm:$0xff]   ;;  %5699 = vset.pattern.permute.xlu1 %v6069_v3  ;;  %5700 = vset.pattern.permute.xlu0 %v6069_v3 }
 0x1b7   :  { %8922 = vst [vmem:[#allocation41_spill] sm:$0xff] %v6997_v42  ;;  %v1281_v7 = vadd.f32 %v1280_v31, %v6875_v36  ;;  %v1282_v30 = vpop.f32.mrb[89].mxu0  ;;  %559 = vst.msk [vmem:[#allocation3 + $0x20] sm:$0xff] %vm554_vm1, %v6068_v18  ;;  %v7195_v31 = vunpack.c.h.bf16 %v4771_v9 }
 0x1b8   :  { %8923 = vst [vmem:[#allocation42_spill] sm:$0xff] %v6999_v32  ;;  %v1283_v19 = vadd.f32 %v1282_v30, %v6879_v34  ;;  %560 = vst.msk [vmem:[#allocation3 + $0x28] sm:$0xff] %vm554_vm1, %v6068_v18 }
 0x1b9   :  { %5616 = vmatpush3.bf16.xpose.msra.mxu0 %v8921_v2  ;;  %v8941_v2 = vld [vmem:[#allocation45_spill] sm:$0xff]  ;;  %561 = vst.msk [vmem:[#allocation3 + $0x30] sm:$0xff] %vm554_vm1, %v6068_v18  ;;  %562 = vst.msk [vmem:[#allocation3 + $0x38] sm:$0xff] %vm554_vm1, %v6068_v18 }
 0x1ba   :  { %5618 = vmatprep.subr.bf16.mxu0 %v6881_v39  ;;  %v1286_v24 = vpop.f32.mrb[90].mxu0  ;;  %v480_v58 = vadd.f32 %v8941_v2, %v8915_v59  ;;  %563 = vst.msk [vmem:[#allocation3 + $0x40] sm:$0xff] %vm554_vm1, %v6068_v18  ;;  %564 = vst.msk [vmem:[#allocation3 + $0x48] sm:$0xff] %vm554_vm1, %v6068_v18  ;;  %v7249_v2 = vunpack.c.l.bf16 %v4804_v33 }
 0x1bb   :  { %v1287_v21 = vadd.f32 %v1286_v24, %v6875_v36  ;;  %v1288_v43 = vpop.f32.mrb[91].mxu0  ;;  %565 = vst.msk [vmem:[#allocation3 + $0x50] sm:$0xff] %vm554_vm1, %v6068_v18  ;;  %566 = vst.msk [vmem:[#allocation3 + $0x58] sm:$0xff] %vm554_vm1, %v6068_v18 }
 0x1bc   :  { %v1289_v48 = vadd.f32 %v1288_v43, %v6879_v34  ;;  %567 = vst.msk [vmem:[#allocation3 + $0x60] sm:$0xff] %vm554_vm1, %v6068_v18  ;;  %568 = vst.msk [vmem:[#allocation3 + $0x68] sm:$0xff] %vm554_vm1, %v6068_v18 }
 0x1bd   :  { %v7007_v45 = vpack.c.bf16 %v1287_v21, %v1281_v7  ;;  %569 = vst.msk [vmem:[#allocation3 + $0x70] sm:$0xff] %vm554_vm1, %v6068_v18  ;;  %570 = vst.msk [vmem:[#allocation3 + $0x78] sm:$0xff] %vm554_vm1, %v6068_v18  ;;  %v7197_v7 = vunpack.c.l.bf16 %v4771_v9  ;;  %v7255_v9 = vunpack.c.h.bf16 %v4804_v33 }
 0x1be   :  { %v7009_v50 = vpack.c.bf16 %v1289_v48, %v1283_v19  ;;  %v1292_v55 = vpop.f32.mrb[92].mxu0  ;;  %571 = vst.msk [vmem:[#allocation3 + $0x80] sm:$0xff] %vm554_vm1, %v6068_v18  ;;  %572 = vst.msk [vmem:[#allocation3 + $0x88] sm:$0xff] %vm554_vm1, %v6068_v18  ;;  %v4802_v19 = vld [vmem:[#allocation6 + $0x8] sm:$0xff]  }
 0x1bf   :  { %8924 = vst [vmem:[#allocation50_spill] sm:$0xff] %v7007_v45  ;;  %v1293_v5 = vadd.f32 %v1292_v55, %v6875_v36  ;;  %v1294_v62 = vpop.f32.mrb[93].mxu0  ;;  %573 = vst.msk [vmem:[#allocation3 + $0x90] sm:$0xff] %vm554_vm1, %v6068_v18  ;;  %v7215_v27 = vunpack.c.l.bf16 %v4802_v19 }
 0x1c0   :  { %8925 = vst [vmem:[#allocation59_spill] sm:$0xff] %v7009_v50  ;;  %v1295_v57 = vadd.f32 %v1294_v62, %v6879_v34  ;;  %574 = vst.msk [vmem:[#allocation3 + $0x98] sm:$0xff] %vm554_vm1, %v6068_v18 }
 0x1c1   :  { %5620 = vmatpush3.bf16.xpose.msra.mxu0 %v6881_v39  ;;  %v408_v39 = vadd.f32 %v8929_v29, %v8915_v59  ;;  %575 = vst.msk [vmem:[#allocation3 + $0xa0] sm:$0xff] %vm554_vm1, %v6068_v18  ;;  %576 = vst.msk [vmem:[#allocation3 + $0xa8] sm:$0xff] %vm554_vm1, %v6068_v18 }
 0x1c2   :  { %5622 = vmatprep.subr.bf16.mxu0 %v6900_v17  ;;  %v1298_v1 = vpop.f32.mrb[94].mxu0  ;;  %577 = vst.msk [vmem:[#allocation3 + $0xb0] sm:$0xff] %vm554_vm1, %v6068_v18  ;;  %578 = vst.msk [vmem:[#allocation3 + $0xb8] sm:$0xff] %vm554_vm1, %v6068_v18 }
 0x1c3   :  { %v1299_v6 = vadd.f32 %v1298_v1, %v6875_v36  ;;  %v1300_v13 = vpop.f32.mrb[95].mxu0  ;;  %v414_v36 = vadd.f32 %v8930_v40, %v8915_v59  ;;  %579 = vst.msk [vmem:[#allocation3 + $0xc0] sm:$0xff] %vm554_vm1, %v6068_v18  ;;  %580 = vst.msk [vmem:[#allocation3 + $0xc8] sm:$0xff] %vm554_vm1, %v6068_v18 }
 0x1c4   :  { %v1301_v8 = vadd.f32 %v1300_v13, %v6879_v34  ;;  %v420_v34 = vadd.f32 %v8931_v56, %v8915_v59  ;;  %581 = vst.msk [vmem:[#allocation3 + $0xd0] sm:$0xff] %vm554_vm1, %v6068_v18  ;;  %582 = vst.msk [vmem:[#allocation3 + $0xd8] sm:$0xff] %vm554_vm1, %v6068_v18 }
 0x1c5   :  { %v7017_v20 = vpack.c.bf16 %v1299_v6, %v1293_v5  ;;  %583 = vst.msk [vmem:[#allocation3 + $0xe0] sm:$0xff] %vm554_vm1, %v6068_v18  ;;  %584 = vst.msk [vmem:[#allocation3 + $0xe8] sm:$0xff] %vm554_vm1, %v6068_v18  ;;  %v7206_v5 = vunpack.c.h.bf16 %v4802_v19 }
 0x1c6   :  { %v7019_v54 = vpack.c.bf16 %v1301_v8, %v1295_v57  ;;  %585 = vst.msk [vmem:[#allocation3 + $0xf0] sm:$0xff] %vm554_vm1, %v6068_v18  ;;  %586 = vst.msk [vmem:[#allocation3 + $0xf8] sm:$0xff] %vm554_vm1, %v6068_v18 }
 0x1c7   :  { %8926 = vst [vmem:[#allocation60_spill] sm:$0xff] %v7017_v20  ;;  %587 = vst.msk [vmem:[#allocation3 + $0x100] sm:$0xff] %vm554_vm1, %v6068_v18  ;;  %v7646_v20 = vld [vmem:[#allocation3 + $0x70] sm:$0xff] }
 0x1c8   :  { %8927 = vst [vmem:[#allocation61_spill] sm:$0xff] %v7019_v54  ;;  %588 = vst.msk [vmem:[#allocation3 + $0x108] sm:$0xff] %vm554_vm1, %v6068_v18 }
 0x1c9   :  { %5624 = vmatpush3.bf16.xpose.msra.mxu0 %v6900_v17  ;;  %v8933_v17 = vld [vmem:[#allocation27_spill] sm:$0xff]  ;;  %589 = vst.msk [vmem:[#allocation3 + $0x110] sm:$0xff] %vm554_vm1, %v6068_v18  ;;  %590 = vst.msk [vmem:[#allocation3 + $0x118] sm:$0xff] %vm554_vm1, %v6068_v18 }
 0x1ca   :  { %v432_v47 = vadd.f32 %v8933_v17, %v8915_v59  ;;  %591 = vst.msk [vmem:[#allocation3 + $0x120] sm:$0xff] %vm554_vm1, %v6068_v18  ;;  %592 = vst.msk [vmem:[#allocation3 + $0x128] sm:$0xff] %vm554_vm1, %v6068_v18  ;;  %v8943_v59 = vmov 0.0  }
 0x1cb   :  { %593 = vst.msk [vmem:[#allocation3 + $0x130] sm:$0xff] %vm554_vm1, %v6068_v18  ;;  %594 = vst.msk [vmem:[#allocation3 + $0x138] sm:$0xff] %vm554_vm1, %v6068_v18 }
 0x1cc   :  { %595 = vst.msk [vmem:[#allocation3 + $0x140] sm:$0xff] %vm554_vm1, %v6068_v18  ;;  %596 = vst.msk [vmem:[#allocation3 + $0x148] sm:$0xff] %vm554_vm1, %v6068_v18  ;;  %v7636_v46 = vld [vmem:[#allocation3 + $0xe8] sm:$0xff] }
 0x1cd   :  { %597 = vst.msk [vmem:[#allocation3 + $0x150] sm:$0xff] %vm554_vm1, %v6068_v18  ;;  %598 = vst.msk [vmem:[#allocation3 + $0x158] sm:$0xff] %vm554_vm1, %v6068_v18 }
 0x1ce   :  { %599 = vst.msk [vmem:[#allocation3 + $0x160] sm:$0xff] %vm554_vm1, %v6068_v18  ;;  %600 = vst.msk [vmem:[#allocation3 + $0x168] sm:$0xff] %vm554_vm1, %v6068_v18 }
 0x1cf   :  { %601 = vst.msk [vmem:[#allocation3 + $0x170] sm:$0xff] %vm554_vm1, %v6068_v18  ;;  %602 = vst.msk [vmem:[#allocation3 + $0x178] sm:$0xff] %vm554_vm1, %v6068_v18  ;;  %v7698_v42 = vld [vmem:[#allocation3 + $0x108] sm:$0xff] }
 0x1d0   :  { %5290 = vmatmul.mubr.f32.vlgmr.msra.gmra.mrb[112].mxu0 %v402_v22  ;;  %603 = vst.msk [vmem:[#allocation4] sm:$0xff] %vm554_vm1, %v8943_v59  ;;  %604 = vst.msk [vmem:[#allocation4 + $0x8] sm:$0xff] %vm554_vm1, %v8943_v59  ;;  %v7724_v60 = vld [vmem:[#allocation3 + $0x118] sm:$0xff] }
 0x1d1   :  { %5292 = vmatprep.mubr.f32.mxu0 %v408_v39  ;;  %605 = vst.msk [vmem:[#allocation4 + $0x10] sm:$0xff] %vm554_vm1, %v8943_v59  ;;  %606 = vst.msk [vmem:[#allocation4 + $0x18] sm:$0xff] %vm554_vm1, %v8943_v59  ;;  %v7742_v15 = vld [vmem:[#allocation3 + $0x120] sm:$0xff] }
 0x1d2   :  { %607 = vst.msk [vmem:[#allocation4 + $0x20] sm:$0xff] %vm554_vm1, %v8943_v59  ;;  %608 = vst.msk [vmem:[#allocation4 + $0x28] sm:$0xff] %vm554_vm1, %v8943_v59  ;;  %v7766_v61 = vld [vmem:[#allocation3 + $0x130] sm:$0xff] }
 0x1d3   :  { %609 = vst.msk [vmem:[#allocation4 + $0x30] sm:$0xff] %vm554_vm1, %v8943_v59  ;;  %610 = vst.msk [vmem:[#allocation4 + $0x38] sm:$0xff] %vm554_vm1, %v8943_v59 }
 0x1d4   :  { %5293 = vmatmul.mubr.f32.gmra.mrb[114].mxu0 %v414_v36  ;;  %611 = vst.msk [vmem:[#allocation4 + $0x40] sm:$0xff] %vm554_vm1, %v8943_v59  ;;  %612 = vst.msk [vmem:[#allocation4 + $0x48] sm:$0xff] %vm554_vm1, %v8943_v59  ;;  %v4803_v36 = vld [vmem:[#allocation6 + $0x10] sm:$0xff]   ;;  %v7808_v23 = vld [vmem:[#allocation3 + $0x158] sm:$0xff] }
 0x1d5   :  { %5295 = vmatprep.mubr.f32.mxu0 %v420_v34  ;;  %613 = vst.msk [vmem:[#allocation4 + $0x50] sm:$0xff] %vm554_vm1, %v8943_v59  ;;  %614 = vst.msk [vmem:[#allocation4 + $0x58] sm:$0xff] %vm554_vm1, %v8943_v59  ;;  %v7229_v17 = vunpack.c.l.bf16 %v4803_v36 }
 0x1d6   :  { %615 = vst.msk [vmem:[#allocation4 + $0x60] sm:$0xff] %vm554_vm1, %v8943_v59  ;;  %616 = vst.msk [vmem:[#allocation4 + $0x68] sm:$0xff] %vm554_vm1, %v8943_v59 }
 0x1d7   :  { %617 = vst.msk [vmem:[#allocation4 + $0x70] sm:$0xff] %vm554_vm1, %v8943_v59  ;;  %618 = vst.msk [vmem:[#allocation4 + $0x78] sm:$0xff] %vm554_vm1, %v8943_v59 }
 0x1d8   :  { %5296 = vmatmul.mubr.f32.gmra.mrb[116].mxu0 %v426_v10  ;;  %619 = vst.msk [vmem:[#allocation4 + $0x80] sm:$0xff] %vm554_vm1, %v8943_v59  ;;  %620 = vst.msk [vmem:[#allocation4 + $0x88] sm:$0xff] %vm554_vm1, %v8943_v59 }
 0x1d9   :  { %5298 = vmatprep.mubr.f32.mxu0 %v432_v47  ;;  %621 = vst.msk [vmem:[#allocation4 + $0x90] sm:$0xff] %vm554_vm1, %v8943_v59  ;;  %622 = vst.msk [vmem:[#allocation4 + $0x98] sm:$0xff] %vm554_vm1, %v8943_v59 }
 0x1da   :  { %623 = vst.msk [vmem:[#allocation4 + $0xa0] sm:$0xff] %vm554_vm1, %v8943_v59  ;;  %624 = vst.msk [vmem:[#allocation4 + $0xa8] sm:$0xff] %vm554_vm1, %v8943_v59 }
 0x1db   :  { %625 = vst.msk [vmem:[#allocation4 + $0xb0] sm:$0xff] %vm554_vm1, %v8943_v59  ;;  %626 = vst.msk [vmem:[#allocation4 + $0xb8] sm:$0xff] %vm554_vm1, %v8943_v59 }
 0x1dc   :  { %5299 = vmatmul.mubr.f32.gmra.mrb[118].mxu0 %v438_v14  ;;  %627 = vst.msk [vmem:[#allocation4 + $0xc0] sm:$0xff] %vm554_vm1, %v8943_v59  ;;  %628 = vst.msk [vmem:[#allocation4 + $0xc8] sm:$0xff] %vm554_vm1, %v8943_v59 }
 0x1dd   :  { %5301 = vmatprep.mubr.f32.mxu0 %v444_v12  ;;  %629 = vst.msk [vmem:[#allocation4 + $0xd0] sm:$0xff] %vm554_vm1, %v8943_v59  ;;  %630 = vst.msk [vmem:[#allocation4 + $0xd8] sm:$0xff] %vm554_vm1, %v8943_v59  ;;  %v7235_v12 = vunpack.c.h.bf16 %v4803_v36 }
 0x1de   :  { %631 = vst.msk [vmem:[#allocation4 + $0xe0] sm:$0xff] %vm554_vm1, %v8943_v59  ;;  %632 = vst.msk [vmem:[#allocation4 + $0xe8] sm:$0xff] %vm554_vm1, %v8943_v59 }
 0x1df   :  { %633 = vst.msk [vmem:[#allocation4 + $0xf0] sm:$0xff] %vm554_vm1, %v8943_v59  ;;  %634 = vst.msk [vmem:[#allocation4 + $0xf8] sm:$0xff] %vm554_vm1, %v8943_v59 }
 0x1e0   :  { %5302 = vmatmul.mubr.f32.gmra.mrb[120].mxu0 %v450_v35  ;;  %635 = vst.msk [vmem:[#allocation4 + $0x100] sm:$0xff] %vm554_vm1, %v8943_v59  ;;  %636 = vst.msk [vmem:[#allocation4 + $0x108] sm:$0xff] %vm554_vm1, %v8943_v59 }
 0x1e1   :  { %5304 = vmatprep.mubr.f32.mxu0 %v456_v4  ;;  %637 = vst.msk [vmem:[#allocation4 + $0x110] sm:$0xff] %vm554_vm1, %v8943_v59  ;;  %638 = vst.msk [vmem:[#allocation4 + $0x118] sm:$0xff] %vm554_vm1, %v8943_v59 }
 0x1e2   :  { %639 = vst.msk [vmem:[#allocation4 + $0x120] sm:$0xff] %vm554_vm1, %v8943_v59  ;;  %640 = vst.msk [vmem:[#allocation4 + $0x128] sm:$0xff] %vm554_vm1, %v8943_v59 }
 0x1e3   :  { %641 = vst.msk [vmem:[#allocation4 + $0x130] sm:$0xff] %vm554_vm1, %v8943_v59  ;;  %642 = vst.msk [vmem:[#allocation4 + $0x138] sm:$0xff] %vm554_vm1, %v8943_v59 }
 0x1e4   :  { %5305 = vmatmul.mubr.f32.gmra.mrb[122].mxu0 %v462_v41  ;;  %643 = vst.msk [vmem:[#allocation4 + $0x140] sm:$0xff] %vm554_vm1, %v8943_v59  ;;  %644 = vst.msk [vmem:[#allocation4 + $0x148] sm:$0xff] %vm554_vm1, %v8943_v59 }
 0x1e5   :  { %5307 = vmatprep.mubr.f32.mxu0 %v468_v52  ;;  %645 = vst.msk [vmem:[#allocation4 + $0x150] sm:$0xff] %vm554_vm1, %v8943_v59  ;;  %646 = vst.msk [vmem:[#allocation4 + $0x158] sm:$0xff] %vm554_vm1, %v8943_v59 }
 0x1e6   :  { %647 = vst.msk [vmem:[#allocation4 + $0x160] sm:$0xff] %vm554_vm1, %v8943_v59  ;;  %648 = vst.msk [vmem:[#allocation4 + $0x168] sm:$0xff] %vm554_vm1, %v8943_v59 }
 0x1e7   :  { %649 = vst.msk [vmem:[#allocation4 + $0x170] sm:$0xff] %vm554_vm1, %v8943_v59  ;;  %650 = vst.msk [vmem:[#allocation4 + $0x178] sm:$0xff] %vm554_vm1, %v8943_v59 }
 0x1e8   :  { %5308 = vmatmul.mubr.f32.gmra.mrb[124].mxu0 %v474_v28  ;;  %8997 = vst [vmem:[#allocation100_spill] sm:$0xff] %v7724_v60 }
 0x1e9   :  { %5310 = vmatprep.mubr.f32.mxu0 %v480_v58 }
 0x1ec   :  { %5311 = vmatmul.mubr.f32.gmra.mrb[126].mxu0 %v8942_v51 }
 0x262   :  { %v5067_v30 = vpop.f32.mrb[64].mxu1 }
 0x263   :  { %v7200_v24 = vadd.f32 %v5067_v30, %v7195_v31  ;;  %v1417_v21 = vpop.f32.mrb[65].mxu1  ;;  %v5179_v43 = vpop.f32.mrb[96].mxu0 }
 0x264   :  { %v2220_v48 = vpop.f32.mrb[97].mxu0  ;;  %v7209_v57 = vadd.f32 %v7197_v7, %v1417_v21  ;;  %v7219_v29 = vadd.f32 %v5179_v43, %v7195_v31 }
 0x265   :  { %v7203_v55 = vadd.f32 %v7197_v7, %v2220_v48  ;;  %1514 = vmax.xlane.f32.xlu0 %v7200_v24  ;;  %v4805_v48 = vld [vmem:[#allocation6 + $0x20] sm:$0xff]  }
 0x266   :  { %v5070_v62 = vpop.f32.mrb[66].mxu1  ;;  %8945 = vst [vmem:[#allocation19_spill] sm:$0xff] %v7219_v29 }
 0x267   :  { %8944 = vst [vmem:[#allocation17_spill] sm:$0xff] %v7203_v55  ;;  %v5182_v1 = vpop.f32.mrb[98].mxu0  ;;  %2316 = vmax.xlane.f32.xlu1 %v7203_v55  ;;  %v1427_v6 = vpop.f32.mrb[67].mxu1  ;;  %v7213_v8 = vadd.f32 %v5070_v62, %v7206_v5  ;;  %v7525_v55 = vld [vmem:[#allocation3 + $0x48] sm:$0xff] }
 0x268   :  { %v2230_v13 = vpop.f32.mrb[99].mxu0  ;;  %v7223_v34 = vadd.f32 %v7215_v27, %v1427_v6  ;;  %v7233_v37 = vadd.f32 %v5182_v1, %v7206_v5 }
 0x269   :  { %1512 = vmax.xlane.f32.xlu0 %v7209_v57  ;;  %v7227_v10 = vadd.f32 %v7215_v27, %v2230_v13 }
 0x26a   :  { %v5073_v22 = vpop.f32.mrb[68].mxu1  ;;  %8946 = vst [vmem:[#allocation21_spill] sm:$0xff] %v7223_v34  ;;  %8948 = vst [vmem:[#allocation25_spill] sm:$0xff] %v7233_v37 }
 0x26b   :  { %v5185_v39 = vpop.f32.mrb[100].mxu0  ;;  %1518 = vmax.xlane.f32.xlu1 %v7213_v8  ;;  %v1437_v40 = vpop.f32.mrb[69].mxu1  ;;  %8947 = vst [vmem:[#allocation23_spill] sm:$0xff] %v7227_v10  ;;  %v7243_v52 = vadd.f32 %v5073_v22, %v7235_v12  ;;  %v7269_v22 = vunpack.c.l.bf16 %v4805_v48 }
 0x26c   :  { %v2240_v56 = vpop.f32.mrb[101].mxu0  ;;  %v7239_v35 = vadd.f32 %v7229_v17, %v1437_v40  ;;  %v7253_v59 = vadd.f32 %v5185_v39, %v7235_v12 }
 0x26d   :  { %2318 = vmax.xlane.f32.xlu0 %v7219_v29  ;;  %8950 = vst [vmem:[#allocation29_spill] sm:$0xff] %v7243_v52  ;;  %v7247_v28 = vadd.f32 %v7229_v17, %v2240_v56  ;;  %v7610_v29 = vld [vmem:[#allocation3 + $0x68] sm:$0xff] }
 0x26e   :  { %v5076_v44 = vpop.f32.mrb[70].mxu1  ;;  %8949 = vst [vmem:[#allocation27_spill] sm:$0xff] %v7239_v35  ;;  %8952 = vst [vmem:[#allocation33_spill] sm:$0xff] %v7253_v59 }
 0x26f   :  { %v1447_v47 = vpop.f32.mrb[71].mxu1  ;;  %v5188_v25 = vpop.f32.mrb[102].mxu0  ;;  %1516 = vmax.xlane.f32.xlu1 %v7223_v34  ;;  %8951 = vst [vmem:[#allocation31_spill] sm:$0xff] %v7247_v28  ;;  %v7263_v1 = vadd.f32 %v5076_v44, %v7255_v9  ;;  %v7810_v34 = vld [vmem:[#allocation3 + $0x150] sm:$0xff] }
 0x270   :  { %v2250_v14 = vpop.f32.mrb[103].mxu0  ;;  %v7259_v19 = vadd.f32 %v7249_v2, %v1447_v47  ;;  %v7273_v56 = vadd.f32 %v5188_v25, %v7255_v9  ;;  %v7275_v47 = vunpack.c.h.bf16 %v4805_v48  ;;  %9005 = vst [vmem:[#allocation108_spill] sm:$0xff] %v7810_v34 }
 0x271   :  { %2320 = vmax.xlane.f32.xlu0 %v7227_v10  ;;  %8954 = vst [vmem:[#allocation37_spill] sm:$0xff] %v7263_v1  ;;  %v7267_v13 = vadd.f32 %v7249_v2, %v2250_v14  ;;  %v4806_v14 = vld [vmem:[#allocation6 + $0x28] sm:$0xff]  }
 0x272   :  { %v5079_v53 = vpop.f32.mrb[72].mxu1  ;;  %8953 = vst [vmem:[#allocation35_spill] sm:$0xff] %v7259_v19  ;;  %8956 = vst [vmem:[#allocation43_spill] sm:$0xff] %v7273_v56  ;;  %v7289_v25 = vunpack.c.l.bf16 %v4806_v14 }
 0x273   :  { %v1457_v0 = vpop.f32.mrb[73].mxu1  ;;  %v5191_v4 = vpop.f32.mrb[104].mxu0  ;;  %2322 = vmax.xlane.f32.xlu1 %v7233_v37  ;;  %8955 = vst [vmem:[#allocation39_spill] sm:$0xff] %v7267_v13  ;;  %v7283_v33 = vadd.f32 %v5079_v53, %v7275_v47  ;;  %v4807_v53 = vld [vmem:[#allocation6 + $0x30] sm:$0xff]   ;;  %v7505_v37 = vld [vmem:[#allocation3 + $0xb8] sm:$0xff] }
 0x274   :  { %v2260_v41 = vpop.f32.mrb[105].mxu0  ;;  %v7279_v44 = vadd.f32 %v7269_v22, %v1457_v0  ;;  %v7293_v48 = vadd.f32 %v5191_v4, %v7275_v47  ;;  %v7295_v0 = vunpack.c.h.bf16 %v4806_v14  ;;  %v7309_v4 = vunpack.c.l.bf16 %v4807_v53 }
 0x275   :  { %1520 = vmax.xlane.f32.xlu0 %v7239_v35  ;;  %8958 = vst [vmem:[#allocation48_spill] sm:$0xff] %v7283_v33  ;;  %v7287_v3 = vadd.f32 %v7269_v22, %v2260_v41  ;;  %v7740_v35 = vld [vmem:[#allocation3 + $0x128] sm:$0xff] }
 0x276   :  { %v5082_v16 = vpop.f32.mrb[74].mxu1  ;;  %8957 = vst [vmem:[#allocation45_spill] sm:$0xff] %v7279_v44  ;;  %8960 = vst [vmem:[#allocation63_spill] sm:$0xff] %v7293_v48 }
 0x277   :  { %v1467_v58 = vpop.f32.mrb[75].mxu1  ;;  %v5194_v51 = vpop.f32.mrb[106].mxu0  ;;  %1522 = vmax.xlane.f32.xlu1 %v7243_v52  ;;  %8959 = vst [vmem:[#allocation62_spill] sm:$0xff] %v7287_v3  ;;  %v7303_v41 = vadd.f32 %v5082_v16, %v7295_v0  ;;  %v4808_v16 = vld [vmem:[#allocation6 + $0x38] sm:$0xff]   ;;  %8998 = vst [vmem:[#allocation101_spill] sm:$0xff] %v7740_v35 }
 0x278   :  { %v2270_v18 = vpop.f32.mrb[107].mxu0  ;;  %v7299_v54 = vadd.f32 %v7289_v25, %v1467_v58  ;;  %v7313_v14 = vadd.f32 %v5194_v51, %v7295_v0  ;;  %v4797_v58 = vunpack.c.h.bf16 %v4807_v53  ;;  %v4800_v38 = vunpack.c.l.bf16 %v4808_v16  ;;  %v7764_v52 = vld [vmem:[#allocation3 + $0x138] sm:$0xff] }
 0x279   :  { %2324 = vmax.xlane.f32.xlu0 %v7247_v28  ;;  %8962 = vst [vmem:[#allocation65_spill] sm:$0xff] %v7303_v41  ;;  %v7307_v50 = vadd.f32 %v7289_v25, %v2270_v18  ;;  %v4801_v53 = vunpack.c.h.bf16 %v4808_v16  ;;  %v7554_v28 = vld [vmem:[#allocation3 + $0x50] sm:$0xff]  ;;  %9001 = vst [vmem:[#allocation104_spill] sm:$0xff] %v7764_v52 }
 0x27a   :  { %v5085_v30 = vpop.f32.mrb[76].mxu1  ;;  %8961 = vst [vmem:[#allocation64_spill] sm:$0xff] %v7299_v54  ;;  %8964 = vst [vmem:[#allocation67_spill] sm:$0xff] %v7313_v14 }
 0x27b   :  { %v1477_v21 = vpop.f32.mrb[77].mxu1  ;;  %v5197_v43 = vpop.f32.mrb[108].mxu0  ;;  %2326 = vmax.xlane.f32.xlu1 %v7253_v59  ;;  %8963 = vst [vmem:[#allocation66_spill] sm:$0xff] %v7307_v50  ;;  %v7320_v63 = vadd.f32 %v5085_v30, %v4797_v58  ;;  %v7497_v59 = vld [vmem:[#allocation3 + $0xb0] sm:$0xff] }
 0x27c   :  { %v2280_v62 = vpop.f32.mrb[109].mxu0  ;;  %v7317_v32 = vadd.f32 %v7309_v4, %v1477_v21  ;;  %v7327_v51 = vadd.f32 %v5197_v43, %v4797_v58 }
 0x27d   :  { %1524 = vmax.xlane.f32.xlu0 %v7259_v19  ;;  %8966 = vst [vmem:[#allocation69_spill] sm:$0xff] %v7320_v63  ;;  %v7324_v18 = vadd.f32 %v7309_v4, %v2280_v62  ;;  %v7682_v19 = vld [vmem:[#allocation3 + $0xf8] sm:$0xff] }
 0x27e   :  { %v5088_v6 = vpop.f32.mrb[78].mxu1  ;;  %8965 = vst [vmem:[#allocation68_spill] sm:$0xff] %v7317_v32  ;;  %8968 = vst [vmem:[#allocation71_spill] sm:$0xff] %v7327_v51 }
 0x27f   :  { %v1487_v39 = vpop.f32.mrb[79].mxu1  ;;  %v5200_v40 = vpop.f32.mrb[110].mxu0  ;;  %1526 = vmax.xlane.f32.xlu1 %v7263_v1  ;;  %8967 = vst [vmem:[#allocation70_spill] sm:$0xff] %v7324_v18  ;;  %v7333_v49 = vadd.f32 %v5088_v6, %v4801_v53 }
 0x280   :  { %v2290_v36 = vpop.f32.mrb[111].mxu0  ;;  %v7330_v21 = vadd.f32 %v4800_v38, %v1487_v39  ;;  %v7339_v62 = vadd.f32 %v5200_v40, %v4801_v53 }
 0x281   :  { %2328 = vmax.xlane.f32.xlu0 %v7267_v13  ;;  %8970 = vst [vmem:[#allocation73_spill] sm:$0xff] %v7333_v49  ;;  %v7336_v30 = vadd.f32 %v4800_v38, %v2290_v36  ;;  %v7534_v13 = vld [vmem:[#allocation3 + $0xc0] sm:$0xff] }
 0x282   :  { %8969 = vst [vmem:[#allocation72_spill] sm:$0xff] %v7330_v21  ;;  %8972 = vst [vmem:[#allocation75_spill] sm:$0xff] %v7339_v62 }
 0x283   :  { %2330 = vmax.xlane.f32.xlu1 %v7273_v56  ;;  %8971 = vst [vmem:[#allocation74_spill] sm:$0xff] %v7336_v30  ;;  %v7489_v56 = vld [vmem:[#allocation3 + $0x38] sm:$0xff] }
 0x285   :  { %1528 = vmax.xlane.f32.xlu0 %v7279_v44  ;;  %v7624_v44 = vld [vmem:[#allocation3 + $0xe0] sm:$0xff] }
 0x287   :  { %1530 = vmax.xlane.f32.xlu1 %v7283_v33 }
 0x289   :  { %2332 = vmax.xlane.f32.xlu0 %v7287_v3  ;;  %v7514_v3 = vld [vmem:[#allocation3 + $0x40] sm:$0xff] }
 0x28b   :  { %2334 = vmax.xlane.f32.xlu1 %v7293_v48  ;;  %v7481_v48 = vld [vmem:[#allocation3 + $0x30] sm:$0xff] }
 0x28d   :  { %1532 = vmax.xlane.f32.xlu0 %v7299_v54 }
 0x28f   :  { %1534 = vmax.xlane.f32.xlu1 %v7303_v41 }
 0x291   :  { %2336 = vmax.xlane.f32.xlu0 %v7307_v50 }
 0x293   :  { %2338 = vmax.xlane.f32.xlu1 %v7313_v14 }
 0x295   :  { %1536 = vmax.xlane.f32.xlu0 %v7317_v32 }
 0x297   :  { %1538 = vmax.xlane.f32.xlu1 %v7320_v63 }
 0x299   :  { %2340 = vmax.xlane.f32.xlu0 %v7324_v18 }
 0x29b   :  { %2342 = vmax.xlane.f32.xlu1 %v7327_v51 }
 0x29d   :  { %1540 = vmax.xlane.f32.xlu0 %v7330_v21 }
 0x29f   :  { %1542 = vmax.xlane.f32.xlu1 %v7333_v49 }
 0x2a1   :  { %2344 = vmax.xlane.f32.xlu0 %v7336_v30 }
 0x2a3   :  { %v5291_v43 = vpop.f32.mrb[112].mxu0  ;;  %2346 = vmax.xlane.f32.xlu1 %v7339_v62 }
 0x2a4   :  { %v7344_v39 = vadd.f32 %v5291_v43, %v7195_v31  ;;  %v3025_v16 = vpop.f32.mrb[113].mxu0 }
 0x2a5   :  { %v7347_v6 = vadd.f32 %v7197_v7, %v3025_v16 }
 0x2a6   :  { %8973 = vst [vmem:[#allocation76_spill] sm:$0xff] %v7344_v39  ;;  %3123 = vmax.xlane.f32.xlu0 %v7344_v39  ;;  %v7474_v39 = vld [vmem:[#allocation3 + $0xa8] sm:$0xff] }
 0x2a7   :  { %8974 = vst [vmem:[#allocation77_spill] sm:$0xff] %v7347_v6  ;;  %v5294_v36 = vpop.f32.mrb[114].mxu0  ;;  %3121 = vmax.xlane.f32.xlu1 %v7347_v6 }
 0x2a8   :  { %v7352_v40 = vadd.f32 %v5294_v36, %v7206_v5  ;;  %v3035_v51 = vpop.f32.mrb[115].mxu0 }
 0x2a9   :  { %v7355_v11 = vadd.f32 %v7215_v27, %v3035_v51 }
 0x2aa   :  { %8975 = vst [vmem:[#allocation78_spill] sm:$0xff] %v7352_v40 }
 0x2ab   :  { %8976 = vst [vmem:[#allocation79_spill] sm:$0xff] %v7355_v11  ;;  %v5297_v62 = vpop.f32.mrb[116].mxu0  ;;  %3127 = vmax.xlane.f32.xlu1 %v7352_v40  ;;  %3125 = vmax.xlane.f32.xlu0 %v7355_v11  ;;  %v7466_v40 = vld [vmem:[#allocation3 + $0xa0] sm:$0xff] }
 0x2ac   :  { %v7360_v31 = vadd.f32 %v5297_v62, %v7235_v12  ;;  %v3045_v7 = vpop.f32.mrb[117].mxu0 }
 0x2ad   :  { %v7363_v43 = vadd.f32 %v7229_v17, %v3045_v7 }
 0x2ae   :  { %8977 = vst [vmem:[#allocation80_spill] sm:$0xff] %v7360_v31 }
 0x2af   :  { %8978 = vst [vmem:[#allocation81_spill] sm:$0xff] %v7363_v43  ;;  %v5300_v16 = vpop.f32.mrb[118].mxu0  ;;  %3131 = vmax.xlane.f32.xlu1 %v7360_v31  ;;  %3129 = vmax.xlane.f32.xlu0 %v7363_v43  ;;  %v7458_v31 = vld [vmem:[#allocation3 + $0x28] sm:$0xff] }
 0x2b0   :  { %v7368_v5 = vadd.f32 %v5300_v16, %v7255_v9  ;;  %v3055_v27 = vpop.f32.mrb[119].mxu0 }
 0x2b1   :  { %v7371_v51 = vadd.f32 %v7249_v2, %v3055_v27 }
 0x2b2   :  { %8979 = vst [vmem:[#allocation82_spill] sm:$0xff] %v7368_v5 }
 0x2b3   :  { %8980 = vst [vmem:[#allocation83_spill] sm:$0xff] %v7371_v51  ;;  %v5303_v36 = vpop.f32.mrb[120].mxu0  ;;  %3135 = vmax.xlane.f32.xlu1 %v7368_v5  ;;  %3133 = vmax.xlane.f32.xlu0 %v7371_v51  ;;  %v7450_v5 = vld [vmem:[#allocation3 + $0x20] sm:$0xff] }
 0x2b4   :  { %v7376_v17 = vadd.f32 %v5303_v36, %v7275_v47  ;;  %v3065_v12 = vpop.f32.mrb[121].mxu0 }
 0x2b5   :  { %v7379_v62 = vadd.f32 %v7269_v22, %v3065_v12 }
 0x2b6   :  { %8981 = vst [vmem:[#allocation84_spill] sm:$0xff] %v7376_v17 }
 0x2b7   :  { %8982 = vst [vmem:[#allocation85_spill] sm:$0xff] %v7379_v62  ;;  %v5306_v7 = vpop.f32.mrb[122].mxu0  ;;  %3139 = vmax.xlane.f32.xlu1 %v7376_v17  ;;  %3137 = vmax.xlane.f32.xlu0 %v7379_v62  ;;  %v7443_v17 = vld [vmem:[#allocation3 + $0x98] sm:$0xff] }
 0x2b8   :  { %v7384_v2 = vadd.f32 %v5306_v7, %v7295_v0  ;;  %v3075_v9 = vpop.f32.mrb[123].mxu0 }
 0x2b9   :  { %v7387_v16 = vadd.f32 %v7289_v25, %v3075_v9 }
 0x2ba   :  { %8983 = vst [vmem:[#allocation86_spill] sm:$0xff] %v7384_v2 }
 0x2bb   :  { %8984 = vst [vmem:[#allocation87_spill] sm:$0xff] %v7387_v16  ;;  %v5309_v27 = vpop.f32.mrb[124].mxu0  ;;  %3143 = vmax.xlane.f32.xlu1 %v7384_v2  ;;  %3141 = vmax.xlane.f32.xlu0 %v7387_v16 }
 0x2bc   :  { %v7391_v47 = vadd.f32 %v5309_v27, %v4797_v58  ;;  %v3085_v22 = vpop.f32.mrb[125].mxu0  ;;  %v7404_v58 = vld [vmem:[#allocation3 + $0x8] sm:$0xff]  ;;  %v7406_v27 = vld [vmem:[#allocation3 + $0x80] sm:$0xff] }
 0x2bd   :  { %v7394_v36 = vadd.f32 %v7309_v4, %v3085_v22 }
 0x2be   :  { %8985 = vst [vmem:[#allocation88_spill] sm:$0xff] %v7391_v47 }
 0x2bf   :  { %8986 = vst [vmem:[#allocation89_spill] sm:$0xff] %v7394_v36  ;;  %v5312_v12 = vpop.f32.mrb[126].mxu0  ;;  %3147 = vmax.xlane.f32.xlu1 %v7391_v47  ;;  %3145 = vmax.xlane.f32.xlu0 %v7394_v36  ;;  %v1496_v47 = vld [vmem:[#allocation3] sm:$0xff]  ;;  %v7427_v36 = vld [vmem:[#allocation3 + $0x10] sm:$0xff] }
 0x2c0   :  { %v7398_v0 = vadd.f32 %v5312_v12, %v4801_v53  ;;  %v3095_v25 = vpop.f32.mrb[127].mxu0  ;;  %v7417_v12 = vld [vmem:[#allocation3 + $0x18] sm:$0xff] }
 0x2c1   :  { %v7400_v7 = vadd.f32 %v4800_v38, %v3095_v25 }
 0x2c2   :  { %8987 = vst [vmem:[#allocation90_spill] sm:$0xff] %v7398_v0 }
 0x2c3   :  { %8988 = vst [vmem:[#allocation91_spill] sm:$0xff] %v7400_v7  ;;  %3151 = vmax.xlane.f32.xlu1 %v7398_v0  ;;  %3149 = vmax.xlane.f32.xlu0 %v7400_v7 }
 0x2f2   :  { %v1515_v9 = vpop.xlane.xlu0 %1514 }
 0x2f3   :  { %v7409_v4 = vmax.f32 %v7404_v58, %v1515_v9  ;;  %v7421_v9 = vld [vmem:[#allocation3 + $0x88] sm:$0xff] }
 0x2f4   :  { %v2317_v22 = vpop.xlane.xlu1 %2316 }
 0x2f5   :  { %2123 = vst.msk [vmem:[#allocation3 + $0x8] sm:$0xff] %vm554_vm1, %v7409_v4  ;;  %v7414_v38 = vmax.f32 %v7406_v27, %v2317_v22  ;;  %1615 = vperm.xlu1 %5699, %v7409_v4  }
 0x2f6   :  { %v1513_v53 = vpop.xlane.xlu0 %1512 }
 0x2f7   :  { %2927 = vst.msk [vmem:[#allocation3 + $0x80] sm:$0xff] %vm554_vm1, %v7414_v38  ;;  %v1544_v25 = vmax.f32 %v1496_v47, %v1513_v53  ;;  %v7434_v53 = vld [vmem:[#allocation3 + $0x90] sm:$0xff] }
 0x2f8   :  { %v1519_v7 = vpop.xlane.xlu1 %1518 }
 0x2f9   :  { %2122 = vst.msk [vmem:[#allocation3] sm:$0xff] %vm554_vm1, %v1544_v25  ;;  %v7425_v0 = vmax.f32 %v7417_v12, %v1519_v7  ;;  %1610 = vperm.xlu0 %5700, %v1544_v25   ;;  %v1560_v30 = vsub.f32 %v1496_v47, %v1544_v25 }
 0x2fa   :  { %v2319_v22 = vpop.xlane.xlu0 %2318 }
 0x2fb   :  { %2125 = vst.msk [vmem:[#allocation3 + $0x18] sm:$0xff] %vm554_vm1, %v7425_v0  ;;  %v7432_v16 = vmax.f32 %v7421_v9, %v2319_v22  ;;  %v1576_v47 = vmul.f32 1.442695, %v1560_v30  ;;  %v2364_v30 = vsub.f32 %v7406_v27, %v7414_v38 }
 0x2fc   :  { %v1517_v2 = vpop.xlane.xlu1 %1516 }
 0x2fd   :  { %2928 = vst.msk [vmem:[#allocation3 + $0x88] sm:$0xff] %vm554_vm1, %v7432_v16  ;;  %v7439_v62 = vmax.f32 %v7427_v36, %v1517_v2  ;;  %2414 = vperm.xlu0 %5700, %v7414_v38   ;;  %2419 = vperm.xlu1 %5699, %v7432_v16   ;;  %5701 = vpow2.f32 %v1576_v47  ;;  %v2380_v38 = vmul.f32 1.442695, %v2364_v30 }
 0x2fe   :  { %v2321_v7 = vpop.xlane.xlu0 %2320 }
 0x2ff   :  { %2124 = vst.msk [vmem:[#allocation3 + $0x10] sm:$0xff] %vm554_vm1, %v7439_v62  ;;  %v7448_v22 = vmax.f32 %v7434_v53, %v2321_v7  ;;  %5703 = vpow2.f32 %v2380_v38 }
 0x300   :  { %v2323_v51 = vpop.xlane.xlu1 %2322 }
 0x301   :  { %2929 = vst.msk [vmem:[#allocation3 + $0x90] sm:$0xff] %vm554_vm1, %v7448_v22  ;;  %v7455_v2 = vmax.f32 %v7443_v17, %v2323_v51  ;;  %1625 = vperm.xlu1 %5699, %v7425_v0  }
 0x302   :  { %v1521_v43 = vpop.xlane.xlu0 %1520 }
 0x303   :  { %2930 = vst.msk [vmem:[#allocation3 + $0x98] sm:$0xff] %vm554_vm1, %v7455_v2  ;;  %v7463_v7 = vmax.f32 %v7450_v5, %v1521_v43  ;;  %2429 = vperm.xlu0 %5700, %v7455_v2  }
 0x304   :  { %v1523_v11 = vpop.xlane.xlu1 %1522 }
 0x305   :  { %2126 = vst.msk [vmem:[#allocation3 + $0x20] sm:$0xff] %vm554_vm1, %v7463_v7  ;;  %v7471_v51 = vmax.f32 %v7458_v31, %v1523_v11  ;;  %1620 = vperm.xlu1 %5699, %v7439_v62  }
 0x306   :  { %v2325_v6 = vpop.xlane.xlu0 %2324 }
 0x307   :  { %2127 = vst.msk [vmem:[#allocation3 + $0x28] sm:$0xff] %vm554_vm1, %v7471_v51  ;;  %v7479_v43 = vmax.f32 %v7466_v40, %v2325_v6 }
 0x308   :  { %v2327_v14 = vpop.xlane.xlu1 %2326 }
 0x309   :  { %2931 = vst.msk [vmem:[#allocation3 + $0xa0] sm:$0xff] %vm554_vm1, %v7479_v43  ;;  %v7486_v11 = vmax.f32 %v7474_v39, %v2327_v14  ;;  %2424 = vperm.xlu1 %5699, %v7448_v22  }
 0x30a   :  { %v1525_v18 = vpop.xlane.xlu0 %1524 }
 0x30b   :  { %2932 = vst.msk [vmem:[#allocation3 + $0xa8] sm:$0xff] %vm554_vm1, %v7486_v11  ;;  %v7494_v6 = vmax.f32 %v7481_v48, %v1525_v18  ;;  %2439 = vperm.xlu0 %5700, %v7486_v11  }
 0x30c   :  { %v1527_v25 = vpop.xlane.xlu1 %1526 }
 0x30d   :  { %2128 = vst.msk [vmem:[#allocation3 + $0x30] sm:$0xff] %vm554_vm1, %v7494_v6  ;;  %v7502_v14 = vmax.f32 %v7489_v56, %v1527_v25  ;;  %1635 = vperm.xlu1 %5699, %v7471_v51  }
 0x30e   :  { %v2329_v50 = vpop.xlane.xlu0 %2328 }
 0x30f   :  { %2129 = vst.msk [vmem:[#allocation3 + $0x38] sm:$0xff] %vm554_vm1, %v7502_v14  ;;  %v7510_v18 = vmax.f32 %v7497_v59, %v2329_v50  ;;  %v1561_v50 = vsub.f32 %v7404_v58, %v7409_v4  ;;  %v2365_v4 = vsub.f32 %v7421_v9, %v7432_v16  ;;  %v7564_v9 = vpop.eup %5701 }
 0x310   :  { %v2331_v21 = vpop.xlane.xlu1 %2330  ;;  %8989 = vst [vmem:[#allocation92_spill] sm:$0xff] %v7564_v9  ;;  %v7606_v54 = vpop.eup %5703 }
 0x311   :  { %2933 = vst.msk [vmem:[#allocation3 + $0xb0] sm:$0xff] %vm554_vm1, %v7510_v18  ;;  %v7519_v25 = vmax.f32 %v7505_v37, %v2331_v21  ;;  %1630 = vperm.xlu1 %5699, %v7463_v7   ;;  %2444 = vperm.xlu0 %5700, %v7510_v18   ;;  %v1563_v21 = vsub.f32 %v7417_v12, %v7425_v0  ;;  %v7546_v0 = vld [vmem:[#allocation3 + $0xc8] sm:$0xff]  ;;  %8990 = vst [vmem:[#allocation93_spill] sm:$0xff] %v7606_v54 }
 0x312   :  { %v1529_v49 = vpop.xlane.xlu0 %1528 }
 0x313   :  { %2934 = vst.msk [vmem:[#allocation3 + $0xb8] sm:$0xff] %vm554_vm1, %v7519_v25  ;;  %v7530_v27 = vmax.f32 %v7514_v3, %v1529_v49  ;;  %v1578_v49 = vmul.f32 1.442695, %v1561_v50 }
 0x314   :  { %v1531_v47 = vpop.xlane.xlu1 %1530 }
 0x315   :  { %2130 = vst.msk [vmem:[#allocation3 + $0x40] sm:$0xff] %vm554_vm1, %v7530_v27  ;;  %v7541_v58 = vmax.f32 %v7525_v55, %v1531_v47  ;;  %2434 = vperm.xlu1 %5699, %v7479_v43   ;;  %v1582_v47 = vmul.f32 1.442695, %v1563_v21  ;;  %5705 = vpow2.f32 %v1578_v49  ;;  %v7566_v21 = vld [vmem:[#allocation3 + $0x58] sm:$0xff] }
 0x316   :  { %v2333_v30 = vpop.xlane.xlu0 %2332 }
 0x317   :  { %2131 = vst.msk [vmem:[#allocation3 + $0x48] sm:$0xff] %vm554_vm1, %v7541_v58  ;;  %v7551_v12 = vmax.f32 %v7534_v13, %v2333_v30  ;;  %1655 = vperm.xlu0 %5700, %v7541_v58   ;;  %v2382_v30 = vmul.f32 1.442695, %v2365_v4  ;;  %5707 = vpow2.f32 %v1582_v47  ;;  %v7578_v4 = vld [vmem:[#allocation3 + $0xd0] sm:$0xff]  ;;  %v7588_v47 = vld [vmem:[#allocation3 + $0xd8] sm:$0xff] }
 0x318   :  { %v2335_v32 = vpop.xlane.xlu1 %2334 }
 0x319   :  { %2935 = vst.msk [vmem:[#allocation3 + $0xc0] sm:$0xff] %vm554_vm1, %v7551_v12  ;;  %v7561_v16 = vmax.f32 %v7546_v0, %v2335_v32  ;;  %1645 = vperm.xlu1 %5699, %v7502_v14   ;;  %v2367_v32 = vsub.f32 %v7443_v17, %v7455_v2  ;;  %5709 = vpow2.f32 %v2382_v30 }
 0x31a   :  { %v1533_v38 = vpop.xlane.xlu0 %1532 }
 0x31b   :  { %2936 = vst.msk [vmem:[#allocation3 + $0xc8] sm:$0xff] %vm554_vm1, %v7561_v16  ;;  %v7573_v50 = vmax.f32 %v7554_v28, %v1533_v38  ;;  %1851 = vperm.xlu0 %5700, %v7564_v9   ;;  %v2386_v2 = vmul.f32 1.442695, %v2367_v32  ;;  %v7596_v9 = vld [vmem:[#allocation3 + $0x60] sm:$0xff] }
 0x31c   :  { %v1535_v49 = vpop.xlane.xlu1 %1534 }
 0x31d   :  { %2132 = vst.msk [vmem:[#allocation3 + $0x50] sm:$0xff] %vm554_vm1, %v7573_v50  ;;  %v7585_v63 = vmax.f32 %v7566_v21, %v1535_v49  ;;  %1640 = vperm.xlu1 %5699, %v7494_v6   ;;  %5711 = vpow2.f32 %v2386_v2 }
 0x31e   :  { %v2337_v38 = vpop.xlane.xlu0 %2336 }
 0x31f   :  { %2133 = vst.msk [vmem:[#allocation3 + $0x58] sm:$0xff] %vm554_vm1, %v7585_v63  ;;  %v7593_v17 = vmax.f32 %v7578_v4, %v2337_v38  ;;  %2459 = vperm.xlu0 %5700, %v7561_v16   ;;  %v1562_v38 = vsub.f32 %v7427_v36, %v7439_v62  ;;  %v1565_v62 = vsub.f32 %v7458_v31, %v7471_v51 }
 0x320   :  { %v2339_v10 = vpop.xlane.xlu1 %2338 }
 0x321   :  { %2937 = vst.msk [vmem:[#allocation3 + $0xd0] sm:$0xff] %vm554_vm1, %v7593_v17  ;;  %v7603_v30 = vmax.f32 %v7588_v47, %v2339_v10  ;;  %2449 = vperm.xlu1 %5699, %v7519_v25   ;;  %v7620_v10 = vpop.eup %5705  ;;  %v1580_v2 = vmul.f32 1.442695, %v1562_v38 }
 0x322   :  { %v1537_v32 = vpop.xlane.xlu0 %1536  ;;  %8991 = vst [vmem:[#allocation94_spill] sm:$0xff] %v7620_v10 }
 0x323   :  { %2938 = vst.msk [vmem:[#allocation3 + $0xd8] sm:$0xff] %vm554_vm1, %v7603_v30  ;;  %v7617_v49 = vmax.f32 %v7596_v9, %v1537_v32  ;;  %2656 = vperm.xlu0 %5700, %v7606_v54   ;;  %v7634_v54 = vpop.eup %5707  ;;  %5713 = vpow2.f32 %v1580_v2 }
 0x324   :  { %v1539_v36 = vpop.xlane.xlu1 %1538  ;;  %8992 = vst [vmem:[#allocation95_spill] sm:$0xff] %v7634_v54  ;;  %v7644_v51 = vpop.eup %5709 }
 0x325   :  { %2134 = vst.msk [vmem:[#allocation3 + $0x60] sm:$0xff] %vm554_vm1, %v7617_v49  ;;  %v7631_v32 = vmax.f32 %v7610_v29, %v1539_v36  ;;  %1856 = vperm.xlu1 %5699, %v7620_v10   ;;  %8993 = vst [vmem:[#allocation96_spill] sm:$0xff] %v7644_v51  ;;  %v1586_v36 = vmul.f32 1.442695, %v1565_v62  ;;  %v7658_v62 = vld [vmem:[#allocation3 + $0x78] sm:$0xff] }
 0x326   :  { %v2341_v33 = vpop.xlane.xlu0 %2340 }
 0x327   :  { %2135 = vst.msk [vmem:[#allocation3 + $0x68] sm:$0xff] %vm554_vm1, %v7631_v32  ;;  %v7641_v31 = vmax.f32 %v7624_v44, %v2341_v33  ;;  %1866 = vperm.xlu0 %5700, %v7634_v54   ;;  %v2366_v33 = vsub.f32 %v7434_v53, %v7448_v22  ;;  %5715 = vpow2.f32 %v1586_v36  ;;  %v7670_v53 = vld [vmem:[#allocation3 + $0xf0] sm:$0xff] }
 0x328   :  { %v2343_v41 = vpop.xlane.xlu1 %2342 }
 0x329   :  { %2939 = vst.msk [vmem:[#allocation3 + $0xe0] sm:$0xff] %vm554_vm1, %v7641_v31  ;;  %v7653_v10 = vmax.f32 %v7636_v46, %v2343_v41  ;;  %2661 = vperm.xlu1 %5699, %v7644_v51   ;;  %v2369_v41 = vsub.f32 %v7474_v39, %v7486_v11  ;;  %v2384_v36 = vmul.f32 1.442695, %v2366_v33 }
 0x32a   :  { %v1541_v54 = vpop.xlane.xlu0 %1540 }
 0x32b   :  { %2940 = vst.msk [vmem:[#allocation3 + $0xe8] sm:$0xff] %vm554_vm1, %v7653_v10  ;;  %v7665_v38 = vmax.f32 %v7646_v20, %v1541_v54  ;;  %1665 = vperm.xlu0 %5700, %v7585_v63   ;;  %v7680_v54 = vpop.eup %5711  ;;  %v2390_v11 = vmul.f32 1.442695, %v2369_v41  ;;  %5717 = vpow2.f32 %v2384_v36  ;;  %v1567_v36 = vsub.f32 %v7489_v56, %v7502_v14 }
 0x32c   :  { %v1543_v2 = vpop.xlane.xlu1 %1542  ;;  %8994 = vst [vmem:[#allocation97_spill] sm:$0xff] %v7680_v54 }
 0x32d   :  { %2136 = vst.msk [vmem:[#allocation3 + $0x70] sm:$0xff] %vm554_vm1, %v7665_v38  ;;  %v7677_v45 = vmax.f32 %v7658_v62, %v1543_v2  ;;  %1650 = vperm.xlu1 %5699, %v7530_v27   ;;  %v7709_v2 = vpop.eup %5713  ;;  %5719 = vpow2.f32 %v2390_v11  ;;  %v7726_v11 = vld [vmem:[#allocation3 + $0x110] sm:$0xff]  ;;  %v1590_v56 = vmul.f32 1.442695, %v1567_v36 }
 0x32e   :  { %v2345_v51 = vpop.xlane.xlu0 %2344  ;;  %8995 = vst [vmem:[#allocation98_spill] sm:$0xff] %v7709_v2 }
 0x32f   :  { %2137 = vst.msk [vmem:[#allocation3 + $0x78] sm:$0xff] %vm554_vm1, %v7677_v45  ;;  %v7687_v39 = vmax.f32 %v7670_v53, %v2345_v51  ;;  %2671 = vperm.xlu0 %5700, %v7680_v54   ;;  %v1564_v51 = vsub.f32 %v7450_v5, %v7463_v7  ;;  %v7702_v54 = vld [vmem:[#allocation3 + $0x100] sm:$0xff] }
 0x330   :  { %v2347_v22 = vpop.xlane.xlu1 %2346 }
 0x331   :  { %2941 = vst.msk [vmem:[#allocation3 + $0xf0] sm:$0xff] %vm554_vm1, %v7687_v39  ;;  %v7695_v33 = vmax.f32 %v7682_v19, %v2347_v22  ;;  %2454 = vperm.xlu1 %5699, %v7551_v12   ;;  %v7720_v41 = vpop.eup %5715  ;;  %v1584_v26 = vmul.f32 1.442695, %v1564_v51 }
 0x332   :  { %8996 = vst [vmem:[#allocation99_spill] sm:$0xff] %v7720_v41 }
 0x333   :  { %2942 = vst.msk [vmem:[#allocation3 + $0xf8] sm:$0xff] %vm554_vm1, %v7695_v33  ;;  %2469 = vperm.xlu0 %5700, %v7603_v30   ;;  %v3124_v22 = vpop.xlane.xlu0 %3123  ;;  %5721 = vpow2.f32 %v1584_v26  ;;  %v2371_v26 = vsub.f32 %v7505_v37, %v7519_v25  ;;  %v1566_v37 = vsub.f32 %v7481_v48, %v7494_v6 }
 0x334   :  { %v7714_v1 = vmax.f32 %v7698_v42, %v3124_v22  ;;  %v3122_v5 = vpop.xlane.xlu1 %3121  ;;  %5723 = vpow2.f32 %v1590_v56 }
 0x335   :  { %v7717_v7 = vmax.f32 %v7702_v54, %v3122_v5  ;;  %1861 = vperm.xlu1 %5699, %v7709_v2   ;;  %v2368_v2 = vsub.f32 %v7466_v40, %v7479_v43  ;;  %v2394_v25 = vmul.f32 1.442695, %v2371_v26 }
 0x336   :  { %3733 = vst.msk [vmem:[#allocation3 + $0x108] sm:$0xff] %vm554_vm1, %v7714_v1 }
 0x337   :  { %3732 = vst.msk [vmem:[#allocation3 + $0x100] sm:$0xff] %vm554_vm1, %v7717_v7  ;;  %1876 = vperm.xlu0 %5700, %v7720_v41  }
 0x338   :  { %v3128_v14 = vpop.xlane.xlu1 %3127  ;;  %v3126_v22 = vpop.xlane.xlu0 %3125 }
 0x339   :  { %v7732_v5 = vmax.f32 %v7724_v60, %v3128_v14  ;;  %v7735_v51 = vmax.f32 %v7726_v11, %v3126_v22  ;;  %1660 = vperm.xlu1 %5699, %v7573_v50   ;;  %v7751_v14 = vpop.eup %5717  ;;  %v2388_v60 = vmul.f32 1.442695, %v2368_v2 }
 0x33a   :  { %8999 = vst [vmem:[#allocation102_spill] sm:$0xff] %v7751_v14  ;;  %v7762_v41 = vpop.eup %5719 }
 0x33b   :  { %3735 = vst.msk [vmem:[#allocation3 + $0x118] sm:$0xff] %vm554_vm1, %v7732_v5  ;;  %3734 = vst.msk [vmem:[#allocation3 + $0x110] sm:$0xff] %vm554_vm1, %v7735_v51  ;;  %1675 = vperm.xlu0 %5700, %v7631_v32   ;;  %5725 = vpow2.f32 %v2388_v60  ;;  %v1569_v60 = vsub.f32 %v7525_v55, %v7541_v58  ;;  %v2370_v55 = vsub.f32 %v7497_v59, %v7510_v18 }
 0x33c   :  { %v3132_v40 = vpop.xlane.xlu1 %3131  ;;  %v3130_v43 = vpop.xlane.xlu0 %3129  ;;  %9000 = vst [vmem:[#allocation103_spill] sm:$0xff] %v7762_v41  ;;  %5727 = vpow2.f32 %v2394_v25  ;;  %v1571_v25 = vsub.f32 %v7566_v21, %v7585_v63  ;;  %v1573_v59 = vsub.f32 %v7610_v29, %v7631_v32 }
 0x33d   :  { %v7756_v22 = vmax.f32 %v7740_v35, %v3132_v40  ;;  %v7759_v36 = vmax.f32 %v7742_v15, %v3130_v43  ;;  %2666 = vperm.xlu1 %5699, %v7751_v14   ;;  %v7784_v14 = vld [vmem:[#allocation3 + $0x148] sm:$0xff]  ;;  %v7786_v35 = vld [vmem:[#allocation3 + $0x140] sm:$0xff]  ;;  %v1594_v58 = vmul.f32 1.442695, %v1569_v60 }
 0x33e   :  { %9002 = vst [vmem:[#allocation105_spill] sm:$0xff] %v7786_v35  ;;  %v7832_v60 = vld [vmem:[#allocation3 + $0x160] sm:$0xff]  ;;  %v1602_v32 = vmul.f32 1.442695, %v1573_v59 }
 0x33f   :  { %3737 = vst.msk [vmem:[#allocation3 + $0x128] sm:$0xff] %vm554_vm1, %v7756_v22  ;;  %3736 = vst.msk [vmem:[#allocation3 + $0x120] sm:$0xff] %vm554_vm1, %v7759_v36  ;;  %2681 = vperm.xlu0 %5700, %v7762_v41  }
 0x340   :  { %v3136_v56 = vpop.xlane.xlu1 %3135  ;;  %v3134_v40 = vpop.xlane.xlu0 %3133 }
 0x341   :  { %v7776_v2 = vmax.f32 %v7764_v52, %v3136_v56  ;;  %v7779_v43 = vmax.f32 %v7766_v61, %v3134_v40  ;;  %2464 = vperm.xlu1 %5699, %v7593_v17   ;;  %v7795_v56 = vpop.eup %5721  ;;  %v1588_v52 = vmul.f32 1.442695, %v1566_v37 }
 0x342   :  { %9003 = vst [vmem:[#allocation106_spill] sm:$0xff] %v7795_v56  ;;  %v7806_v41 = vpop.eup %5723 }
 0x343   :  { %3739 = vst.msk [vmem:[#allocation3 + $0x138] sm:$0xff] %vm554_vm1, %v7776_v2  ;;  %3738 = vst.msk [vmem:[#allocation3 + $0x130] sm:$0xff] %vm554_vm1, %v7779_v43  ;;  %2479 = vperm.xlu0 %5700, %v7653_v10   ;;  %5729 = vpow2.f32 %v1588_v52  ;;  %v1598_v52 = vmul.f32 1.442695, %v1571_v25 }
 0x344   :  { %v3140_v48 = vpop.xlane.xlu1 %3139  ;;  %v3138_v6 = vpop.xlane.xlu0 %3137  ;;  %9004 = vst [vmem:[#allocation107_spill] sm:$0xff] %v7806_v41  ;;  %5731 = vpow2.f32 %v1594_v58  ;;  %v7856_v58 = vld [vmem:[#allocation3 + $0x170] sm:$0xff] }
 0x345   :  { %v7800_v40 = vmax.f32 %v7784_v14, %v3140_v48  ;;  %v7803_v26 = vmax.f32 %v7786_v35, %v3138_v6  ;;  %1871 = vperm.xlu1 %5699, %v7795_v56   ;;  %v7830_v35 = vld [vmem:[#allocation3 + $0x168] sm:$0xff]  ;;  %v7841_v21 = vpop.eup %5725  ;;  %5733 = vpow2.f32 %v1598_v52 }
 0x346   :  { %9007 = vst [vmem:[#allocation110_spill] sm:$0xff] %v7841_v21 }
 0x347   :  { %3741 = vst.msk [vmem:[#allocation3 + $0x148] sm:$0xff] %vm554_vm1, %v7800_v40  ;;  %3740 = vst.msk [vmem:[#allocation3 + $0x140] sm:$0xff] %vm554_vm1, %v7803_v26  ;;  %1886 = vperm.xlu0 %5700, %v7806_v41   ;;  %v7852_v41 = vpop.eup %5727 }
 0x348   :  { %v3144_v37 = vpop.xlane.xlu1 %3143  ;;  %v3142_v48 = vpop.xlane.xlu0 %3141 }
 0x349   :  { %v7822_v6 = vmax.f32 %v7808_v23, %v3144_v37  ;;  %v7825_v56 = vmax.f32 %v7810_v34, %v3142_v48  ;;  %1670 = vperm.xlu1 %5699, %v7617_v49   ;;  %v2392_v34 = vmul.f32 1.442695, %v2370_v55  ;;  %v1575_v55 = vsub.f32 %v7658_v62, %v7677_v45 }
 0x34b   :  { %9006 = vst [vmem:[#allocation109_spill] sm:$0xff] %v7825_v56  ;;  %3743 = vst.msk [vmem:[#allocation3 + $0x158] sm:$0xff] %vm554_vm1, %v7822_v6  ;;  %1685 = vperm.xlu0 %5700, %v7677_v45   ;;  %5735 = vpow2.f32 %v2392_v34  ;;  %v1606_v62 = vmul.f32 1.442695, %v1575_v55  ;;  %v9008_v34 = vsub.f32 %v7514_v3, %v7530_v27  ;;  %v9010_v27 = vsub.f32 %v7534_v13, %v7551_v12 }
 0x34c   :  { %3742 = vst.msk [vmem:[#allocation3 + $0x150] sm:$0xff] %vm554_vm1, %v7825_v56  ;;  %v3148_v18 = vpop.xlane.xlu1 %3147  ;;  %v3146_v37 = vpop.xlane.xlu0 %3145  ;;  %v7854_v56 = vld [vmem:[#allocation3 + $0x178] sm:$0xff]  ;;  %5737 = vpow2.f32 %v1602_v32  ;;  %v9009_v32 = vsub.f32 %v7546_v0, %v7561_v16  ;;  %v9011_v0 = vsub.f32 %v7554_v28, %v7573_v50  ;;  %v3170_v13 = vsub.f32 %v7698_v42, %v7714_v1 }
 0x34d   :  { %v7846_v48 = vmax.f32 %v7830_v35, %v3148_v18  ;;  %v7849_v63 = vmax.f32 %v7832_v60, %v3146_v37  ;;  %2676 = vperm.xlu1 %5699, %v7841_v21   ;;  %v7881_v45 = vpop.eup %5729  ;;  %v1592_v59 = vmul.f32 1.442695, %v9008_v34  ;;  %5739 = vpow2.f32 %v1606_v62 }
 0x34e   :  { %v7884_v52 = vpop.eup %5731  ;;  %v2398_v55 = vmul.f32 1.442695, %v9009_v32  ;;  %v2396_v62 = vmul.f32 1.442695, %v9010_v27  ;;  %v1596_v16 = vmul.f32 1.442695, %v9011_v0  ;;  %v9012_v12 = vsub.f32 %v7588_v47, %v7603_v30 }
 0x34f   :  { %3745 = vst.msk [vmem:[#allocation3 + $0x168] sm:$0xff] %vm554_vm1, %v7846_v48  ;;  %3744 = vst.msk [vmem:[#allocation3 + $0x160] sm:$0xff] %vm554_vm1, %v7849_v63  ;;  %2691 = vperm.xlu0 %5700, %v7852_v41   ;;  %5741 = vpow2.f32 %v1592_v59  ;;  %v3187_v28 = vmul.f32 1.442695, %v3170_v13  ;;  %v9013_v50 = vsub.f32 %v7578_v4, %v7593_v17  ;;  %v3169_v47 = vsub.f32 %v7702_v54, %v7717_v7 }
 0x350   :  { %v3152_v25 = vpop.xlane.xlu1 %3151  ;;  %v3150_v18 = vpop.xlane.xlu0 %3149  ;;  %5743 = vpow2.f32 %v2398_v55  ;;  %v2402_v32 = vmul.f32 1.442695, %v9012_v12  ;;  %v9016_v13 = vsub.f32 %v7624_v44, %v7641_v31 }
 0x351   :  { %v7868_v37 = vmax.f32 %v7854_v56, %v3152_v25  ;;  %v7871_v29 = vmax.f32 %v7856_v58, %v3150_v18  ;;  %2474 = vperm.xlu1 %5699, %v7641_v31   ;;  %v7891_v25 = vpop.eup %5733  ;;  %5745 = vpow2.f32 %v2396_v62  ;;  %v2400_v27 = vmul.f32 1.442695, %v9013_v50 }
 0x352   :  { %5747 = vpow2.f32 %v1596_v16  ;;  %v3185_v17 = vmul.f32 1.442695, %v3169_v47  ;;  %v9015_v62 = vsub.f32 %v7636_v46, %v7653_v10  ;;  %v2404_v12 = vmul.f32 1.442695, %v9016_v13 }
 0x353   :  { %v3184_v21 = vsub.f32 %v7854_v56, %v7868_v37  ;;  %3747 = vst.msk [vmem:[#allocation3 + $0x178] sm:$0xff] %vm554_vm1, %v7868_v37  ;;  %3746 = vst.msk [vmem:[#allocation3 + $0x170] sm:$0xff] %vm554_vm1, %v7871_v29  ;;  %2489 = vperm.xlu0 %5700, %v7695_v33   ;;  %5749 = vpow2.f32 %v2402_v32  ;;  %v9017_v10 = vsub.f32 %v7646_v20, %v7665_v38 }
 0x354   :  { %5751 = vpow2.f32 %v3187_v28  ;;  %v2406_v0 = vmul.f32 1.442695, %v9015_v62  ;;  %v3173_v20 = vsub.f32 %v7742_v15, %v7759_v36  ;;  %v9018_v47 = vsub.f32 %v7682_v19, %v7695_v33 }
 0x355   :  { %1881 = vperm.xlu1 %5699, %v7881_v45   ;;  %v7897_v18 = vpop.eup %5735  ;;  %5753 = vpow2.f32 %v2400_v27  ;;  %v1604_v32 = vmul.f32 1.442695, %v9017_v10  ;;  %v9019_v15 = vsub.f32 %v7670_v53, %v7687_v39  ;;  %v3175_v33 = vsub.f32 %v7766_v61, %v7779_v43 }
 0x356   :  { %v7900_v3 = vpop.eup %5737 }
 0x357   :  { %1896 = vperm.xlu0 %5700, %v7884_v52   ;;  %v7907_v34 = vpop.eup %5739  ;;  %v3197_v61 = vmul.f32 1.442695, %v3175_v33  ;;  %v9025_v33 = vld [vmem:[#allocation55_spill] sm:$0xff] }
 0x359   :  { %1680 = vperm.xlu1 %5699, %v7665_v38   ;;  %v7913_v59 = vpop.eup %5741 }
 0x35a   :  { %v7922_v55 = vpop.eup %5743 }
 0x35b   :  { %1906 = vperm.xlu0 %5700, %v7891_v25   ;;  %v7929_v42 = vpop.eup %5745 }
 0x35c   :  { %v7938_v4 = vpop.eup %5747 }
 0x35d   :  { %2686 = vperm.xlu1 %5699, %v7897_v18   ;;  %v7945_v54 = vpop.eup %5749 }
 0x35e   :  { %v7950_v16 = vpop.eup %5751 }
 0x35f   :  { %1916 = vperm.xlu0 %5700, %v7900_v3   ;;  %v7960_v28 = vpop.eup %5753 }
 0x361   :  { %2484 = vperm.xlu1 %5699, %v7687_v39  }
 0x363   :  { %1926 = vperm.xlu0 %5700, %v7907_v34  }
 0x365   :  { %1891 = vperm.xlu1 %5699, %v7913_v59  }
 0x367   :  { %3224 = vperm.xlu0 %5700, %v7714_v1   ;;  %v9014_v1 = vsub.f32 %v7596_v9, %v7617_v49  ;;  %v3171_v9 = vsub.f32 %v7726_v11, %v7735_v51 }
 0x369   :  { %2701 = vperm.xlu1 %5699, %v7922_v55   ;;  %v1600_v30 = vmul.f32 1.442695, %v9014_v1  ;;  %v3189_v11 = vmul.f32 1.442695, %v3171_v9  ;;  %v2410_v1 = vmul.f32 1.442695, %v9018_v47  ;;  %v9023_v47 = vsub.f32 %v7784_v14, %v7800_v40 }
 0x36a   :  { %v9026_v14 = vsub.f32 %v7808_v23, %v7822_v6  ;;  %v9029_v23 = vsub.f32 %v7830_v35, %v7846_v48  ;;  %v3215_v35 = vmul.f32 1.442695, %v3184_v21  ;;  %v9037_v21 = vld [vmem:[#allocation35_spill] sm:$0xff] }
 0x36b   :  { %3234 = vperm.xlu0 %5700, %v7732_v5   ;;  %5755 = vpow2.f32 %v1600_v30 }
 0x36c   :  { %5757 = vpow2.f32 %v3185_v17  ;;  %v3193_v17 = vmul.f32 1.442695, %v3173_v20 }
 0x36d   :  { %2696 = vperm.xlu1 %5699, %v7929_v42   ;;  %5759 = vpow2.f32 %v2406_v0  ;;  %v2408_v0 = vmul.f32 1.442695, %v9019_v15 }
 0x36e   :  { %5761 = vpow2.f32 %v2404_v12  ;;  %v9020_v12 = vld [vmem:[#allocation21_spill] sm:$0xff] }
 0x36f   :  { %3244 = vperm.xlu0 %5700, %v7756_v22   ;;  %5763 = vpow2.f32 %v1604_v32 }
 0x370   :  { %5765 = vpow2.f32 %v3189_v11 }
 0x371   :  { %1901 = vperm.xlu1 %5699, %v7938_v4  }
 0x373   :  { %3254 = vperm.xlu0 %5700, %v7776_v2  }
 0x374   :  { %v1616_v49 = vpop.permute.xlu1 %1615 }
 0x375   :  { %2711 = vperm.xlu1 %5699, %v7945_v54   ;;  %v1689_v46 = vsub.f32 %v7200_v24, %v1616_v49  ;;  %v7965_v24 = vpop.eup %5755 }
 0x377   :  { %3466 = vperm.xlu0 %5700, %v7950_v16   ;;  %v1706_v44 = vmul.f32 1.442695, %v1689_v46 }
 0x378   :  { %v1611_v50 = vpop.permute.xlu0 %1610 }
 0x379   :  { %v1688_v27 = vsub.f32 %v7209_v57, %v1611_v50  ;;  %2706 = vperm.xlu1 %5699, %v7960_v28   ;;  %v7972_v57 = vpop.eup %5757 }
 0x37a   :  { %v7978_v30 = vpop.eup %5759 }
 0x37b   :  { %v1704_v31 = vmul.f32 1.442695, %v1688_v27  ;;  %3264 = vperm.xlu0 %5700, %v7800_v40   ;;  %v7986_v19 = vpop.eup %5761  ;;  %v3207_v40 = vmul.f32 1.442695, %v9026_v14  ;;  %v9032_v14 = vld [vmem:[#allocation100_spill] sm:$0xff] }
 0x37c   :  { %v7969_v38 = vpop.permute.xlu1 %2419  ;;  %v7990_v13 = vpop.eup %5763 }
 0x37d   :  { %5767 = vpow2.f32 %v1704_v31  ;;  %1911 = vperm.xlu1 %5699, %v7965_v24   ;;  %v7994_v53 = vpop.eup %5765  ;;  %v7996_v39 = vpop.permute.xlu0 %2414  ;;  %v9022_v31 = vld [vmem:[#allocation53_spill] sm:$0xff] }
 0x37e   :  { %5769 = vpow2.f32 %v1706_v44  ;;  %v9021_v44 = vld [vmem:[#allocation51_spill] sm:$0xff] }
 0x37f   :  { %3461 = vperm.xlu0 %5700, %v7972_v57   ;;  %5771 = vpow2.f32 %v2410_v1  ;;  %v3203_v1 = vmul.f32 1.442695, %v9023_v47  ;;  %v9028_v47 = vld [vmem:[#allocation57_spill] sm:$0xff] }
 0x380   :  { %v1626_v62 = vpop.permute.xlu1 %1625  ;;  %5773 = vpow2.f32 %v3193_v17 }
 0x381   :  { %2721 = vperm.xlu1 %5699, %v7978_v30   ;;  %v1691_v9 = vsub.f32 %v7213_v8, %v1626_v62  ;;  %5775 = vpow2.f32 %v2408_v0  ;;  %v9024_v0 = vld [vmem:[#allocation29_spill] sm:$0xff] }
 0x382   :  { %v8008_v27 = vpop.permute.xlu0 %2429 }
 0x383   :  { %3274 = vperm.xlu0 %5700, %v7822_v6   ;;  %v1710_v8 = vmul.f32 1.442695, %v1691_v9  ;;  %v3211_v6 = vmul.f32 1.442695, %v9029_v23 }
 0x384   :  { %v1621_v49 = vpop.permute.xlu1 %1620 }
 0x385   :  { %v1690_v46 = vsub.f32 %v9020_v12, %v1621_v49  ;;  %2716 = vperm.xlu1 %5699, %v7986_v19  }
 0x387   :  { %v7998_v10 = vpop.eup %5767  ;;  %v1708_v32 = vmul.f32 1.442695, %v1690_v46  ;;  %3471 = vperm.xlu0 %5700, %v7994_v53   ;;  %v9027_v46 = vld [vmem:[#allocation27_spill] sm:$0xff] }
 0x388   :  { %v8001_v11 = vpop.eup %5769  ;;  %v8003_v50 = vpop.permute.xlu1 %2424  ;;  %5121 = vmatprep.mubr.f32.mxu1 %v7998_v10 }
 0x389   :  { %5777 = vpow2.f32 %v1708_v32  ;;  %1921 = vperm.xlu1 %5699, %v7990_v13   ;;  %5122 = vmatmul.mubr.f32.vlgmr.msra.gmra.mrb[80].mxu1 %v8001_v11  ;;  %v8013_v20 = vpop.eup %5771 }
 0x38a   :  { %5779 = vpow2.f32 %v1710_v8  ;;  %5564 = vmatpush3.bf16.msra.mxu1 %v9021_v44  ;;  %v8019_v62 = vpop.eup %5773  ;;  %v8021_v15 = vpop.permute.xlu0 %2439 }
 0x38b   :  { %5566 = vmatprep.subr.bf16.mxu1 %v9022_v31  ;;  %3284 = vperm.xlu0 %5700, %v7846_v48   ;;  %5781 = vpow2.f32 %v3197_v61  ;;  %v8027_v49 = vpop.eup %5775 }
 0x38c   :  { %v1636_v17 = vpop.permute.xlu1 %1635  ;;  %5783 = vpow2.f32 %v3203_v1 }
 0x38d   :  { %2731 = vperm.xlu1 %5699, %v8013_v20   ;;  %v1693_v9 = vsub.f32 %v9024_v0, %v1636_v17  ;;  %5785 = vpow2.f32 %v3207_v40  ;;  %v9033_v40 = vsub.f32 %v9032_v14, %v7732_v5  ;;  %v9041_v14 = vld [vmem:[#allocation101_spill] sm:$0xff] }
 0x38e   :  { %5568 = vmatpush3.bf16.msra.mxu1 %v9022_v31 }
 0x38f   :  { %5570 = vmatprep.subr.bf16.mxu1 %v9025_v33  ;;  %3481 = vperm.xlu0 %5700, %v8019_v62   ;;  %v1714_v32 = vmul.f32 1.442695, %v1693_v9 }
 0x390   :  { %v1631_v12 = vpop.permute.xlu1 %1630  ;;  %v8034_v61 = vpop.permute.xlu0 %2444 }
 0x391   :  { %v1692_v8 = vsub.f32 %v9027_v46, %v1631_v12  ;;  %2726 = vperm.xlu1 %5699, %v8027_v49   ;;  %v3191_v12 = vmul.f32 1.442695, %v9033_v40  ;;  %v9034_v46 = vld [vmem:[#allocation37_spill] sm:$0xff]  ;;  %v9042_v40 = vsub.f32 %v9041_v14, %v7756_v22  ;;  %v9053_v14 = vld [vmem:[#allocation48_spill] sm:$0xff] }
 0x392   :  { %5572 = vmatpush3.bf16.msra.mxu1 %v9025_v33  ;;  %v9030_v33 = vld [vmem:[#allocation47_spill] sm:$0xff] }
 0x393   :  { %v8037_v44 = vpop.eup %5777  ;;  %v1712_v31 = vmul.f32 1.442695, %v1692_v8  ;;  %5574 = vmatprep.subr.bf16.mxu1 %v9028_v47  ;;  %3294 = vperm.xlu0 %5700, %v7868_v37  }
 0x394   :  { %v8041_v1 = vpop.eup %5779  ;;  %v8046_v17 = vpop.permute.xlu1 %2434  ;;  %5124 = vmatprep.mubr.f32.mxu1 %v8037_v44 }
 0x395   :  { %5787 = vpow2.f32 %v1712_v31  ;;  %3219 = vperm.xlu1 %5699, %v7717_v7   ;;  %5125 = vmatmul.mubr.f32.gmra.mrb[82].mxu1 %v8041_v1  ;;  %v8051_v0 = vpop.eup %5781  ;;  %v9036_v31 = vld [vmem:[#allocation41_spill] sm:$0xff] }
 0x396   :  { %5789 = vpow2.f32 %v1714_v32  ;;  %5576 = vmatpush3.bf16.msra.mxu1 %v9028_v47  ;;  %v8054_v9 = vpop.permute.xlu0 %1655  ;;  %v8062_v7 = vpop.eup %5783 }
 0x397   :  { %5578 = vmatprep.subr.bf16.mxu1 %v9030_v33  ;;  %3491 = vperm.xlu0 %5700, %v8051_v0   ;;  %5791 = vpow2.f32 %v3211_v6  ;;  %9031 = vst [vmem:[#allocation21_spill] sm:$0xff] %v8062_v7  ;;  %v8075_v37 = vpop.eup %5785 }
 0x398   :  { %v1646_v48 = vpop.permute.xlu1 %1645  ;;  %5793 = vpow2.f32 %v3215_v35  ;;  %9038 = vst [vmem:[#allocation53_spill] sm:$0xff] %v8075_v37 }
 0x399   :  { %3229 = vperm.xlu1 %5699, %v7735_v51   ;;  %v1695_v8 = vsub.f32 %v9034_v46, %v1646_v48  ;;  %5795 = vpow2.f32 %v3191_v12  ;;  %v3195_v12 = vmul.f32 1.442695, %v9042_v40  ;;  %v1697_v40 = vsub.f32 %v9053_v14, %v8054_v9 }
 0x39a   :  { %5580 = vmatpush3.bf16.msra.mxu1 %v9030_v33  ;;  %v8069_v32 = vpop.permute.xlu0 %1851  ;;  %v9039_v33 = vld [vmem:[#allocation50_spill] sm:$0xff] }
 0x39b   :  { %9035 = vst [vmem:[#allocation51_spill] sm:$0xff] %v8069_v32  ;;  %5582 = vmatprep.subr.bf16.mxu1 %v9036_v31  ;;  %3506 = vperm.xlu0 %5700, %v8062_v7   ;;  %v1718_v5 = vmul.f32 1.442695, %v1695_v8  ;;  %v9044_v8 = vld [vmem:[#allocation60_spill] sm:$0xff]  ;;  %v9054_v32 = vld [vmem:[#allocation45_spill] sm:$0xff] }
 0x39c   :  { %v1641_v56 = vpop.permute.xlu1 %1640 }
 0x39d   :  { %v1694_v51 = vsub.f32 %v9037_v21, %v1641_v56  ;;  %3239 = vperm.xlu1 %5699, %v7759_v36   ;;  %v9048_v56 = vld [vmem:[#allocation52_spill] sm:$0xff] }
 0x39e   :  { %5584 = vmatpush3.bf16.msra.mxu1 %v9036_v31  ;;  %v8078_v47 = vpop.permute.xlu0 %2459 }
 0x39f   :  { %v8080_v23 = vpop.eup %5787  ;;  %v1716_v6 = vmul.f32 1.442695, %v1694_v51  ;;  %5586 = vmatprep.subr.bf16.mxu1 %v9039_v33  ;;  %3516 = vperm.xlu0 %5700, %v8075_v37  }
 0x3a0   :  { %v8084_v35 = vpop.eup %5789  ;;  %v8086_v48 = vpop.permute.xlu1 %2449  ;;  %5127 = vmatprep.mubr.f32.mxu1 %v8080_v23 }
 0x3a1   :  { %5797 = vpow2.f32 %v1716_v6  ;;  %3249 = vperm.xlu1 %5699, %v7779_v43   ;;  %5128 = vmatmul.mubr.f32.gmra.mrb[84].mxu1 %v8084_v35  ;;  %v8091_v36 = vpop.eup %5791 }
 0x3a2   :  { %9040 = vst [vmem:[#allocation29_spill] sm:$0xff] %v8091_v36  ;;  %5799 = vpow2.f32 %v1718_v5  ;;  %5588 = vmatpush3.bf16.msra.mxu1 %v9039_v33  ;;  %v8097_v46 = vpop.permute.xlu0 %2656  ;;  %v8104_v43 = vpop.eup %5793  ;;  %v9051_v5 = vld [vmem:[#allocation104_spill] sm:$0xff] }
 0x3a3   :  { %9043 = vst [vmem:[#allocation55_spill] sm:$0xff] %v8097_v46  ;;  %5590 = vmatprep.subr.bf16.mxu1 %v9044_v8  ;;  %3526 = vperm.xlu0 %5700, %v8091_v36   ;;  %9046 = vst [vmem:[#allocation57_spill] sm:$0xff] %v8104_v43  ;;  %5801 = vpow2.f32 %v3195_v12  ;;  %v8111_v21 = vpop.eup %5795  ;;  %v9052_v6 = vsub.f32 %v9051_v5, %v7776_v2  ;;  %v9056_v2 = vld [vmem:[#allocation105_spill] sm:$0xff] }
 0x3a4   :  { %v8101_v31 = vpop.permute.xlu1 %1856  ;;  %9049 = vst [vmem:[#allocation100_spill] sm:$0xff] %v8111_v21  ;;  %v3177_v5 = vsub.f32 %v9056_v2, %v7803_v26  ;;  %v9061_v2 = vld [vmem:[#allocation65_spill] sm:$0xff] }
 0x3a5   :  { %9045 = vst [vmem:[#allocation27_spill] sm:$0xff] %v8101_v31  ;;  %3259 = vperm.xlu1 %5699, %v7803_v26   ;;  %v3199_v33 = vmul.f32 1.442695, %v9052_v6  ;;  %v1722_v6 = vmul.f32 1.442695, %v1697_v40  ;;  %v3181_v26 = vsub.f32 %v7832_v60, %v7849_v63  ;;  %v3183_v60 = vsub.f32 %v7856_v58, %v7871_v29 }
 0x3a6   :  { %5592 = vmatpush3.bf16.msra.mxu1 %v9044_v8  ;;  %v8107_v22 = vpop.permute.xlu0 %1866 }
 0x3a7   :  { %9047 = vst [vmem:[#allocation47_spill] sm:$0xff] %v8107_v22  ;;  %5626 = vmatprep.subr.bf16.mxu1 %v9048_v56  ;;  %3536 = vperm.xlu0 %5700, %v8104_v43   ;;  %5803 = vpow2.f32 %v3199_v33 }
 0x3a8   :  { %v8113_v51 = vpop.permute.xlu1 %2661 }
 0x3a9   :  { %9050 = vst [vmem:[#allocation37_spill] sm:$0xff] %v8113_v51  ;;  %3476 = vperm.xlu1 %5699, %v8111_v21   ;;  %v9055_v51 = vld [vmem:[#allocation109_spill] sm:$0xff] }
 0x3aa   :  { %v1666_v12 = vpop.permute.xlu0 %1665 }
 0x3ab   :  { %v8121_v8 = vpop.eup %5797 }
 0x3ac   :  { %v8123_v22 = vpop.eup %5799  ;;  %v1651_v46 = vpop.permute.xlu1 %1650  ;;  %5130 = vmatprep.mubr.f32.mxu1 %v8121_v8 }
 0x3ad   :  { %v1696_v31 = vsub.f32 %v9054_v32, %v1651_v46  ;;  %3269 = vperm.xlu1 %5699, %v9055_v51   ;;  %5131 = vmatmul.mubr.f32.gmra.mrb[86].mxu1 %v8123_v22  ;;  %v8133_v43 = vpop.eup %5801  ;;  %v3201_v32 = vmul.f32 1.442695, %v3177_v5  ;;  %v9059_v46 = vld [vmem:[#allocation108_spill] sm:$0xff]  ;;  %v9063_v5 = vld [vmem:[#allocation19_spill] sm:$0xff] }
 0x3ae   :  { %v8131_v9 = vpop.permute.xlu0 %2671  ;;  %9058 = vst [vmem:[#allocation35_spill] sm:$0xff] %v8133_v43  ;;  %v3179_v37 = vsub.f32 %v9059_v46, %v9055_v51  ;;  %v2493_v7 = vsub.f32 %v9063_v5, %v7969_v38 }
 0x3af   :  { %9057 = vst [vmem:[#allocation41_spill] sm:$0xff] %v8131_v9  ;;  %v1720_v14 = vmul.f32 1.442695, %v1696_v31 }
 0x3b0   :  { %v8135_v36 = vpop.permute.xlu1 %2454  ;;  %v3205_v31 = vmul.f32 1.442695, %v3179_v37 }
 0x3b1   :  { %5805 = vpow2.f32 %v1720_v14  ;;  %3486 = vperm.xlu1 %5699, %v8133_v43   ;;  %v1699_v14 = vsub.f32 %v9061_v2, %v1666_v12  ;;  %v8152_v51 = vpop.eup %5803  ;;  %v9065_v43 = vld [vmem:[#allocation64_spill] sm:$0xff] }
 0x3b2   :  { %5807 = vpow2.f32 %v1722_v6  ;;  %v8140_v33 = vpop.permute.xlu0 %2469  ;;  %9064 = vst [vmem:[#allocation60_spill] sm:$0xff] %v8152_v51  ;;  %v3209_v6 = vmul.f32 1.442695, %v3181_v26 }
 0x3b3   :  { %5809 = vpow2.f32 %v3201_v32  ;;  %v2510_v32 = vmul.f32 1.442695, %v2493_v7  ;;  %v9068_v7 = vld [vmem:[#allocation23_spill] sm:$0xff] }
 0x3b4   :  { %v8144_v40 = vpop.permute.xlu1 %1861  ;;  %5811 = vpow2.f32 %v3205_v31 }
 0x3b5   :  { %9060 = vst [vmem:[#allocation50_spill] sm:$0xff] %v8144_v40  ;;  %3279 = vperm.xlu1 %5699, %v7849_v63   ;;  %v1726_v63 = vmul.f32 1.442695, %v1699_v14  ;;  %5813 = vpow2.f32 %v3209_v6 }
 0x3b6   :  { %v8148_v9 = vpop.permute.xlu0 %1876 }
 0x3b7   :  { %9062 = vst [vmem:[#allocation101_spill] sm:$0xff] %v8148_v9 }
 0x3b8   :  { %v1661_v46 = vpop.permute.xlu1 %1660 }
 0x3b9   :  { %v1698_v21 = vsub.f32 %v9065_v43, %v1661_v46  ;;  %3496 = vperm.xlu1 %5699, %v8152_v51   ;;  %v3213_v43 = vmul.f32 1.442695, %v3183_v60  ;;  %v9071_v60 = vld [vmem:[#allocation69_spill] sm:$0xff] }
 0x3ba   :  { %v1676_v37 = vpop.permute.xlu0 %1675 }
 0x3bb   :  { %v8158_v12 = vpop.eup %5805  ;;  %v1724_v2 = vmul.f32 1.442695, %v1698_v21  ;;  %v2494_v21 = vsub.f32 %v9068_v7, %v8003_v50  ;;  %v1701_v50 = vsub.f32 %v9071_v60, %v1676_v37 }
 0x3bc   :  { %v8160_v9 = vpop.eup %5807  ;;  %v8162_v38 = vpop.permute.xlu1 %2666  ;;  %5133 = vmatprep.mubr.f32.mxu1 %v8158_v12 }
 0x3bd   :  { %9066 = vst [vmem:[#allocation52_spill] sm:$0xff] %v8162_v38  ;;  %5815 = vpow2.f32 %v1724_v2  ;;  %3289 = vperm.xlu1 %5699, %v7871_v29   ;;  %5134 = vmatmul.mubr.f32.gmra.mrb[88].mxu1 %v8160_v9  ;;  %v8171_v26 = vpop.eup %5809  ;;  %v2512_v29 = vmul.f32 1.442695, %v2494_v21  ;;  %v9073_v2 = vld [vmem:[#allocation31_spill] sm:$0xff] }
 0x3be   :  { %5817 = vpow2.f32 %v1726_v63  ;;  %v8167_v58 = vpop.permute.xlu0 %2681  ;;  %v8178_v5 = vpop.eup %5811 }
 0x3bf   :  { %9067 = vst [vmem:[#allocation104_spill] sm:$0xff] %v8167_v58  ;;  %5819 = vpow2.f32 %v2510_v32  ;;  %v8183_v46 = vpop.eup %5813 }
 0x3c0   :  { %v8173_v31 = vpop.permute.xlu1 %2464  ;;  %5821 = vpow2.f32 %v3213_v43  ;;  %9070 = vst [vmem:[#allocation45_spill] sm:$0xff] %v8183_v46  ;;  %v2496_v43 = vsub.f32 %v9073_v2, %v8046_v17 }
 0x3c1   :  { %3501 = vperm.xlu1 %5699, %v8171_v26   ;;  %5823 = vpow2.f32 %v2512_v29 }
 0x3c2   :  { %v8176_v14 = vpop.permute.xlu0 %2479  ;;  %v2516_v29 = vmul.f32 1.442695, %v2496_v43 }
 0x3c4   :  { %v8180_v6 = vpop.permute.xlu1 %1871 }
 0x3c5   :  { %9069 = vst [vmem:[#allocation48_spill] sm:$0xff] %v8180_v6  ;;  %3511 = vperm.xlu1 %5699, %v8178_v5   ;;  %v9074_v6 = vld [vmem:[#allocation68_spill] sm:$0xff] }
 0x3c6   :  { %1770 = vadd.xlane.f32.xlu0 %v8001_v11  ;;  %v8187_v63 = vpop.permute.xlu0 %1886  ;;  %v1730_v11 = vmul.f32 1.442695, %v1701_v50 }
 0x3c7   :  { %9072 = vst [vmem:[#allocation109_spill] sm:$0xff] %v8187_v63  ;;  %v8189_v32 = vpop.eup %5815 }
 0x3c8   :  { %v8193_v7 = vpop.eup %5817  ;;  %v1671_v21 = vpop.permute.xlu1 %1670  ;;  %5136 = vmatprep.mubr.f32.mxu1 %v8189_v32 }
 0x3c9   :  { %v8196_v58 = vpop.eup %5819  ;;  %v1700_v38 = vsub.f32 %v9074_v6, %v1671_v21  ;;  %3521 = vperm.xlu1 %5699, %v8183_v46   ;;  %5137 = vmatmul.mubr.f32.gmra.mrb[90].mxu1 %v8193_v7  ;;  %v9078_v21 = vld [vmem:[#allocation39_spill] sm:$0xff] }
 0x3ca   :  { %2575 = vadd.xlane.f32.xlu0 %v8196_v58  ;;  %v1686_v37 = vpop.permute.xlu0 %1685  ;;  %v8202_v17 = vpop.eup %5821  ;;  %v2498_v50 = vsub.f32 %v9078_v21, %v8034_v61  ;;  %v9082_v61 = vld [vmem:[#allocation62_spill] sm:$0xff] }
 0x3cb   :  { %v1728_v60 = vmul.f32 1.442695, %v1700_v38  ;;  %9075 = vst [vmem:[#allocation105_spill] sm:$0xff] %v8202_v17  ;;  %v8212_v40 = vpop.eup %5823 }
 0x3cc   :  { %v8204_v2 = vpop.permute.xlu1 %2676  ;;  %v2520_v43 = vmul.f32 1.442695, %v2498_v50 }
 0x3cd   :  { %9076 = vst [vmem:[#allocation108_spill] sm:$0xff] %v8204_v2  ;;  %5825 = vpow2.f32 %v1728_v60  ;;  %3531 = vperm.xlu1 %5699, %v8202_v17   ;;  %v9079_v60 = vld [vmem:[#allocation17_spill] sm:$0xff] }
 0x3ce   :  { %5827 = vpow2.f32 %v1730_v11  ;;  %1772 = vadd.xlane.f32.xlu0 %v8037_v44  ;;  %v8208_v6 = vpop.permute.xlu0 %2691  ;;  %v2492_v2 = vsub.f32 %v9079_v60, %v7996_v39  ;;  %v9081_v44 = vld [vmem:[#allocation73_spill] sm:$0xff]  ;;  %v9084_v60 = vld [vmem:[#allocation72_spill] sm:$0xff] }
 0x3cf   :  { %9077 = vst [vmem:[#allocation65_spill] sm:$0xff] %v8208_v6  ;;  %5829 = vpow2.f32 %v2516_v29  ;;  %v1703_v17 = vsub.f32 %v9081_v44, %v1686_v37  ;;  %v2500_v29 = vsub.f32 %v9082_v61, %v8135_v36 }
 0x3d0   :  { %v2475_v63 = vpop.permute.xlu1 %2474  ;;  %5831 = vpow2.f32 %v2520_v43  ;;  %v2508_v50 = vmul.f32 1.442695, %v2492_v2  ;;  %v9087_v2 = vld [vmem:[#allocation25_spill] sm:$0xff] }
 0x3d1   :  { %v2524_v43 = vmul.f32 1.442695, %v2500_v29 }
 0x3d2   :  { %2577 = vadd.xlane.f32.xlu0 %v8212_v40  ;;  %v8215_v38 = vpop.permute.xlu0 %2489  ;;  %5833 = vpow2.f32 %v2508_v50  ;;  %v9089_v50 = vld [vmem:[#allocation33_spill] sm:$0xff] }
 0x3d4   :  { %v8219_v11 = vpop.permute.xlu1 %1881 }
 0x3d5   :  { %9080 = vst [vmem:[#allocation19_spill] sm:$0xff] %v8219_v11 }
 0x3d6   :  { %1776 = vadd.xlane.f32.xlu0 %v8080_v23  ;;  %v8227_v21 = vpop.permute.xlu0 %1896  ;;  %v1734_v23 = vmul.f32 1.442695, %v1703_v17 }
 0x3d7   :  { %v8223_v6 = vpop.eup %5825  ;;  %9083 = vst [vmem:[#allocation64_spill] sm:$0xff] %v8227_v21  ;;  %v2495_v21 = vsub.f32 %v9087_v2, %v8008_v27 }
 0x3d8   :  { %v8229_v46 = vpop.eup %5827  ;;  %v1681_v51 = vpop.permute.xlu1 %1680  ;;  %5139 = vmatprep.mubr.f32.mxu1 %v8223_v6 }
 0x3d9   :  { %v8232_v39 = vpop.eup %5829  ;;  %v1702_v37 = vsub.f32 %v9084_v60, %v1681_v51  ;;  %5140 = vmatmul.mubr.f32.gmra.mrb[92].mxu1 %v8229_v46  ;;  %v9088_v51 = vld [vmem:[#allocation66_spill] sm:$0xff]  ;;  %v2514_v29 = vmul.f32 1.442695, %v2495_v21 }
 0x3da   :  { %2581 = vadd.xlane.f32.xlu0 %v8232_v39  ;;  %v8239_v61 = vpop.permute.xlu0 %1906  ;;  %v2502_v17 = vsub.f32 %v9088_v51, %v8173_v31  ;;  %v5832_v11 = vpop.eup %5831  ;;  %v9091_v21 = vld [vmem:[#allocation70_spill] sm:$0xff] }
 0x3db   :  { %v1732_v44 = vmul.f32 1.442695, %v1702_v37  ;;  %9086 = vst [vmem:[#allocation69_spill] sm:$0xff] %v8239_v61  ;;  %v2497_v37 = vsub.f32 %v9089_v50, %v8021_v15  ;;  %v2504_v2 = vsub.f32 %v9091_v21, %v2475_v63 }
 0x3dc   :  { %v8237_v36 = vpop.permute.xlu1 %2686  ;;  %v5834_v27 = vpop.eup %5833 }
 0x3dd   :  { %9085 = vst [vmem:[#allocation23_spill] sm:$0xff] %v8237_v36  ;;  %5835 = vpow2.f32 %v1732_v44  ;;  %v2528_v44 = vmul.f32 1.442695, %v2502_v17 }
 0x3de   :  { %5837 = vpow2.f32 %v1734_v23  ;;  %1780 = vadd.xlane.f32.xlu0 %v8121_v8  ;;  %v8248_v36 = vpop.permute.xlu0 %1916  ;;  %v2518_v23 = vmul.f32 1.442695, %v2497_v37  ;;  %v9090_v8 = vld [vmem:[#allocation43_spill] sm:$0xff]  ;;  %v2532_v37 = vmul.f32 1.442695, %v2504_v2  ;;  %v9095_v2 = vld [vmem:[#allocation54_spill] sm:$0xff] }
 0x3df   :  { %5839 = vpow2.f32 %v2524_v43  ;;  %v2499_v43 = vsub.f32 %v9090_v8, %v8086_v48  ;;  %v9092_v48 = vld [vmem:[#allocation63_spill] sm:$0xff] }
 0x3e0   :  { %v2485_v60 = vpop.permute.xlu1 %2484  ;;  %5841 = vpow2.f32 %v2514_v29  ;;  %v9093_v8 = vld [vmem:[#allocation67_spill] sm:$0xff] }
 0x3e1   :  { %5843 = vpow2.f32 %v2528_v44  ;;  %v2522_v29 = vmul.f32 1.442695, %v2499_v43  ;;  %v2503_v21 = vsub.f32 %v9093_v8, %v8140_v33  ;;  %v9096_v33 = vld [vmem:[#allocation71_spill] sm:$0xff] }
 0x3e2   :  { %2585 = vadd.xlane.f32.xlu0 %v5832_v11  ;;  %v8263_v50 = vpop.permute.xlu0 %1926  ;;  %5845 = vpow2.f32 %v2518_v23  ;;  %v9094_v23 = vld [vmem:[#allocation74_spill] sm:$0xff] }
 0x3e3   :  { %5847 = vpow2.f32 %v2522_v29 }
 0x3e4   :  { %v8250_v61 = vpop.permute.xlu1 %1891  ;;  %5849 = vpow2.f32 %v2532_v37 }
 0x3e6   :  { %1784 = vadd.xlane.f32.xlu0 %v8158_v12  ;;  %v2501_v12 = vsub.f32 %v9092_v48, %v8078_v47  ;;  %v2506_v47 = vsub.f32 %v9094_v23, %v2485_v60  ;;  %v8276_v43 = vpop.permute.xlu0 %3224 }
 0x3e7   :  { %v8255_v31 = vpop.eup %5835 }
 0x3e8   :  { %v8258_v15 = vpop.eup %5837  ;;  %v8260_v51 = vpop.permute.xlu1 %2701  ;;  %5142 = vmatprep.mubr.f32.mxu1 %v8255_v31  ;;  %v2526_v44 = vmul.f32 1.442695, %v2501_v12  ;;  %v2536_v60 = vmul.f32 1.442695, %v2506_v47 }
 0x3e9   :  { %v5840_v17 = vpop.eup %5839  ;;  %5143 = vmatmul.mubr.f32.gmra.mrb[94].mxu1 %v8258_v15 }
 0x3ea   :  { %2589 = vadd.xlane.f32.xlu0 %v5840_v17  ;;  %5233 = vmatprep.mubr.f32.mxu1 %v5834_v27  ;;  %v5842_v48 = vpop.eup %5841  ;;  %5851 = vpow2.f32 %v2526_v44  ;;  %v8290_v8 = vpop.permute.xlu0 %3234  ;;  %v9098_v44 = vld [vmem:[#allocation75_spill] sm:$0xff] }
 0x3eb   :  { %v5844_v12 = vpop.eup %5843 }
 0x3ec   :  { %v8268_v63 = vpop.permute.xlu1 %2696  ;;  %v5846_v29 = vpop.eup %5845 }
 0x3ed   :  { %5234 = vmatmul.mubr.f32.vlgmr.msra.gmra.mrb[96].mxu1 %v8196_v58 }
 0x3ee   :  { %5628 = vmatpush3.bf16.msra.mxu1 %v9048_v56  ;;  %1788 = vadd.xlane.f32.xlu0 %v8189_v32  ;;  %v2530_v56 = vmul.f32 1.442695, %v2503_v21  ;;  %v2505_v32 = vsub.f32 %v9096_v33, %v8176_v14  ;;  %v2507_v14 = vsub.f32 %v9098_v44, %v8215_v38  ;;  %v5848_v21 = vpop.eup %5847  ;;  %v3245_v38 = vpop.permute.xlu0 %3244 }
 0x3ef   :  { %5236 = vmatprep.mubr.f32.mxu1 %v8212_v40  ;;  %5630 = vmatprep.subr.bf16.mxu1 %v9095_v2  ;;  %v9097_v40 = vld [vmem:[#allocation56_spill] sm:$0xff]  ;;  %v5850_v47 = vpop.eup %5849 }
 0x3f0   :  { %v8280_v58 = vpop.permute.xlu1 %1901  ;;  %5853 = vpow2.f32 %v2530_v56 }
 0x3f1   :  { %1768 = vadd.xlane.f32.xlu1 %v7998_v10  ;;  %5237 = vmatmul.mubr.f32.gmra.mrb[98].mxu1 %v5842_v48  ;;  %v2534_v10 = vmul.f32 1.442695, %v2505_v32  ;;  %5855 = vpow2.f32 %v2536_v60 }
 0x3f2   :  { %5632 = vmatpush3.bf16.msra.mxu1 %v9095_v2  ;;  %2593 = vadd.xlane.f32.xlu0 %v5844_v12  ;;  %v9100_v2 = vld [vmem:[#allocation15_spill] sm:$0xff] }
 0x3f3   :  { %5239 = vmatprep.mubr.f32.mxu1 %v8232_v39  ;;  %5634 = vmatprep.subr.bf16.mxu1 %v9097_v40  ;;  %v9099_v39 = vld [vmem:[#allocation58_spill] sm:$0xff]  ;;  %5857 = vpow2.f32 %v2534_v10 }
 0x3f4   :  { %v8288_v37 = vpop.permute.xlu1 %2711 }
 0x3f5   :  { %2573 = vadd.xlane.f32.xlu1 %v5834_v27  ;;  %5240 = vmatmul.mubr.f32.gmra.mrb[100].mxu1 %v5846_v29  ;;  %v2538_v27 = vmul.f32 1.442695, %v2507_v14 }
 0x3f6   :  { %5636 = vmatpush3.bf16.msra.mxu1 %v9097_v40  ;;  %1792 = vadd.xlane.f32.xlu0 %v8223_v6  ;;  %v5852_v6 = vpop.eup %5851 }
 0x3f7   :  { %5242 = vmatprep.mubr.f32.mxu1 %v5832_v11  ;;  %5638 = vmatprep.subr.bf16.mxu1 %v9099_v39  ;;  %5859 = vpow2.f32 %v2538_v27 }
 0x3f8   :  { %v8297_v23 = vpop.permute.xlu1 %2706 }
 0x3f9   :  { %1774 = vadd.xlane.f32.xlu1 %v8041_v1  ;;  %5243 = vmatmul.mubr.f32.gmra.mrb[102].mxu1 %v5848_v21  ;;  %v9102_v1 = vld [vmem:[#allocation42_spill] sm:$0xff] }
 0x3fa   :  { %5640 = vmatpush3.bf16.msra.mxu1 %v9099_v39  ;;  %2597 = vadd.xlane.f32.xlu0 %v5850_v47  ;;  %v5854_v56 = vpop.eup %5853  ;;  %v9111_v39 = vld [vmem:[#allocation76_spill] sm:$0xff] }
 0x3fb   :  { %5245 = vmatprep.mubr.f32.mxu1 %v5840_v17  ;;  %5642 = vmatprep.subr.bf16.mxu1 %v9100_v2  ;;  %v5856_v32 = vpop.eup %5855  ;;  %v3255_v17 = vpop.permute.xlu0 %3254 }
 0x3fc   :  { %v8302_v11 = vpop.permute.xlu1 %1911 }
 0x3fd   :  { %9101 = vst [vmem:[#allocation31_spill] sm:$0xff] %v8302_v11  ;;  %2579 = vadd.xlane.f32.xlu1 %v5842_v48  ;;  %5246 = vmatmul.mubr.f32.gmra.mrb[104].mxu1 %v5852_v6  ;;  %v9104_v48 = vld [vmem:[#allocation59_spill] sm:$0xff]  ;;  %v5858_v60 = vpop.eup %5857 }
 0x3fe   :  { %5644 = vmatpush3.bf16.msra.mxu1 %v9100_v2  ;;  %1796 = vadd.xlane.f32.xlu0 %v8255_v31 }
 0x3ff   :  { %5248 = vmatprep.mubr.f32.mxu1 %v5844_v12  ;;  %5646 = vmatprep.subr.bf16.mxu1 %v9102_v1  ;;  %v8315_v31 = vpop.permute.xlu0 %3466  ;;  %v9107_v12 = vld [vmem:[#allocation61_spill] sm:$0xff] }
 0x400   :  { %v8307_v33 = vpop.permute.xlu1 %2721  ;;  %9106 = vst [vmem:[#allocation17_spill] sm:$0xff] %v8315_v31 }
 0x401   :  { %9103 = vst [vmem:[#allocation68_spill] sm:$0xff] %v8307_v33  ;;  %1778 = vadd.xlane.f32.xlu1 %v8084_v35  ;;  %5249 = vmatmul.mubr.f32.gmra.mrb[106].mxu1 %v5854_v56  ;;  %v8318_v35 = vpop.eup %5859 }
 0x402   :  { %5648 = vmatpush3.bf16.msra.mxu1 %v9102_v1  ;;  %2601 = vadd.xlane.f32.xlu0 %v5856_v32  ;;  %v9113_v1 = vld [vmem:[#allocation77_spill] sm:$0xff] }
 0x403   :  { %5251 = vmatprep.mubr.f32.mxu1 %v5850_v47  ;;  %5650 = vmatprep.subr.bf16.mxu1 %v9104_v48  ;;  %v3298_v47 = vsub.f32 %v9111_v39, %v8276_v43  ;;  %v9116_v43 = vld [vmem:[#allocation80_spill] sm:$0xff] }
 0x404   :  { %v8312_v40 = vpop.permute.xlu1 %2716  ;;  %v3302_v39 = vsub.f32 %v9116_v43, %v3245_v38 }
 0x405   :  { %9105 = vst [vmem:[#allocation39_spill] sm:$0xff] %v8312_v40  ;;  %2583 = vadd.xlane.f32.xlu1 %v5846_v29  ;;  %5252 = vmatmul.mubr.f32.gmra.mrb[108].mxu1 %v5858_v60  ;;  %v3265_v29 = vpop.permute.xlu0 %3264 }
 0x406   :  { %5652 = vmatpush3.bf16.msra.mxu1 %v9104_v48  ;;  %5254 = vmatprep.mubr.f32.mxu1 %v5856_v32  ;;  %v3315_v32 = vmul.f32 1.442695, %v3298_v47  ;;  %v9114_v48 = vld [vmem:[#allocation78_spill] sm:$0xff] }
 0x407   :  { %5654 = vmatprep.subr.bf16.mxu1 %v9107_v12 }
 0x408   :  { %v8320_v10 = vpop.permute.xlu1 %1921 }
 0x409   :  { %9108 = vst [vmem:[#allocation73_spill] sm:$0xff] %v8320_v10  ;;  %1782 = vadd.xlane.f32.xlu1 %v8123_v22  ;;  %5255 = vmatmul.mubr.f32.gmra.mrb[110].mxu1 %v8318_v35  ;;  %v8332_v27 = vpop.permute.xlu0 %3461 }
 0x40a   :  { %5656 = vmatpush3.bf16.msra.mxu1 %v9107_v12  ;;  %9112 = vst [vmem:[#allocation25_spill] sm:$0xff] %v8332_v27  ;;  %v3300_v12 = vsub.f32 %v9114_v48, %v8290_v8  ;;  %v3323_v8 = vmul.f32 1.442695, %v3302_v39 }
 0x40c   :  { %v8325_v44 = vpop.permute.xlu1 %2731 }
 0x40d   :  { %9109 = vst [vmem:[#allocation62_spill] sm:$0xff] %v8325_v44  ;;  %2587 = vadd.xlane.f32.xlu1 %v5848_v21  ;;  %v3275_v21 = vpop.permute.xlu0 %3274 }
 0x410   :  { %v8327_v14 = vpop.permute.xlu1 %2726 }
 0x411   :  { %9110 = vst [vmem:[#allocation72_spill] sm:$0xff] %v8327_v14  ;;  %1786 = vadd.xlane.f32.xlu1 %v8160_v9  ;;  %v9115_v14 = vld [vmem:[#allocation79_spill] sm:$0xff]  ;;  %v3319_v9 = vmul.f32 1.442695, %v3300_v12  ;;  %v9122_v12 = vld [vmem:[#allocation85_spill] sm:$0xff] }
 0x414   :  { %v3220_v2 = vpop.permute.xlu1 %3219 }
 0x415   :  { %v3297_v22 = vsub.f32 %v9113_v1, %v3220_v2  ;;  %2591 = vadd.xlane.f32.xlu1 %v5852_v6  ;;  %v9117_v6 = vld [vmem:[#allocation81_spill] sm:$0xff]  ;;  %v9118_v2 = vld [vmem:[#allocation82_spill] sm:$0xff] }
 0x416   :  { %v3304_v1 = vsub.f32 %v9118_v2, %v3255_v17 }
 0x417   :  { %v3313_v44 = vmul.f32 1.442695, %v3297_v22  ;;  %v8342_v22 = vpop.permute.xlu0 %3471 }
 0x418   :  { %v3230_v10 = vpop.permute.xlu1 %3229  ;;  %9119 = vst [vmem:[#allocation66_spill] sm:$0xff] %v8342_v22  ;;  %v3327_v38 = vmul.f32 1.442695, %v3304_v1 }
 0x419   :  { %5861 = vpow2.f32 %v3313_v44  ;;  %v3299_v40 = vsub.f32 %v9115_v14, %v3230_v10  ;;  %1790 = vadd.xlane.f32.xlu1 %v8193_v7  ;;  %v9120_v7 = vld [vmem:[#allocation83_spill] sm:$0xff] }
 0x41a   :  { %5863 = vpow2.f32 %v3315_v32 }
 0x41b   :  { %v3317_v27 = vmul.f32 1.442695, %v3299_v40  ;;  %v9121_v40 = vld [vmem:[#allocation84_spill] sm:$0xff]  ;;  %v3285_v17 = vpop.permute.xlu0 %3284 }
 0x41c   :  { %v3240_v33 = vpop.permute.xlu1 %3239 }
 0x41d   :  { %5865 = vpow2.f32 %v3317_v27  ;;  %v3301_v47 = vsub.f32 %v9117_v6, %v3240_v33  ;;  %2595 = vadd.xlane.f32.xlu1 %v5854_v56  ;;  %v3306_v27 = vsub.f32 %v9121_v40, %v3265_v29  ;;  %v9124_v29 = vld [vmem:[#allocation86_spill] sm:$0xff] }
 0x41e   :  { %5867 = vpow2.f32 %v3319_v9 }
 0x41f   :  { %v3321_v44 = vmul.f32 1.442695, %v3301_v47  ;;  %v3331_v43 = vmul.f32 1.442695, %v3306_v27  ;;  %v8352_v1 = vpop.permute.xlu0 %3481 }
 0x420   :  { %v3250_v10 = vpop.permute.xlu1 %3249  ;;  %9125 = vst [vmem:[#allocation43_spill] sm:$0xff] %v8352_v1  ;;  %v1750_v1 = vld [vmem:[#allocation4 + $0x70] sm:$0xff] }
 0x421   :  { %5869 = vpow2.f32 %v3321_v44  ;;  %v3303_v14 = vsub.f32 %v9120_v7, %v3250_v10  ;;  %1794 = vadd.xlane.f32.xlu1 %v8229_v46  ;;  %v9126_v10 = vld [vmem:[#allocation87_spill] sm:$0xff] }
 0x422   :  { %5871 = vpow2.f32 %v3323_v8  ;;  %v3308_v8 = vsub.f32 %v9124_v29, %v3275_v21 }
 0x423   :  { %v5862_v32 = vpop.eup %5861  ;;  %v3325_v33 = vmul.f32 1.442695, %v3303_v14  ;;  %v3295_v21 = vpop.permute.xlu0 %3294 }
 0x424   :  { %v5864_v56 = vpop.eup %5863  ;;  %v3260_v48 = vpop.permute.xlu1 %3259  ;;  %3378 = vadd.xlane.f32.xlu0 %v5862_v32  ;;  %5345 = vmatprep.mubr.f32.mxu1 %v5862_v32  ;;  %v3335_v14 = vmul.f32 1.442695, %v3308_v8  ;;  %v9128_v32 = vld [vmem:[#allocation88_spill] sm:$0xff] }
 0x425   :  { %5873 = vpow2.f32 %v3325_v33  ;;  %v3305_v9 = vsub.f32 %v9122_v12, %v3260_v48  ;;  %2599 = vadd.xlane.f32.xlu1 %v5858_v60  ;;  %5346 = vmatmul.mubr.f32.vlgmr.msra.gmra.mrb[112].mxu1 %v5864_v56  ;;  %v3310_v33 = vsub.f32 %v9128_v32, %v3285_v17 }
 0x426   :  { %5875 = vpow2.f32 %v3327_v38 }
 0x427   :  { %v5866_v39 = vpop.eup %5865  ;;  %v3329_v46 = vmul.f32 1.442695, %v3305_v9 }
 0x428   :  { %v5868_v6 = vpop.eup %5867  ;;  %v8348_v47 = vpop.permute.xlu1 %3476  ;;  %3382 = vadd.xlane.f32.xlu0 %v5866_v39  ;;  %5348 = vmatprep.mubr.f32.mxu1 %v5866_v39  ;;  %v3339_v39 = vmul.f32 1.442695, %v3310_v33 }
 0x429   :  { %9123 = vst [vmem:[#allocation33_spill] sm:$0xff] %v8348_v47  ;;  %5877 = vpow2.f32 %v3329_v46  ;;  %1798 = vadd.xlane.f32.xlu1 %v8258_v15  ;;  %5349 = vmatmul.mubr.f32.gmra.mrb[114].mxu1 %v5868_v6  ;;  %v8360_v46 = vpop.permute.xlu0 %3491 }
 0x42a   :  { %5879 = vpow2.f32 %v3331_v43  ;;  %9130 = vst [vmem:[#allocation63_spill] sm:$0xff] %v8360_v46 }
 0x42b   :  { %v5870_v2 = vpop.eup %5869 }
 0x42c   :  { %v5872_v60 = vpop.eup %5871  ;;  %v3270_v44 = vpop.permute.xlu1 %3269  ;;  %3386 = vadd.xlane.f32.xlu0 %v5870_v2  ;;  %5351 = vmatprep.mubr.f32.mxu1 %v5870_v2 }
 0x42d   :  { %v3307_v7 = vsub.f32 %v9126_v10, %v3270_v44  ;;  %2603 = vadd.xlane.f32.xlu1 %v8318_v35  ;;  %5352 = vmatmul.mubr.f32.gmra.mrb[116].mxu1 %v5872_v60  ;;  %v9129_v35 = vld [vmem:[#allocation89_spill] sm:$0xff] }
 0x42f   :  { %v5874_v38 = vpop.eup %5873  ;;  %v3333_v40 = vmul.f32 1.442695, %v3307_v7  ;;  %v8365_v7 = vpop.permute.xlu0 %3506 }
 0x430   :  { %v5876_v15 = vpop.eup %5875  ;;  %v8356_v27 = vpop.permute.xlu1 %3486  ;;  %3390 = vadd.xlane.f32.xlu0 %v5874_v38  ;;  %5354 = vmatprep.mubr.f32.mxu1 %v5874_v38  ;;  %9133 = vst [vmem:[#allocation74_spill] sm:$0xff] %v8365_v7 }
 0x431   :  { %9127 = vst [vmem:[#allocation70_spill] sm:$0xff] %v8356_v27  ;;  %5881 = vpow2.f32 %v3333_v40  ;;  %3380 = vadd.xlane.f32.xlu1 %v5864_v56  ;;  %5355 = vmatmul.mubr.f32.gmra.mrb[118].mxu1 %v5876_v15  ;;  %v9132_v56 = vld [vmem:[#allocation90_spill] sm:$0xff]  ;;  %v4492_v27 = vld [vmem:[#allocation9 + $0x28] sm:$0xff] }
 0x432   :  { %5883 = vpow2.f32 %v3335_v14  ;;  %v3312_v17 = vsub.f32 %v9132_v56, %v3295_v21 }
 0x433   :  { %v5878_v48 = vpop.eup %5877  ;;  %v8368_v32 = vpop.permute.xlu0 %3516 }
 0x434   :  { %v5880_v12 = vpop.eup %5879  ;;  %v3280_v9 = vpop.permute.xlu1 %3279  ;;  %3394 = vadd.xlane.f32.xlu0 %v5878_v48  ;;  %5357 = vmatprep.mubr.f32.mxu1 %v5878_v48  ;;  %v3343_v38 = vmul.f32 1.442695, %v3312_v17  ;;  %9135 = vst [vmem:[#allocation54_spill] sm:$0xff] %v8368_v32  ;;  %v9139_v17 = vld [vmem:[#allocation96_spill] sm:$0xff] }
 0x435   :  { %v3309_v43 = vsub.f32 %v9129_v35, %v3280_v9  ;;  %3384 = vadd.xlane.f32.xlu1 %v5868_v6  ;;  %5358 = vmatmul.mubr.f32.gmra.mrb[120].mxu1 %v5880_v12  ;;  %v9134_v6 = vld [vmem:[#allocation91_spill] sm:$0xff]  ;;  %v9138_v35 = vld [vmem:[#allocation94_spill] sm:$0xff] }
 0x437   :  { %v3337_v29 = vmul.f32 1.442695, %v3309_v43  ;;  %v8370_v33 = vpop.permute.xlu0 %3526 }
 0x438   :  { %v8362_v8 = vpop.permute.xlu1 %3496  ;;  %9136 = vst [vmem:[#allocation71_spill] sm:$0xff] %v8370_v33  ;;  %v3768_v33 = vld [vmem:[#allocation3 + $0x8] sm:$0xff] }
 0x439   :  { %9131 = vst [vmem:[#allocation67_spill] sm:$0xff] %v8362_v8  ;;  %5885 = vpow2.f32 %v3337_v29  ;;  %3388 = vadd.xlane.f32.xlu1 %v5872_v60  ;;  %v2542_v29 = vld [vmem:[#allocation4 + $0x88] sm:$0xff]  ;;  %vm3784_vm2 = vcmp.gt.f32.partialorder %v3768_v33, -1e+29  ;;  %v2549_v33 = vld [vmem:[#allocation4 + $0xc0] sm:$0xff] }
 0x43a   :  { %5887 = vpow2.f32 %v3339_v39 }
 0x43b   :  { %v5882_v2 = vpop.eup %5881 }
 0x43c   :  { %v5884_v44 = vpop.eup %5883  ;;  %v3290_v10 = vpop.permute.xlu1 %3289  ;;  %3398 = vadd.xlane.f32.xlu0 %v5882_v2  ;;  %5360 = vmatprep.mubr.f32.mxu1 %v5882_v2  ;;  %v2558_v2 = vmul.f32 %v9139_v17, %v2542_v29 }
 0x43d   :  { %v3311_v14 = vsub.f32 %v9134_v6, %v3290_v10  ;;  %3392 = vadd.xlane.f32.xlu1 %v5876_v15  ;;  %5361 = vmatmul.mubr.f32.gmra.mrb[122].mxu1 %v5884_v44  ;;  %v8372_v15 = vpop.permute.xlu0 %3536  ;;  %v1738_v10 = vld [vmem:[#allocation4 + $0x10] sm:$0xff] }
 0x43e   :  { %9137 = vst [vmem:[#allocation56_spill] sm:$0xff] %v8372_v15 }
 0x43f   :  { %v3341_v40 = vmul.f32 1.442695, %v3311_v14  ;;  %v9140_v14 = vld [vmem:[#allocation98_spill] sm:$0xff] }
 0x441   :  { %5889 = vpow2.f32 %v3341_v40  ;;  %3396 = vadd.xlane.f32.xlu1 %v5880_v12  ;;  %v1737_v12 = vld [vmem:[#allocation4 + $0x8] sm:$0xff] }
 0x442   :  { %5891 = vpow2.f32 %v3343_v38  ;;  %v1753_v43 = vmul.f32 %v9138_v35, %v1737_v12  ;;  %v1754_v38 = vmul.f32 %v9140_v14, %v1738_v10  ;;  %v9141_v35 = vld [vmem:[#allocation102_spill] sm:$0xff] }
 0x443   :  { %v5886_v60 = vpop.eup %5885 }
 0x444   :  { %v5888_v21 = vpop.eup %5887  ;;  %3402 = vadd.xlane.f32.xlu0 %v5886_v60  ;;  %5363 = vmatprep.mubr.f32.mxu1 %v5886_v60  ;;  %v2543_v60 = vld [vmem:[#allocation4 + $0x90] sm:$0xff] }
 0x445   :  { %3400 = vadd.xlane.f32.xlu1 %v5884_v44  ;;  %5364 = vmatmul.mubr.f32.gmra.mrb[124].mxu1 %v5888_v21 }
 0x449   :  { %3404 = vadd.xlane.f32.xlu1 %v5888_v21 }
 0x44b   :  { %v5890_v48 = vpop.eup %5889 }
 0x44c   :  { %v5892_v9 = vpop.eup %5891  ;;  %3406 = vadd.xlane.f32.xlu0 %v5890_v48  ;;  %5366 = vmatprep.mubr.f32.mxu1 %v5890_v48 }
 0x44d   :  { %3408 = vadd.xlane.f32.xlu1 %v5892_v9  ;;  %5367 = vmatmul.mubr.f32.gmra.mrb[126].mxu1 %v5892_v9 }
 0x453   :  { %v1771_v39 = vpop.xlane.xlu0 %1770 }
 0x454   :  { %v1801_v56 = vadd.f32 %v1771_v39, %v1753_v43  ;;  %v2559_v43 = vmul.f32 %v9141_v35, %v2543_v60  ;;  %v8389_v60 = vpop.permute.xlu1 %3501 }
 0x456   :  { %1818 = vst.msk [vmem:[#allocation4 + $0x8] sm:$0xff] %vm554_vm1, %v1801_v56  ;;  %v1740_v56 = vld [vmem:[#allocation4 + $0x20] sm:$0xff] }
 0x457   :  { %v2576_v44 = vpop.xlane.xlu0 %2575 }
 0x458   :  { %v2606_v6 = vadd.f32 %v2576_v44, %v2558_v2  ;;  %v9142_v2 = vld [vmem:[#allocation106_spill] sm:$0xff] }
 0x459   :  { %v1756_v44 = vmul.f32 %v9142_v2, %v1740_v56  ;;  %v2547_v2 = vld [vmem:[#allocation4 + $0xb0] sm:$0xff] }
 0x45a   :  { %2622 = vst.msk [vmem:[#allocation4 + $0x88] sm:$0xff] %vm554_vm1, %v2606_v6  ;;  %v2545_v6 = vld [vmem:[#allocation4 + $0xa0] sm:$0xff] }
 0x45b   :  { %v1773_v40 = vpop.xlane.xlu0 %1772 }
 0x45c   :  { %v1802_v21 = vadd.f32 %v1773_v40, %v1754_v38  ;;  %v8379_v48 = vpop.f32.mrb[80].mxu1  ;;  %v9143_v38 = vld [vmem:[#allocation110_spill] sm:$0xff] }
 0x45d   :  { %v8381_v9 = vpop.f32.mrb[81].mxu1  ;;  %v3800_v12 = vld [vmem:[#allocation4 + $0x8] sm:$0xff]  ;;  %v2561_v40 = vmul.f32 %v9143_v38, %v2545_v6 }
 0x45e   :  { %1819 = vst.msk [vmem:[#allocation4 + $0x10] sm:$0xff] %vm554_vm1, %v1802_v21  ;;  %v3816_v39 = vmax.f32 %v3800_v12, 1e-30  ;;  %v1742_v21 = vld [vmem:[#allocation4 + $0x30] sm:$0xff] }
 0x45f   :  { %v2578_v29 = vpop.xlane.xlu0 %2577 }
 0x460   :  { %v2607_v17 = vadd.f32 %v2578_v29, %v2559_v43  ;;  %5893 = vrcp.f32 %v3816_v39  ;;  %v1758_v29 = vmul.f32 %v7881_v45, %v1742_v21 }
 0x462   :  { %2623 = vst.msk [vmem:[#allocation4 + $0x90] sm:$0xff] %vm554_vm1, %v2607_v17 }
 0x463   :  { %v1777_v10 = vpop.xlane.xlu0 %1776 }
 0x464   :  { %v1804_v14 = vadd.f32 %v1777_v10, %v1756_v44  ;;  %v8397_v10 = vpop.permute.xlu1 %3511 }
 0x466   :  { %1821 = vst.msk [vmem:[#allocation4 + $0x20] sm:$0xff] %vm554_vm1, %v1804_v14  ;;  %v1744_v14 = vld [vmem:[#allocation4 + $0x40] sm:$0xff] }
 0x467   :  { %v2582_v15 = vpop.xlane.xlu0 %2581 }
 0x468   :  { %v2609_v12 = vadd.f32 %v2582_v15, %v2561_v40  ;;  %v8391_v35 = vpop.f32.mrb[82].mxu1  ;;  %v2563_v15 = vmul.f32 %v7897_v18, %v2547_v2  ;;  %v1760_v40 = vmul.f32 %v7913_v59, %v1744_v14  ;;  %v8403_v21 = vpop.permute.xlu1 %3521  ;;  %v2565_v18 = vmul.f32 %v7929_v42, %v2549_v33  ;;  %v2551_v14 = vld [vmem:[#allocation4 + $0xd0] sm:$0xff]  ;;  %v2541_v33 = vld [vmem:[#allocation4 + $0x80] sm:$0xff] }
 0x469   :  { %v8393_v43 = vpop.f32.mrb[83].mxu1  ;;  %v2567_v42 = vmul.f32 %v7960_v28, %v2551_v14 }
 0x46a   :  { %v5894_v39 = vpop.eup %5893  ;;  %2625 = vst.msk [vmem:[#allocation4 + $0xa0] sm:$0xff] %vm554_vm1, %v2609_v12 }
 0x46b   :  { %v1781_v56 = vpop.xlane.xlu0 %1780  ;;  %v3864_v17 = vsel %vm3784_vm2, %v5894_v39, 0.0 }
 0x46c   :  { %v1806_v44 = vadd.f32 %v1781_v56, %v1758_v29  ;;  %3902 = vperm.xlu1 %5699, %v3864_v17   ;;  %v1746_v17 = vld [vmem:[#allocation4 + $0x50] sm:$0xff] }
 0x46d   :  { %v1762_v59 = vmul.f32 %v7938_v4, %v1746_v17  ;;  %v9145_v17 = vld [vmem:[#allocation93_spill] sm:$0xff] }
 0x46e   :  { %1823 = vst.msk [vmem:[#allocation4 + $0x30] sm:$0xff] %vm554_vm1, %v1806_v44  ;;  %v8411_v44 = vpop.permute.xlu1 %3531 }
 0x46f   :  { %v2586_v6 = vpop.xlane.xlu0 %2585 }
 0x470   :  { %v2611_v38 = vadd.f32 %v2586_v6, %v2563_v15  ;;  %v1736_v15 = vld [vmem:[#allocation4] sm:$0xff] }
 0x472   :  { %2627 = vst.msk [vmem:[#allocation4 + $0xb0] sm:$0xff] %vm554_vm1, %v2611_v38 }
 0x473   :  { %v1785_v45 = vpop.xlane.xlu0 %1784 }
 0x474   :  { %v1808_v12 = vadd.f32 %v1785_v45, %v1760_v40  ;;  %v8405_v39 = vpop.f32.mrb[84].mxu1  ;;  %v9144_v40 = vld [vmem:[#allocation92_spill] sm:$0xff] }
 0x475   :  { %v8407_v29 = vpop.f32.mrb[85].mxu1  ;;  %v1752_v45 = vmul.f32 %v9144_v40, %v1736_v15 }
 0x476   :  { %1825 = vst.msk [vmem:[#allocation4 + $0x40] sm:$0xff] %vm554_vm1, %v1808_v12 }
 0x477   :  { %v2590_v56 = vpop.xlane.xlu0 %2589 }
 0x478   :  { %v2613_v2 = vadd.f32 %v2590_v56, %v2565_v18  ;;  %v1748_v56 = vld [vmem:[#allocation4 + $0x60] sm:$0xff] }
 0x479   :  { %v1764_v15 = vmul.f32 %v7965_v24, %v1748_v56 }
 0x47a   :  { %2629 = vst.msk [vmem:[#allocation4 + $0xc0] sm:$0xff] %vm554_vm1, %v2613_v2  ;;  %v2557_v2 = vmul.f32 %v9145_v17, %v2541_v33  ;;  %v2544_v33 = vld [vmem:[#allocation4 + $0x98] sm:$0xff] }
 0x47b   :  { %v1789_v6 = vpop.xlane.xlu0 %1788 }
 0x47c   :  { %v1810_v38 = vadd.f32 %v1789_v6, %v1762_v59  ;;  %v1739_v6 = vld [vmem:[#allocation4 + $0x18] sm:$0xff] }
 0x47e   :  { %1827 = vst.msk [vmem:[#allocation4 + $0x50] sm:$0xff] %vm554_vm1, %v1810_v38  ;;  %v1769_v12 = vpop.xlane.xlu1 %1768  ;;  %v2553_v38 = vld [vmem:[#allocation4 + $0xe0] sm:$0xff] }
 0x47f   :  { %v1800_v32 = vadd.f32 %v1769_v12, %v1752_v45  ;;  %v2594_v18 = vpop.xlane.xlu0 %2593  ;;  %v9146_v45 = vld [vmem:[#allocation95_spill] sm:$0xff] }
 0x480   :  { %v2615_v7 = vadd.f32 %v2594_v18, %v2567_v42  ;;  %v8418_v8 = vpop.f32.mrb[86].mxu1  ;;  %v1755_v12 = vmul.f32 %v9146_v45, %v1739_v6  ;;  %v2569_v42 = vmul.f32 %v7986_v19, %v2553_v38  ;;  %v4040_v18 = vld [vmem:[#allocation4 + $0x88] sm:$0xff]  ;;  %v3801_v19 = vld [vmem:[#allocation4 + $0x10] sm:$0xff] }
 0x481   :  { %1817 = vst.msk [vmem:[#allocation4] sm:$0xff] %vm554_vm1, %v1800_v32  ;;  %v8421_v4 = vpop.f32.mrb[87].mxu1 }
 0x482   :  { %2631 = vst.msk [vmem:[#allocation4 + $0xd0] sm:$0xff] %vm554_vm1, %v2615_v7  ;;  %v2574_v59 = vpop.xlane.xlu1 %2573 }
 0x483   :  { %v2605_v28 = vadd.f32 %v2574_v59, %v2557_v2  ;;  %v1793_v14 = vpop.xlane.xlu0 %1792  ;;  %v9147_v2 = vld [vmem:[#allocation97_spill] sm:$0xff] }
 0x484   :  { %v1812_v40 = vadd.f32 %v1793_v14, %v1764_v15  ;;  %v2560_v59 = vmul.f32 %v9147_v2, %v2544_v33  ;;  %v1766_v14 = vmul.f32 %v7990_v13, %v1750_v1  ;;  %v2546_v1 = vld [vmem:[#allocation4 + $0xa8] sm:$0xff] }
 0x485   :  { %2621 = vst.msk [vmem:[#allocation4 + $0x80] sm:$0xff] %vm554_vm1, %v2605_v28  ;;  %v4056_v28 = vmax.f32 %v4040_v18, 1e-30  ;;  %v3817_v18 = vmax.f32 %v3801_v19, 1e-30 }
 0x486   :  { %1829 = vst.msk [vmem:[#allocation4 + $0x60] sm:$0xff] %vm554_vm1, %v1812_v40  ;;  %v1775_v32 = vpop.xlane.xlu1 %1774  ;;  %v1741_v40 = vld [vmem:[#allocation4 + $0x28] sm:$0xff] }
 0x487   :  { %v1803_v7 = vadd.f32 %v1775_v32, %v1755_v12  ;;  %v2598_v17 = vpop.xlane.xlu0 %2597  ;;  %v2555_v12 = vld [vmem:[#allocation4 + $0xf0] sm:$0xff] }
 0x488   :  { %v2617_v24 = vadd.f32 %v2598_v17, %v2569_v42  ;;  %v3799_v56 = vld [vmem:[#allocation4] sm:$0xff]  ;;  %v2571_v13 = vmul.f32 %v8027_v49, %v2555_v12  ;;  %v1743_v12 = vld [vmem:[#allocation4 + $0x38] sm:$0xff] }
 0x489   :  { %1820 = vst.msk [vmem:[#allocation4 + $0x18] sm:$0xff] %vm554_vm1, %v1803_v7  ;;  %v3815_v15 = vmax.f32 %v3799_v56, 1e-30  ;;  %v9148_v7 = vld [vmem:[#allocation99_spill] sm:$0xff]  ;;  %v4041_v56 = vld [vmem:[#allocation4 + $0x90] sm:$0xff] }
 0x48a   :  { %2633 = vst.msk [vmem:[#allocation4 + $0xe0] sm:$0xff] %vm554_vm1, %v2617_v24  ;;  %v2580_v6 = vpop.xlane.xlu1 %2579  ;;  %v1757_v17 = vmul.f32 %v9148_v7, %v1741_v40 }
 0x48b   :  { %v2608_v38 = vadd.f32 %v2580_v6, %v2560_v59  ;;  %v1797_v45 = vpop.xlane.xlu0 %1796  ;;  %5895 = vrcp.f32 %v3815_v15 }
 0x48c   :  { %v1814_v32 = vadd.f32 %v1797_v45, %v1766_v14  ;;  %v4039_v42 = vld [vmem:[#allocation4 + $0x80] sm:$0xff]  ;;  %5897 = vrcp.f32 %v4056_v28 }
 0x48d   :  { %2624 = vst.msk [vmem:[#allocation4 + $0x98] sm:$0xff] %vm554_vm1, %v2608_v38  ;;  %v4055_v33 = vmax.f32 %v4039_v42, 1e-30  ;;  %v9149_v28 = vld [vmem:[#allocation103_spill] sm:$0xff] }
 0x48e   :  { %1831 = vst.msk [vmem:[#allocation4 + $0x70] sm:$0xff] %vm554_vm1, %v1814_v32  ;;  %v1779_v24 = vpop.xlane.xlu1 %1778  ;;  %v2562_v19 = vmul.f32 %v9149_v28, %v2546_v1  ;;  %v3767_v38 = vld [vmem:[#allocation3] sm:$0xff]  ;;  %v4057_v32 = vmax.f32 %v4041_v56, 1e-30  ;;  %v4008_v1 = vld [vmem:[#allocation3 + $0x88] sm:$0xff] }
 0x48f   :  { %v1805_v2 = vadd.f32 %v1779_v24, %v1757_v17  ;;  %v2602_v59 = vpop.xlane.xlu0 %2601  ;;  %5899 = vrcp.f32 %v4055_v33  ;;  %v3803_v42 = vld [vmem:[#allocation4 + $0x20] sm:$0xff]  ;;  %vm3783_vm3 = vcmp.gt.f32.partialorder %v3767_v38, -1e+29  ;;  %vm4024_vm5 = vcmp.gt.f32.partialorder %v4008_v1, -1e+29 }
 0x490   :  { %v2619_v15 = vadd.f32 %v2602_v59, %v2571_v13  ;;  %v8438_v6 = vpop.f32.mrb[88].mxu1  ;;  %v3802_v14 = vld [vmem:[#allocation4 + $0x18] sm:$0xff]  ;;  %5901 = vrcp.f32 %v3817_v18  ;;  %v9150_v24 = vld [vmem:[#allocation107_spill] sm:$0xff]  ;;  %v3819_v18 = vmax.f32 %v3803_v42, 1e-30 }
 0x491   :  { %1822 = vst.msk [vmem:[#allocation4 + $0x28] sm:$0xff] %vm554_vm1, %v1805_v2  ;;  %v8441_v40 = vpop.f32.mrb[89].mxu1  ;;  %v3818_v45 = vmax.f32 %v3802_v14, 1e-30  ;;  %v1759_v13 = vmul.f32 %v9150_v24, %v1743_v12  ;;  %v4007_v2 = vld [vmem:[#allocation3 + $0x80] sm:$0xff]  ;;  %v3769_v12 = vld [vmem:[#allocation3 + $0x10] sm:$0xff] }
 0x492   :  { %2635 = vst.msk [vmem:[#allocation4 + $0xf0] sm:$0xff] %vm554_vm1, %v2619_v15  ;;  %v2584_v49 = vpop.xlane.xlu1 %2583  ;;  %v2548_v15 = vld [vmem:[#allocation4 + $0xb8] sm:$0xff]  ;;  %v4043_v28 = vld [vmem:[#allocation4 + $0xa0] sm:$0xff]  ;;  %vm4023_vm4 = vcmp.gt.f32.partialorder %v4007_v2, -1e+29  ;;  %v1745_v24 = vld [vmem:[#allocation4 + $0x48] sm:$0xff] }
 0x493   :  { %v2610_v7 = vadd.f32 %v2584_v49, %v2562_v19  ;;  %5903 = vrcp.f32 %v3818_v45  ;;  %v2564_v45 = vmul.f32 %v7852_v41, %v2548_v15  ;;  %v3770_v49 = vld [vmem:[#allocation3 + $0x18] sm:$0xff]  ;;  %v4059_v42 = vmax.f32 %v4043_v28, 1e-30 }
 0x494   :  { %v4042_v17 = vld [vmem:[#allocation4 + $0x98] sm:$0xff]  ;;  %5905 = vrcp.f32 %v4057_v32  ;;  %vm3786_vm6 = vcmp.gt.f32.partialorder %v3770_v49, -1e+29  ;;  %vm3785_vm7 = vcmp.gt.f32.partialorder %v3769_v12, -1e+29 }
 0x495   :  { %v5896_v33 = vpop.eup %5895  ;;  %2626 = vst.msk [vmem:[#allocation4 + $0xa8] sm:$0xff] %vm554_vm1, %v2610_v7  ;;  %v4058_v59 = vmax.f32 %v4042_v17, 1e-30 }
 0x496   :  { %v1783_v56 = vpop.xlane.xlu1 %1782  ;;  %v3863_v14 = vsel %vm3783_vm3, %v5896_v33, 0.0  ;;  %v5898_v22 = vpop.eup %5897 }
 0x497   :  { %v1807_v46 = vadd.f32 %v1783_v56, %v1759_v13  ;;  %3897 = vperm.xlu1 %5699, %v3863_v14   ;;  %5907 = vrcp.f32 %v4058_v59  ;;  %v4104_v33 = vsel %vm4024_vm5, %v5898_v22, 0.0  ;;  %v3805_v13 = vld [vmem:[#allocation4 + $0x30] sm:$0xff] }
 0x498   :  { %v3804_v19 = vld [vmem:[#allocation4 + $0x28] sm:$0xff]  ;;  %5909 = vrcp.f32 %v3819_v18  ;;  %v1761_v18 = vmul.f32 %v7884_v52, %v1745_v24  ;;  %v4009_v22 = vld [vmem:[#allocation3 + $0x90] sm:$0xff]  ;;  %v3821_v15 = vmax.f32 %v3805_v13, 1e-30 }
 0x499   :  { %v5900_v38 = vpop.eup %5899  ;;  %1824 = vst.msk [vmem:[#allocation4 + $0x38] sm:$0xff] %vm554_vm1, %v1807_v46  ;;  %v3820_v32 = vmax.f32 %v3804_v19, 1e-30  ;;  %vm4025_vm8 = vcmp.gt.f32.partialorder %v4009_v22, -1e+29 }
 0x49a   :  { %v2588_v7 = vpop.xlane.xlu1 %2587  ;;  %v4103_v17 = vsel %vm4023_vm4, %v5900_v38, 0.0  ;;  %v5902_v56 = vpop.eup %5901 }
 0x49b   :  { %v2612_v59 = vadd.f32 %v2588_v7, %v2564_v45  ;;  %4137 = vperm.xlu0 %5700, %v4103_v17   ;;  %4142 = vperm.xlu1 %5699, %v4104_v33   ;;  %5911 = vrcp.f32 %v3820_v32  ;;  %v3865_v38 = vsel %vm3785_vm7, %v5902_v56, 0.0  ;;  %v2550_v45 = vld [vmem:[#allocation4 + $0xc8] sm:$0xff]  ;;  %v4010_v32 = vld [vmem:[#allocation3 + $0x98] sm:$0xff]  ;;  %v3771_v33 = vld [vmem:[#allocation3 + $0x20] sm:$0xff] }
 0x49c   :  { %v8449_v2 = vpop.f32.mrb[90].mxu1  ;;  %v4044_v41 = vld [vmem:[#allocation4 + $0xa8] sm:$0xff]  ;;  %5913 = vrcp.f32 %v4059_v42  ;;  %v2566_v52 = vmul.f32 %v7922_v55, %v2550_v45  ;;  %vm4026_vm9 = vcmp.gt.f32.partialorder %v4010_v32, -1e+29  ;;  %vm3787_vm11 = vcmp.gt.f32.partialorder %v3771_v33, -1e+29 }
 0x49d   :  { %v5904_v46 = vpop.eup %5903  ;;  %2628 = vst.msk [vmem:[#allocation4 + $0xb8] sm:$0xff] %vm554_vm1, %v2612_v59  ;;  %v8452_v1 = vpop.f32.mrb[91].mxu1  ;;  %v4060_v14 = vmax.f32 %v4044_v41, 1e-30  ;;  %v3772_v42 = vld [vmem:[#allocation3 + $0x28] sm:$0xff]  ;;  %v1747_v41 = vld [vmem:[#allocation4 + $0x58] sm:$0xff] }
 0x49e   :  { %v1787_v28 = vpop.xlane.xlu1 %1786  ;;  %v3866_v19 = vsel %vm3786_vm6, %v5904_v46, 0.0  ;;  %v5906_v7 = vpop.eup %5905  ;;  %v4045_v46 = vld [vmem:[#allocation4 + $0xb0] sm:$0xff]  ;;  %vm3788_vm10 = vcmp.gt.f32.partialorder %v3772_v42, -1e+29  ;;  %v1763_v55 = vmul.f32 %v7891_v25, %v1747_v41 }
 0x49f   :  { %v1809_v49 = vadd.f32 %v1787_v28, %v1761_v18  ;;  %3912 = vperm.xlu0 %5700, %v3866_v19   ;;  %3907 = vperm.xlu1 %5699, %v3865_v38   ;;  %5915 = vrcp.f32 %v4060_v14  ;;  %v4105_v59 = vsel %vm4025_vm8, %v5906_v7, 0.0  ;;  %v4012_v19 = vld [vmem:[#allocation3 + $0xa8] sm:$0xff]  ;;  %v4061_v45 = vmax.f32 %v4045_v46, 1e-30 }
 0x4a0   :  { %v3806_v12 = vld [vmem:[#allocation4 + $0x38] sm:$0xff]  ;;  %5917 = vrcp.f32 %v3821_v15  ;;  %v4011_v15 = vld [vmem:[#allocation3 + $0xa0] sm:$0xff]  ;;  %vm4028_vm12 = vcmp.gt.f32.partialorder %v4012_v19, -1e+29 }
 0x4a1   :  { %v5908_v17 = vpop.eup %5907  ;;  %1826 = vst.msk [vmem:[#allocation4 + $0x48] sm:$0xff] %vm554_vm1, %v1809_v49  ;;  %v3822_v24 = vmax.f32 %v3806_v12, 1e-30  ;;  %v2552_v12 = vld [vmem:[#allocation4 + $0xd8] sm:$0xff]  ;;  %vm4027_vm13 = vcmp.gt.f32.partialorder %v4011_v15, -1e+29 }
 0x4a2   :  { %v2592_v13 = vpop.xlane.xlu1 %2591  ;;  %v4106_v56 = vsel %vm4026_vm9, %v5908_v17, 0.0  ;;  %v5910_v18 = vpop.eup %5909  ;;  %v3807_v17 = vld [vmem:[#allocation4 + $0x40] sm:$0xff]  ;;  %v2568_v25 = vmul.f32 %v7945_v54, %v2552_v12 }
 0x4a3   :  { %v2614_v28 = vadd.f32 %v2592_v13, %v2566_v52  ;;  %4152 = vperm.xlu1 %5699, %v4106_v56   ;;  %4147 = vperm.xlu0 %5700, %v4105_v59   ;;  %5919 = vrcp.f32 %v3822_v24  ;;  %v3867_v49 = vsel %vm3787_vm11, %v5910_v18, 0.0  ;;  %v3773_v24 = vld [vmem:[#allocation3 + $0x30] sm:$0xff]  ;;  %v3823_v59 = vmax.f32 %v3807_v17, 1e-30  ;;  %v3346_v15 = vld [vmem:[#allocation4 + $0x100] sm:$0xff] }
 0x4a4   :  { %v4046_v22 = vld [vmem:[#allocation4 + $0xb8] sm:$0xff]  ;;  %vm3789_vm14 = vcmp.gt.f32.partialorder %v3773_v24, -1e+29 }
 0x4a5   :  { %v5912_v14 = vpop.eup %5911  ;;  %2630 = vst.msk [vmem:[#allocation4 + $0xc8] sm:$0xff] %vm554_vm1, %v2614_v28  ;;  %v4062_v38 = vmax.f32 %v4046_v22, 1e-30  ;;  %v1749_v28 = vld [vmem:[#allocation4 + $0x68] sm:$0xff]  ;;  %v3774_v22 = vld [vmem:[#allocation3 + $0x38] sm:$0xff] }
 0x4a6   :  { %v1791_v32 = vpop.xlane.xlu1 %1790  ;;  %v3868_v7 = vsel %vm3788_vm10, %v5912_v14, 0.0  ;;  %v5914_v52 = vpop.eup %5913  ;;  %vm3790_vm15 = vcmp.gt.f32.partialorder %v3774_v22, -1e+29 }
 0x4a7   :  { %v1811_v13 = vadd.f32 %v1791_v32, %v1763_v55  ;;  %3922 = vperm.xlu0 %5700, %v3868_v7   ;;  %3917 = vperm.xlu1 %5699, %v3867_v49   ;;  %5921 = vrcp.f32 %v4062_v38  ;;  %v4107_v18 = vsel %vm4027_vm13, %v5914_v52, 0.0  ;;  %v1765_v32 = vmul.f32 %v7900_v3, %v1749_v28  ;;  %v4014_v7 = vld [vmem:[#allocation3 + $0xb8] sm:$0xff] }
 0x4a8   :  { %v3808_v42 = vld [vmem:[#allocation4 + $0x48] sm:$0xff]  ;;  %5923 = vrcp.f32 %v4061_v45  ;;  %vm4030_vm0 = vcmp.gt.f32.partialorder %v4014_v7, -1e+29 }
 0x4a9   :  { %v5916_v33 = vpop.eup %5915  ;;  %1828 = vst.msk [vmem:[#allocation4 + $0x58] sm:$0xff] %vm554_vm1, %v1811_v13  ;;  %v3824_v56 = vmax.f32 %v3808_v42, 1e-30  ;;  %v2554_v13 = vld [vmem:[#allocation4 + $0xe8] sm:$0xff]  ;;  %v4047_v42 = vld [vmem:[#allocation4 + $0xc0] sm:$0xff] }
 0x4aa   :  { %v2596_v41 = vpop.xlane.xlu1 %2595  ;;  %v4108_v46 = vsel %vm4028_vm12, %v5916_v33, 0.0  ;;  %v5918_v14 = vpop.eup %5917  ;;  %v4063_v28 = vmax.f32 %v4047_v42, 1e-30 }
 0x4ab   :  { %v2616_v55 = vadd.f32 %v2596_v41, %v2568_v25  ;;  %4162 = vperm.xlu1 %5699, %v4108_v46   ;;  %4157 = vperm.xlu0 %5700, %v4107_v18   ;;  %5925 = vrcp.f32 %v3824_v56  ;;  %v3869_v52 = vsel %vm3789_vm14, %v5918_v14, 0.0  ;;  %v3362_v25 = vmul.f32 %v7972_v57, %v3346_v15  ;;  %v4013_v46 = vld [vmem:[#allocation3 + $0xb0] sm:$0xff] }
 0x4ac   :  { %v8461_v19 = vpop.f32.mrb[92].mxu1  ;;  %v4048_v38 = vld [vmem:[#allocation4 + $0xc8] sm:$0xff]  ;;  %5927 = vrcp.f32 %v3823_v59  ;;  %v2570_v41 = vmul.f32 %v7978_v30, %v2554_v13  ;;  %v3348_v59 = vld [vmem:[#allocation4 + $0x110] sm:$0xff]  ;;  %vm4029_vm2 = vcmp.gt.f32.partialorder %v4013_v46, -1e+29 }
 0x4ad   :  { %v5920_v54 = vpop.eup %5919  ;;  %2632 = vst.msk [vmem:[#allocation4 + $0xd8] sm:$0xff] %vm554_vm1, %v2616_v55  ;;  %v8464_v45 = vpop.f32.mrb[93].mxu1  ;;  %v4064_v49 = vmax.f32 %v4048_v38, 1e-30  ;;  %v1751_v38 = vld [vmem:[#allocation4 + $0x78] sm:$0xff]  ;;  %v3364_v7 = vmul.f32 %v7994_v53, %v3348_v59 }
 0x4ae   :  { %9151 = vst [vmem:[#allocation75_spill] sm:$0xff] %v8464_v45  ;;  %v1795_v12 = vpop.xlane.xlu1 %1794  ;;  %v3870_v17 = vsel %vm3790_vm15, %v5920_v54, 0.0  ;;  %v3776_v54 = vld [vmem:[#allocation3 + $0x48] sm:$0xff]  ;;  %v4494_v45 = vld [vmem:[#allocation9 + $0x38] sm:$0xff] }
 0x4af   :  { %v1813_v33 = vadd.f32 %v1795_v12, %v1765_v32  ;;  %3932 = vperm.xlu0 %5700, %v3870_v17   ;;  %3927 = vperm.xlu1 %5699, %v3869_v52   ;;  %5929 = vrcp.f32 %v4064_v49  ;;  %v3809_v32 = vld [vmem:[#allocation4 + $0x50] sm:$0xff]  ;;  %v1767_v12 = vmul.f32 %v7907_v34, %v1751_v38  ;;  %vm3792_vm3 = vcmp.gt.f32.partialorder %v3776_v54, -1e+29  ;;  %v3350_v17 = vld [vmem:[#allocation4 + $0x120] sm:$0xff] }
 0x4b0   :  { %v3810_v24 = vld [vmem:[#allocation4 + $0x58] sm:$0xff]  ;;  %v3775_v52 = vld [vmem:[#allocation3 + $0x40] sm:$0xff]  ;;  %v3825_v13 = vmax.f32 %v3809_v32, 1e-30  ;;  %v3366_v59 = vmul.f32 %v8019_v62, %v3350_v17 }
 0x4b1   :  { %v5922_v56 = vpop.eup %5921  ;;  %1830 = vst.msk [vmem:[#allocation4 + $0x68] sm:$0xff] %vm554_vm1, %v1813_v33  ;;  %v3379_v3 = vpop.xlane.xlu0 %3378  ;;  %v3826_v18 = vmax.f32 %v3810_v24, 1e-30  ;;  %vm3791_vm4 = vcmp.gt.f32.partialorder %v3775_v52, -1e+29  ;;  %v4015_v17 = vld [vmem:[#allocation3 + $0xc0] sm:$0xff] }
 0x4b2   :  { %v3410_v22 = vadd.f32 %v3379_v3, %v3362_v25  ;;  %v2600_v14 = vpop.xlane.xlu1 %2599  ;;  %v4110_v55 = vsel %vm4030_vm0, %v5922_v56, 0.0  ;;  %v5924_v57 = vpop.eup %5923  ;;  %v2556_v56 = vld [vmem:[#allocation4 + $0xf8] sm:$0xff]  ;;  %vm4031_vm7 = vcmp.gt.f32.partialorder %v4015_v17, -1e+29 }
 0x4b3   :  { %v2618_v15 = vadd.f32 %v2600_v14, %v2570_v41  ;;  %4172 = vperm.xlu0 %5700, %v4110_v55   ;;  %5931 = vrcp.f32 %v3826_v18  ;;  %v4109_v24 = vsel %vm4029_vm2, %v5924_v57, 0.0  ;;  %v2572_v18 = vmul.f32 %v8013_v20, %v2556_v56  ;;  %v3347_v57 = vld [vmem:[#allocation4 + $0x108] sm:$0xff] }
 0x4b4   :  { %3426 = vst.msk [vmem:[#allocation4 + $0x100] sm:$0xff] %vm554_vm1, %v3410_v22  ;;  %5933 = vrcp.f32 %v4063_v28  ;;  %v4050_v3 = vld [vmem:[#allocation4 + $0xd8] sm:$0xff]  ;;  %v3352_v28 = vld [vmem:[#allocation4 + $0x130] sm:$0xff]  ;;  %v4016_v22 = vld [vmem:[#allocation3 + $0xc8] sm:$0xff] }
 0x4b5   :  { %v5926_v30 = vpop.eup %5925  ;;  %2634 = vst.msk [vmem:[#allocation4 + $0xe8] sm:$0xff] %vm554_vm1, %v2618_v15  ;;  %v3383_v49 = vpop.xlane.xlu0 %3382  ;;  %5935 = vrcp.f32 %v3825_v13  ;;  %v4066_v55 = vmax.f32 %v4050_v3, 1e-30  ;;  %v3778_v15 = vld [vmem:[#allocation3 + $0x58] sm:$0xff]  ;;  %v3368_v20 = vmul.f32 %v8051_v0, %v3352_v28  ;;  %vm4032_vm5 = vcmp.gt.f32.partialorder %v4016_v22, -1e+29 }
 0x4b6   :  { %v3412_v42 = vadd.f32 %v3383_v49, %v3364_v7  ;;  %v1799_v33 = vpop.xlane.xlu1 %1798  ;;  %v3872_v25 = vsel %vm3792_vm3, %v5926_v30, 0.0  ;;  %v5928_v41 = vpop.eup %5927  ;;  %v4049_v7 = vld [vmem:[#allocation4 + $0xd0] sm:$0xff]  ;;  %vm3794_vm6 = vcmp.gt.f32.partialorder %v3778_v15, -1e+29  ;;  %v3349_v0 = vld [vmem:[#allocation4 + $0x118] sm:$0xff] }
 0x4b7   :  { %v1815_v53 = vadd.f32 %v1799_v33, %v1767_v12  ;;  %3942 = vperm.xlu1 %5699, %v3872_v25   ;;  %4167 = vperm.xlu0 %5700, %v4109_v24   ;;  %v3871_v32 = vsel %vm3791_vm4, %v5928_v41, 0.0  ;;  %v3354_v12 = vld [vmem:[#allocation4 + $0x140] sm:$0xff]  ;;  %v3363_v33 = vmul.f32 %v7950_v16, %v3347_v57  ;;  %v4065_v25 = vmax.f32 %v4049_v7, 1e-30 }
 0x4b8   :  { %3428 = vst.msk [vmem:[#allocation4 + $0x110] sm:$0xff] %vm554_vm1, %v3412_v42  ;;  %v3812_v34 = vld [vmem:[#allocation4 + $0x68] sm:$0xff]  ;;  %v3811_v24 = vld [vmem:[#allocation4 + $0x60] sm:$0xff]  ;;  %v3370_v16 = vmul.f32 %v8171_v26, %v3354_v12 }
 0x4b9   :  { %1832 = vst.msk [vmem:[#allocation4 + $0x78] sm:$0xff] %vm554_vm1, %v1815_v53  ;;  %v3387_v46 = vpop.xlane.xlu0 %3386  ;;  %v3828_v14 = vmax.f32 %v3812_v34, 1e-30  ;;  %v5930_v30 = vpop.eup %5929  ;;  %v3827_v22 = vmax.f32 %v3811_v24, 1e-30  ;;  %v3353_v24 = vld [vmem:[#allocation4 + $0x138] sm:$0xff] }
 0x4ba   :  { %v3414_v38 = vadd.f32 %v3387_v46, %v3366_v59  ;;  %v2604_v54 = vpop.xlane.xlu1 %2603  ;;  %v4112_v53 = vsel %vm4032_vm5, %v5930_v30, 0.0  ;;  %v4053_v59 = vld [vmem:[#allocation4 + $0xf0] sm:$0xff] }
 0x4bb   :  { %v2620_v62 = vadd.f32 %v2604_v54, %v2572_v18  ;;  %3937 = vperm.xlu0 %5700, %v3871_v32   ;;  %5937 = vrcp.f32 %v3828_v14  ;;  %v3777_v32 = vld [vmem:[#allocation3 + $0x50] sm:$0xff]  ;;  %v4069_v15 = vmax.f32 %v4053_v59, 1e-30 }
 0x4bc   :  { %3430 = vst.msk [vmem:[#allocation4 + $0x120] sm:$0xff] %vm554_vm1, %v3414_v38  ;;  %v8479_v49 = vpop.f32.mrb[94].mxu1  ;;  %5939 = vrcp.f32 %v4066_v55  ;;  %v9154_v38 = vld [vmem:[#allocation100_spill] sm:$0xff]  ;;  %vm3793_vm8 = vcmp.gt.f32.partialorder %v3777_v32, -1e+29 }
 0x4bd   :  { %9152 = vst [vmem:[#allocation58_spill] sm:$0xff] %v8479_v49  ;;  %v5932_v52 = vpop.eup %5931  ;;  %2636 = vst.msk [vmem:[#allocation4 + $0xf8] sm:$0xff] %vm554_vm1, %v2620_v62  ;;  %v8483_v13 = vpop.f32.mrb[95].mxu1  ;;  %v3365_v54 = vmul.f32 %v9154_v38, %v3349_v0  ;;  %5941 = vrcp.f32 %v4065_v25  ;;  %v4052_v26 = vld [vmem:[#allocation4 + $0xe8] sm:$0xff] }
 0x4be   :  { %9153 = vst [vmem:[#allocation15_spill] sm:$0xff] %v8483_v13  ;;  %v3391_v42 = vpop.xlane.xlu0 %3390  ;;  %v3381_v3 = vpop.xlane.xlu1 %3380  ;;  %v3874_v41 = vsel %vm3794_vm6, %v5932_v52, 0.0  ;;  %v3780_v52 = vld [vmem:[#allocation3 + $0x68] sm:$0xff]  ;;  %v4068_v0 = vmax.f32 %v4052_v26, 1e-30  ;;  %v4491_v13 = vld [vmem:[#allocation9 + $0x20] sm:$0xff] }
 0x4bf   :  { %v3416_v56 = vadd.f32 %v3391_v42, %v3368_v20  ;;  %v5934_v34 = vpop.eup %5933  ;;  %v3411_v46 = vadd.f32 %v3381_v3, %v3363_v33  ;;  %3952 = vperm.xlu1 %5699, %v3874_v41   ;;  %4182 = vperm.xlu0 %5700, %v4112_v53   ;;  %v3351_v20 = vld [vmem:[#allocation4 + $0x128] sm:$0xff]  ;;  %v3356_v33 = vld [vmem:[#allocation4 + $0x150] sm:$0xff]  ;;  %v9155_v3 = vld [vmem:[#allocation35_spill] sm:$0xff]  ;;  %vm3796_vm9 = vcmp.gt.f32.partialorder %v3780_v52, -1e+29 }
 0x4c0   :  { %v8487_v18 = vpop.f32.mrb[96].mxu1  ;;  %v3814_v28 = vld [vmem:[#allocation4 + $0x78] sm:$0xff]  ;;  %v4111_v62 = vsel %vm4031_vm7, %v5934_v34, 0.0  ;;  %v5936_v12 = vpop.eup %5935  ;;  %v3367_v41 = vmul.f32 %v9155_v3, %v3351_v20  ;;  %v9156_v26 = vld [vmem:[#allocation60_spill] sm:$0xff] }
 0x4c1   :  { %3432 = vst.msk [vmem:[#allocation4 + $0x130] sm:$0xff] %vm554_vm1, %v3416_v56  ;;  %3427 = vst.msk [vmem:[#allocation4 + $0x108] sm:$0xff] %vm554_vm1, %v3411_v46  ;;  %v8491_v14 = vpop.f32.mrb[97].mxu1  ;;  %v3830_v57 = vmax.f32 %v3814_v28, 1e-30  ;;  %v4018_v53 = vld [vmem:[#allocation3 + $0xd8] sm:$0xff] }
 0x4c2   :  { %v3395_v55 = vpop.xlane.xlu0 %3394  ;;  %v3385_v30 = vpop.xlane.xlu1 %3384  ;;  %v3873_v46 = vsel %vm3793_vm8, %v5936_v12, 0.0  ;;  %v4487_v28 = vld [vmem:[#allocation9] sm:$0xff]  ;;  %vm4034_vm10 = vcmp.gt.f32.partialorder %v4018_v53, -1e+29  ;;  %v3369_v12 = vmul.f32 %v9156_v26, %v3353_v24  ;;  %v4489_v53 = vld [vmem:[#allocation9 + $0x10] sm:$0xff] }
 0x4c3   :  { %v3418_v7 = vadd.f32 %v3395_v55, %v3370_v16  ;;  %v3413_v17 = vadd.f32 %v3385_v30, %v3365_v54  ;;  %4177 = vperm.xlu0 %5700, %v4111_v62   ;;  %5943 = vrcp.f32 %v3830_v57  ;;  %v4051_v16 = vld [vmem:[#allocation4 + $0xe0] sm:$0xff]  ;;  %v4488_v55 = vld [vmem:[#allocation9 + $0x8] sm:$0xff] }
 0x4c4   :  { %v8495_v42 = vpop.f32.mrb[98].mxu1  ;;  %5945 = vrcp.f32 %v3827_v22  ;;  %v4017_v22 = vld [vmem:[#allocation3 + $0xd0] sm:$0xff]  ;;  %v5657_v32 = vpack.c.bf16 %v4488_v55, %v4487_v28  ;;  %v3355_v30 = vld [vmem:[#allocation4 + $0x148] sm:$0xff]  ;;  %v4067_v3 = vmax.f32 %v4051_v16, 1e-30  ;;  %v3358_v16 = vld [vmem:[#allocation4 + $0x160] sm:$0xff] }
 0x4c5   :  { %3434 = vst.msk [vmem:[#allocation4 + $0x140] sm:$0xff] %vm554_vm1, %v3418_v7  ;;  %v5938_v25 = vpop.eup %5937  ;;  %3429 = vst.msk [vmem:[#allocation4 + $0x118] sm:$0xff] %vm554_vm1, %v3413_v17  ;;  %v8498_v56 = vpop.f32.mrb[99].mxu1  ;;  %5947 = vrcp.f32 %v4069_v15  ;;  %v3372_v7 = vmul.f32 %v8178_v5, %v3356_v33  ;;  %v8504_v15 = vld [vmem:[#allocation3 + $0x60] sm:$0xff]  ;;  %v3782_v17 = vld [vmem:[#allocation3 + $0x78] sm:$0xff] }
 0x4c6   :  { %v3389_v59 = vpop.xlane.xlu1 %3388  ;;  %v3876_v34 = vsel %vm3796_vm9, %v5938_v25, 0.0  ;;  %v5940_v38 = vpop.eup %5939  ;;  %5949 = vrcp.f32 %v4068_v0  ;;  %5658 = vmatprep.subr.bf16.mxu1 %v5657_v32  ;;  %vm4033_vm11 = vcmp.gt.f32.partialorder %v4017_v22, -1e+29  ;;  %v3813_v33 = vld [vmem:[#allocation4 + $0x70] sm:$0xff]  ;;  %vm3795_vm12 = vcmp.gt.f32.partialorder %v8504_v15, -1e+29 }
 0x4c7   :  { %v3415_v54 = vadd.f32 %v3389_v59, %v3367_v41  ;;  %3962 = vperm.xlu1 %5699, %v3876_v34   ;;  %3947 = vperm.xlu0 %5700, %v3873_v46   ;;  %v4114_v5 = vsel %vm4034_vm10, %v5940_v38, 0.0  ;;  %v4490_v34 = vld [vmem:[#allocation9 + $0x18] sm:$0xff]  ;;  %v5942_v46 = vpop.eup %5941  ;;  %vm3798_vm13 = vcmp.gt.f32.partialorder %v3782_v17, -1e+29  ;;  %v4021_v38 = vld [vmem:[#allocation3 + $0xf0] sm:$0xff]  ;;  %v4020_v17 = vld [vmem:[#allocation3 + $0xe8] sm:$0xff] }
 0x4c8   :  { %v8501_v57 = vpop.f32.mrb[100].mxu1  ;;  %v4280_v62 = vld [vmem:[#allocation4 + $0x108] sm:$0xff]  ;;  %5660 = vmatpush3.bf16.msra.mxu1 %v5657_v32  ;;  %v5661_v24 = vpack.c.bf16 %v4490_v34, %v4489_v53  ;;  %v3357_v55 = vld [vmem:[#allocation4 + $0x158] sm:$0xff]  ;;  %v4113_v53 = vsel %vm4033_vm11, %v5942_v46, 0.0  ;;  %v4285_v34 = vld [vmem:[#allocation4 + $0x130] sm:$0xff] }
 0x4c9   :  { %3431 = vst.msk [vmem:[#allocation4 + $0x128] sm:$0xff] %vm554_vm1, %v3415_v54  ;;  %v8507_v20 = vpop.f32.mrb[101].mxu1  ;;  %v3399_v52 = vpop.xlane.xlu0 %3398  ;;  %v4296_v25 = vmax.f32 %v4280_v62, 1e-30  ;;  %v9157_v62 = vld [vmem:[#allocation21_spill] sm:$0xff]  ;;  %v3361_v15 = vld [vmem:[#allocation4 + $0x178] sm:$0xff] }
 0x4ca   :  { %v3420_v41 = vadd.f32 %v3399_v52, %v3372_v7  ;;  %v3393_v59 = vpop.xlane.xlu1 %3392  ;;  %v3371_v52 = vmul.f32 %v9157_v62, %v3355_v30  ;;  %5662 = vmatprep.subr.bf16.mxu1 %v5661_v24  ;;  %vm4037_vm14 = vcmp.gt.f32.partialorder %v4021_v38, -1e+29  ;;  %v5665_v30 = vpack.c.bf16 %v4492_v27, %v4491_v13  ;;  %v3359_v62 = vld [vmem:[#allocation4 + $0x168] sm:$0xff]  ;;  %v4281_v27 = vld [vmem:[#allocation4 + $0x110] sm:$0xff] }
 0x4cb   :  { %v3417_v28 = vadd.f32 %v3393_v59, %v3369_v12  ;;  %4192 = vperm.xlu0 %5700, %v4114_v5   ;;  %5951 = vrcp.f32 %v4296_v25  ;;  %v3829_v12 = vmax.f32 %v3813_v33, 1e-30  ;;  %v4279_v25 = vld [vmem:[#allocation4 + $0x100] sm:$0xff]  ;;  %v9158_v33 = vld [vmem:[#allocation45_spill] sm:$0xff]  ;;  %vm4036_vm15 = vcmp.gt.f32.partialorder %v4020_v17, -1e+29 }
 0x4cc   :  { %3436 = vst.msk [vmem:[#allocation4 + $0x150] sm:$0xff] %vm554_vm1, %v3420_v41  ;;  %v8512_v0 = vpop.f32.mrb[102].mxu1  ;;  %v4282_v54 = vld [vmem:[#allocation4 + $0x118] sm:$0xff]  ;;  %5953 = vrcp.f32 %v4067_v3  ;;  %5664 = vmatpush3.bf16.msra.mxu1 %v5661_v24  ;;  %v4295_v46 = vmax.f32 %v4279_v25, 1e-30  ;;  %v4287_v25 = vld [vmem:[#allocation4 + $0x140] sm:$0xff] }
 0x4cd   :  { %v5944_v7 = vpop.eup %5943  ;;  %3433 = vst.msk [vmem:[#allocation4 + $0x138] sm:$0xff] %vm554_vm1, %v3417_v28  ;;  %v8515_v32 = vpop.f32.mrb[103].mxu1  ;;  %v4298_v26 = vmax.f32 %v4282_v54, 1e-30  ;;  %v3374_v54 = vmul.f32 %v9158_v33, %v3358_v16  ;;  %5666 = vmatprep.subr.bf16.mxu1 %v5665_v30  ;;  %v4297_v38 = vmax.f32 %v4281_v27, 1e-30 }
 0x4ce   :  { %v5946_v41 = vpop.eup %5945  ;;  %v3397_v59 = vpop.xlane.xlu1 %3396  ;;  %v3878_v5 = vsel %vm3798_vm13, %v5944_v7, 0.0  ;;  %v4248_v7 = vld [vmem:[#allocation3 + $0x108] sm:$0xff]  ;;  %v4495_v27 = vld [vmem:[#allocation9 + $0x40] sm:$0xff] }
 0x4cf   :  { %v5948_v28 = vpop.eup %5947  ;;  %v3419_v47 = vadd.f32 %v3397_v59, %v3371_v52  ;;  %3972 = vperm.xlu1 %5699, %v3878_v5   ;;  %4187 = vperm.xlu0 %5700, %v4113_v53   ;;  %5955 = vrcp.f32 %v4298_v26  ;;  %v9159_v52 = vld [vmem:[#allocation53_spill] sm:$0xff]  ;;  %v4301_v26 = vmax.f32 %v4285_v34, 1e-30  ;;  %v3875_v16 = vsel %vm3795_vm12, %v5946_v41, 0.0 }
 0x4d0   :  { %v8520_v3 = vpop.f32.mrb[104].mxu1  ;;  %v4284_v22 = vld [vmem:[#allocation4 + $0x128] sm:$0xff]  ;;  %v3373_v59 = vmul.f32 %v9159_v52, %v3357_v55  ;;  %5957 = vrcp.f32 %v3829_v12  ;;  %v4117_v33 = vsel %vm4037_vm14, %v5948_v28, 0.0  ;;  %5668 = vmatpush3.bf16.msra.mxu1 %v5665_v30  ;;  %v5950_v11 = vpop.eup %5949  ;;  %v3360_v55 = vld [vmem:[#allocation4 + $0x170] sm:$0xff]  ;;  %vm4264_vm0 = vcmp.gt.f32.partialorder %v4248_v7, -1e+29 }
 0x4d1   :  { %3435 = vst.msk [vmem:[#allocation4 + $0x148] sm:$0xff] %vm554_vm1, %v3419_v47  ;;  %v8524_v24 = vpop.f32.mrb[105].mxu1  ;;  %v3403_v31 = vpop.xlane.xlu0 %3402  ;;  %v4300_v5 = vmax.f32 %v4284_v22, 1e-30  ;;  %v4493_v47 = vld [vmem:[#allocation9 + $0x30] sm:$0xff]  ;;  %v4250_v22 = vld [vmem:[#allocation3 + $0x118] sm:$0xff] }
 0x4d2   :  { %v3422_v13 = vadd.f32 %v3403_v31, %v3374_v54  ;;  %v3401_v53 = vpop.xlane.xlu1 %3400  ;;  %v5669_v12 = vpack.c.bf16 %v4494_v45, %v4493_v47  ;;  %v9160_v28 = vld [vmem:[#allocation29_spill] sm:$0xff]  ;;  %v4019_v54 = vld [vmem:[#allocation3 + $0xe0] sm:$0xff]  ;;  %v4303_v52 = vmax.f32 %v4287_v25, 1e-30  ;;  %vm4266_vm3 = vcmp.gt.f32.partialorder %v4250_v22, -1e+29 }
 0x4d3   :  { %v3421_v49 = vadd.f32 %v3401_v53, %v3373_v59  ;;  %3957 = vperm.xlu0 %5700, %v3875_v16   ;;  %4207 = vperm.xlu1 %5699, %v4117_v33   ;;  %5959 = vrcp.f32 %v4300_v5  ;;  %v3375_v30 = vmul.f32 %v9160_v28, %v3359_v62  ;;  %v4283_v45 = vld [vmem:[#allocation4 + $0x120] sm:$0xff]  ;;  %v4116_v5 = vsel %vm4036_vm15, %v5950_v11, 0.0  ;;  %v4496_v53 = vld [vmem:[#allocation9 + $0x48] sm:$0xff]  ;;  %v3781_v47 = vld [vmem:[#allocation3 + $0x70] sm:$0xff] }
 0x4d4   :  { %3438 = vst.msk [vmem:[#allocation4 + $0x160] sm:$0xff] %vm554_vm1, %v3422_v13  ;;  %v8531_v31 = vpop.f32.mrb[106].mxu1  ;;  %5961 = vrcp.f32 %v4295_v46  ;;  %5670 = vmatprep.subr.bf16.mxu1 %v5669_v12  ;;  %v4289_v46 = vld [vmem:[#allocation4 + $0x150] sm:$0xff]  ;;  %v5673_v62 = vpack.c.bf16 %v4496_v53, %v4495_v27  ;;  %vm4035_vm2 = vcmp.gt.f32.partialorder %v4019_v54, -1e+29  ;;  %v4498_v53 = vld [vmem:[#allocation9 + $0x58] sm:$0xff] }
 0x4d5   :  { %v5952_v41 = vpop.eup %5951  ;;  %3437 = vst.msk [vmem:[#allocation4 + $0x158] sm:$0xff] %vm554_vm1, %v3421_v49  ;;  %v8534_v34 = vpop.f32.mrb[107].mxu1  ;;  %5963 = vrcp.f32 %v4301_v26  ;;  %5672 = vmatpush3.bf16.msra.mxu1 %v5669_v12  ;;  %v9161_v26 = vld [vmem:[#allocation105_spill] sm:$0xff]  ;;  %v4299_v17 = vmax.f32 %v4283_v45, 1e-30 }
 0x4d6   :  { %v3405_v59 = vpop.xlane.xlu1 %3404  ;;  %v4344_v13 = vsel %vm4264_vm0, %v5952_v41, 0.0  ;;  %v5954_v49 = vpop.eup %5953  ;;  %v3376_v25 = vmul.f32 %v9161_v26, %v3360_v55  ;;  %5965 = vrcp.f32 %v4297_v38  ;;  %v9163_v41 = vld [vmem:[#allocation57_spill] sm:$0xff]  ;;  %5674 = vmatprep.subr.bf16.mxu1 %v5673_v62  ;;  %v4252_v38 = vld [vmem:[#allocation3 + $0x128] sm:$0xff]  ;;  %vm3797_vm4 = vcmp.gt.f32.partialorder %v3781_v47, -1e+29 }
 0x4d7   :  { %v3423_v16 = vadd.f32 %v3405_v59, %v3375_v30  ;;  %4202 = vperm.xlu0 %5700, %v4116_v5   ;;  %4382 = vperm.xlu1 %5699, %v4344_v13   ;;  %v3377_v28 = vmul.f32 %v9163_v41, %v3361_v15  ;;  %5967 = vrcp.f32 %v4303_v52  ;;  %v4305_v30 = vmax.f32 %v4289_v46, 1e-30  ;;  %v4054_v59 = vld [vmem:[#allocation4 + $0xf8] sm:$0xff]  ;;  %v4497_v45 = vld [vmem:[#allocation9 + $0x50] sm:$0xff]  ;;  %v4247_v52 = vld [vmem:[#allocation3 + $0x100] sm:$0xff] }
 0x4d8   :  { %v8539_v33 = vpop.f32.mrb[108].mxu1  ;;  %v4115_v55 = vsel %vm4035_vm2, %v5954_v49, 0.0  ;;  %v5677_v15 = vpack.c.bf16 %v4498_v53, %v4497_v45  ;;  %5969 = vrcp.f32 %v4299_v17  ;;  %v4070_v54 = vmax.f32 %v4054_v59, 1e-30  ;;  %v4500_v47 = vld [vmem:[#allocation9 + $0x68] sm:$0xff]  ;;  %v4249_v59 = vld [vmem:[#allocation3 + $0x110] sm:$0xff] }
 0x4d9   :  { %v5956_v11 = vpop.eup %5955  ;;  %3439 = vst.msk [vmem:[#allocation4 + $0x168] sm:$0xff] %vm554_vm1, %v3423_v16  ;;  %v8543_v7 = vpop.f32.mrb[109].mxu1  ;;  %5676 = vmatpush3.bf16.msra.mxu1 %v5673_v62  ;;  %vm4268_vm5 = vcmp.gt.f32.partialorder %v4252_v38, -1e+29  ;;  %v4253_v62 = vld [vmem:[#allocation3 + $0x130] sm:$0xff]  ;;  %5971 = vrcp.f32 %v4305_v30  ;;  %v4288_v45 = vld [vmem:[#allocation4 + $0x148] sm:$0xff] }
 0x4da   :  { %9162 = vst [vmem:[#allocation42_spill] sm:$0xff] %v8543_v7  ;;  %v3407_v12 = vpop.xlane.xlu0 %3406  ;;  %v3409_v13 = vpop.xlane.xlu1 %3408  ;;  %v4346_v27 = vsel %vm4266_vm3, %v5956_v11, 0.0  ;;  %5678 = vmatprep.subr.bf16.mxu1 %v5677_v15  ;;  %vm4263_vm6 = vcmp.gt.f32.partialorder %v4247_v52, -1e+29  ;;  %5973 = vrcp.f32 %v4070_v54  ;;  %v4501_v53 = vld [vmem:[#allocation9 + $0x70] sm:$0xff] }
 0x4db   :  { %v3424_v5 = vadd.f32 %v3407_v12, %v3376_v25  ;;  %v5958_v16 = vpop.eup %5957  ;;  %v3425_v26 = vadd.f32 %v3409_v13, %v3377_v28  ;;  %4197 = vperm.xlu0 %5700, %v4115_v55   ;;  %4392 = vperm.xlu1 %5699, %v4346_v27   ;;  %v4291_v7 = vld [vmem:[#allocation4 + $0x160] sm:$0xff]  ;;  %v4286_v28 = vld [vmem:[#allocation4 + $0x138] sm:$0xff]  ;;  %vm4265_vm7 = vcmp.gt.f32.partialorder %v4249_v59, -1e+29  ;;  %v4304_v54 = vmax.f32 %v4288_v45, 1e-30 }
 0x4dc   :  { %v8548_v22 = vpop.f32.mrb[110].mxu1  ;;  %v4307_v25 = vmax.f32 %v4291_v7, 1e-30  ;;  %v3877_v12 = vsel %vm3797_vm4, %v5958_v16, 0.0  ;;  %v4255_v55 = vld [vmem:[#allocation3 + $0x140] sm:$0xff]  ;;  %v4502_v16 = vld [vmem:[#allocation9 + $0x78] sm:$0xff] }
 0x4dd   :  { %3440 = vst.msk [vmem:[#allocation4 + $0x170] sm:$0xff] %vm554_vm1, %v3424_v5  ;;  %9164 = vst [vmem:[#allocation59_spill] sm:$0xff] %v8548_v22  ;;  %v5960_v46 = vpop.eup %5959  ;;  %v8551_v49 = vpop.f32.mrb[111].mxu1  ;;  %5680 = vmatpush3.bf16.msra.mxu1 %v5677_v15  ;;  %v4499_v5 = vld [vmem:[#allocation9 + $0x60] sm:$0xff]  ;;  %v4302_v30 = vmax.f32 %v4286_v28, 1e-30 }
 0x4de   :  { %3441 = vst.msk [vmem:[#allocation4 + $0x178] sm:$0xff] %vm554_vm1, %v3425_v26  ;;  %v5962_v11 = vpop.eup %5961  ;;  %v4348_v41 = vsel %vm4268_vm5, %v5960_v46, 0.0  ;;  %v5681_v17 = vpack.c.bf16 %v4500_v47, %v4499_v5  ;;  %vm4269_vm1 = vcmp.gt.f32.partialorder %v4253_v62, -1e+29  ;;  %5975 = vrcp.f32 %v4307_v25  ;;  %v4290_v28 = vld [vmem:[#allocation4 + $0x158] sm:$0xff]  ;;  %v9165_v47 = vld [vmem:[#allocation27_spill] sm:$0xff] }
 0x4df   :  { %v5964_v13 = vpop.eup %5963  ;;  %3967 = vperm.xlu0 %5700, %v3877_v12   ;;  %4402 = vperm.xlu1 %5699, %v4348_v41   ;;  %v4343_v27 = vsel %vm4263_vm6, %v5962_v11, 0.0  ;;  %v5685_v46 = vpack.c.bf16 %v4502_v16, %v4501_v53  ;;  %vm4271_vm8 = vcmp.gt.f32.partialorder %v4255_v55, -1e+29  ;;  %5977 = vrcp.f32 %v4302_v30  ;;  %v4251_v11 = vld [vmem:[#allocation3 + $0x120] sm:$0xff]  ;;  %v4257_v41 = vld [vmem:[#allocation3 + $0x150] sm:$0xff]  ;;  %v9177_v22 = vld [vmem:[#allocation50_spill] sm:$0xff] }
 0x4e0   :  { %5682 = vmatprep.subr.bf16.mxu1 %v5681_v17  ;;  %v5966_v7 = vpop.eup %5965  ;;  %v4349_v38 = vsel %vm4269_vm1, %v5964_v13, 0.0  ;;  %v1930_v13 = vmul.f32 0.0, %v9165_v47  ;;  %vm4267_vm9 = vcmp.gt.f32.partialorder %v4251_v11, -1e+29  ;;  %vm4273_vm10 = vcmp.gt.f32.partialorder %v4257_v41, -1e+29 }
 0x4e1   :  { %5684 = vmatpush3.bf16.msra.mxu1 %v5681_v17  ;;  %v5968_v26 = vpop.eup %5967  ;;  %v4345_v25 = vsel %vm4265_vm7, %v5966_v7, 0.0  ;;  %v4022_v17 = vld [vmem:[#allocation3 + $0xf8] sm:$0xff]  ;;  %v4306_v59 = vmax.f32 %v4290_v28, 1e-30  ;;  %v4292_v45 = vld [vmem:[#allocation4 + $0x168] sm:$0xff] }
 0x4e2   :  { %5686 = vmatprep.subr.bf16.mxu1 %v5685_v46  ;;  %v5970_v62 = vpop.eup %5969  ;;  %v4351_v12 = vsel %vm4271_vm8, %v5968_v26, 0.0  ;;  %v2091_v30 = vadd.f32 %v8379_v48, %v1930_v13  ;;  %vm4038_vm11 = vcmp.gt.f32.partialorder %v4022_v17, -1e+29  ;;  %v4254_v48 = vld [vmem:[#allocation3 + $0x138] sm:$0xff]  ;;  %v4256_v13 = vld [vmem:[#allocation3 + $0x148] sm:$0xff] }
 0x4e3   :  { %4377 = vperm.xlu0 %5700, %v4343_v27   ;;  %4407 = vperm.xlu1 %5699, %v4349_v38   ;;  %v5972_v5 = vpop.eup %5971  ;;  %v4347_v7 = vsel %vm4267_vm9, %v5970_v62, 0.0  ;;  %v4259_v38 = vld [vmem:[#allocation3 + $0x160] sm:$0xff]  ;;  %vm4270_vm14 = vcmp.gt.f32.partialorder %v4254_v48, -1e+29  ;;  %vm4272_vm15 = vcmp.gt.f32.partialorder %v4256_v13, -1e+29 }
 0x4e4   :  { %v4293_v15 = vld [vmem:[#allocation4 + $0x170] sm:$0xff]  ;;  %v5974_v55 = vpop.eup %5973  ;;  %v4353_v27 = vsel %vm4273_vm10, %v5972_v5, 0.0  ;;  %vm4275_vm12 = vcmp.gt.f32.partialorder %v4259_v38, -1e+29  ;;  %v3549_v13 = vmul.f32 0.0, %v8397_v10 }
 0x4e5   :  { %v4309_v52 = vmax.f32 %v4293_v15, 1e-30  ;;  %5688 = vmatpush3.bf16.msra.mxu1 %v5685_v46  ;;  %v4261_v15 = vld [vmem:[#allocation3 + $0x170] sm:$0xff]  ;;  %v4308_v46 = vmax.f32 %v4292_v45, 1e-30  ;;  %v4294_v62 = vld [vmem:[#allocation4 + $0x178] sm:$0xff] }
 0x4e6   :  { %vm4277_vm13 = vcmp.gt.f32.partialorder %v4261_v15, -1e+29  ;;  %v4310_v5 = vmax.f32 %v4294_v62, 1e-30  ;;  %v4260_v45 = vld [vmem:[#allocation3 + $0x168] sm:$0xff] }
 0x4e7   :  { %5979 = vrcp.f32 %v4309_v52  ;;  %4387 = vperm.xlu0 %5700, %v4345_v25   ;;  %4417 = vperm.xlu1 %5699, %v4351_v12   ;;  %v9166_v52 = vld [vmem:[#allocation18_spill] sm:$0xff]  ;;  %v4118_v25 = vsel %vm4038_vm11, %v5974_v55, 0.0  ;;  %vm4276_vm2 = vcmp.gt.f32.partialorder %v4260_v45, -1e+29 }
 0x4e8   :  { %5981 = vrcp.f32 %v4304_v54  ;;  %v5976_v53 = vpop.eup %5975  ;;  %v4258_v55 = vld [vmem:[#allocation3 + $0x158] sm:$0xff] }
 0x4e9   :  { %5983 = vrcp.f32 %v4306_v59  ;;  %v4355_v12 = vsel %vm4275_vm12, %v5976_v53, 0.0  ;;  %v5978_v11 = vpop.eup %5977  ;;  %vm4274_vm0 = vcmp.gt.f32.partialorder %v4258_v55, -1e+29 }
 0x4ea   :  { %5985 = vrcp.f32 %v4308_v46  ;;  %v4350_v47 = vsel %vm4270_vm14, %v5978_v11, 0.0  ;;  %v4262_v46 = vld [vmem:[#allocation3 + $0x178] sm:$0xff] }
 0x4eb   :  { %v3903_v16 = vpop.permute.xlu1 %3902  ;;  %4397 = vperm.xlu0 %5700, %v4347_v7   ;;  %4427 = vperm.xlu1 %5699, %v4353_v27   ;;  %5987 = vrcp.f32 %v4310_v5  ;;  %vm4278_vm3 = vcmp.gt.f32.partialorder %v4262_v46, -1e+29 }
 0x4ec   :  { %v3976_v26 = vmul.f32 %v3903_v16, %v2091_v30 }
 0x4ee   :  { %v8556_v54 = vadd.f32 %v3976_v26, %v9166_v52 }
 0x4ef   :  { %4212 = vperm.xlu0 %5700, %v4118_v25   ;;  %4437 = vperm.xlu1 %5699, %v4355_v12  }
 0x4f1   :  { %v5980_v41 = vpop.eup %5979 }
 0x4f2   :  { %v4357_v28 = vsel %vm4277_vm13, %v5980_v41, 0.0  ;;  %v5982_v17 = vpop.eup %5981  ;;  %v3547_v41 = vmul.f32 0.0, %v8389_v60  ;;  %v9172_v60 = vld [vmem:[#allocation37_spill] sm:$0xff] }
 0x4f3   :  { %4412 = vperm.xlu0 %5700, %v4350_v47   ;;  %4447 = vperm.xlu1 %5699, %v4357_v28   ;;  %v4352_v59 = vsel %vm4272_vm15, %v5982_v17, 0.0  ;;  %v5984_v30 = vpop.eup %5983 }
 0x4f4   :  { %v4354_v38 = vsel %vm4274_vm0, %v5984_v30, 0.0  ;;  %v5986_v53 = vpop.eup %5985  ;;  %v9170_v30 = vld [vmem:[#allocation51_spill] sm:$0xff] }
 0x4f5   :  { %v4356_v15 = vsel %vm4276_vm2, %v5986_v53, 0.0  ;;  %v5988_v52 = vpop.eup %5987 }
 0x4f6   :  { %v4358_v48 = vsel %vm4278_vm3, %v5988_v52, 0.0  ;;  %v2735_v52 = vmul.f32 0.0, %v9172_v60  ;;  %v1931_v60 = vmul.f32 0.0, %v9177_v22  ;;  %v3553_v22 = vmul.f32 0.0, %v8411_v44 }
 0x4f7   :  { %4422 = vperm.xlu0 %5700, %v4352_v59  }
 0x4f8   :  { %v8558_v7 = vpop.f32.mrb[112].mxu1  ;;  %v2896_v10 = vadd.f32 %v8487_v18, %v2735_v52  ;;  %v9178_v52 = vld [vmem:[#allocation41_spill] sm:$0xff] }
 0x4f9   :  { %v8560_v27 = vpop.f32.mrb[113].mxu1 }
 0x4fb   :  { %4432 = vperm.xlu0 %5700, %v4354_v38   ;;  %v1929_v38 = vmul.f32 0.0, %v9170_v30 }
 0x4fc   :  { %v8562_v16 = vpop.f32.mrb[114].mxu1 }
 0x4fd   :  { %v8564_v26 = vpop.f32.mrb[115].mxu1  ;;  %v2090_v45 = vadd.f32 %v8381_v9, %v1929_v38 }
 0x4ff   :  { %4442 = vperm.xlu0 %5700, %v4356_v15   ;;  %v9171_v15 = vld [vmem:[#allocation55_spill] sm:$0xff] }
 0x500   :  { %v8566_v25 = vpop.f32.mrb[116].mxu1  ;;  %v2734_v46 = vmul.f32 0.0, %v9171_v15 }
 0x501   :  { %v8568_v12 = vpop.f32.mrb[117].mxu1 }
 0x503   :  { %4452 = vperm.xlu0 %5700, %v4358_v48  }
 0x504   :  { %v8570_v62 = vpop.f32.mrb[118].mxu1 }
 0x505   :  { %9167 = vst [vmem:[#allocation61_spill] sm:$0xff] %v8570_v62  ;;  %v8572_v11 = vpop.f32.mrb[119].mxu1  ;;  %v9176_v62 = vld [vmem:[#allocation47_spill] sm:$0xff] }
 0x506   :  { %v1932_v15 = vmul.f32 0.0, %v9176_v62 }
 0x508   :  { %v8575_v28 = vpop.f32.mrb[120].mxu1 }
 0x509   :  { %9168 = vst [vmem:[#allocation76_spill] sm:$0xff] %v8575_v28  ;;  %v3661_v5 = vpop.f32.mrb[121].mxu1 }
 0x50a   :  { %v8577_v47 = vadd.f32 %v3661_v5, %v3547_v41  ;;  %v3551_v41 = vmul.f32 0.0, %v8403_v21  ;;  %v2093_v21 = vadd.f32 %v8391_v35, %v1932_v15 }
 0x510   :  { %v8580_v17 = vpop.f32.mrb[122].mxu1 }
 0x511   :  { %9169 = vst [vmem:[#allocation77_spill] sm:$0xff] %v8580_v17  ;;  %v3671_v59 = vpop.f32.mrb[123].mxu1  ;;  %v2895_v17 = vadd.f32 %v8491_v14, %v2734_v46 }
 0x512   :  { %v8582_v55 = vadd.f32 %v3671_v59, %v3549_v13  ;;  %v9174_v13 = vld [vmem:[#allocation16_spill] sm:$0xff] }
 0x516   :  { %v3898_v53 = vpop.permute.xlu1 %3897 }
 0x517   :  { %v3975_v48 = vmul.f32 %v3898_v53, %v2090_v45 }
 0x518   :  { %v8589_v5 = vpop.f32.mrb[124].mxu1 }
 0x519   :  { %9173 = vst [vmem:[#allocation78_spill] sm:$0xff] %v8589_v5  ;;  %v3991_v59 = vadd.f32 %v3975_v48, %v9174_v13  ;;  %v3681_v28 = vpop.f32.mrb[125].mxu1  ;;  %v2092_v5 = vadd.f32 %v8393_v43, %v1931_v60  ;;  %v2737_v48 = vmul.f32 0.0, %v9178_v52 }
 0x51a   :  { %v8594_v30 = vadd.f32 %v3681_v28, %v3551_v41  ;;  %v4143_v9 = vpop.permute.xlu1 %4142  ;;  %v4138_v38 = vpop.permute.xlu0 %4137  ;;  %v9179_v41 = vld [vmem:[#allocation52_spill] sm:$0xff] }
 0x51b   :  { %v4216_v45 = vmul.f32 %v4143_v9, %v2896_v10  ;;  %v4215_v53 = vmul.f32 %v4138_v38, %v2895_v17  ;;  %v2736_v13 = vmul.f32 0.0, %v9179_v41  ;;  %v2898_v35 = vadd.f32 %v8495_v42, %v2737_v48 }
 0x51c   :  { %9175 = vst [vmem:[#allocation79_spill] sm:$0xff] %v8594_v30 }
 0x51d   :  { %v8601_v18 = vadd.f32 %v4216_v45, %v8556_v54  ;;  %v8603_v14 = vadd.f32 %v4215_v53, %v3991_v59  ;;  %v2897_v43 = vadd.f32 %v8498_v56, %v2736_v13  ;;  %v9180_v54 = vld [vmem:[#allocation20_spill] sm:$0xff]  ;;  %v9181_v59 = vld [vmem:[#allocation22_spill] sm:$0xff]  ;;  %v9182_v53 = vld [vmem:[#allocation101_spill] sm:$0xff] }
 0x51e   :  { %v3908_v46 = vpop.permute.xlu1 %3907  ;;  %v3913_v28 = vpop.permute.xlu0 %3912  ;;  %v9184_v13 = vld [vmem:[#allocation104_spill] sm:$0xff] }
 0x51f   :  { %v3977_v62 = vmul.f32 %v3908_v46, %v2092_v5  ;;  %v3978_v30 = vmul.f32 %v3913_v28, %v2093_v21  ;;  %v1934_v5 = vmul.f32 0.0, %v9182_v53  ;;  %v9183_v21 = vld [vmem:[#allocation48_spill] sm:$0xff] }
 0x520   :  { %v8608_v17 = vpop.f32.mrb[126].mxu1  ;;  %v1933_v46 = vmul.f32 0.0, %v9183_v21  ;;  %v9189_v21 = vld [vmem:[#allocation19_spill] sm:$0xff] }
 0x521   :  { %v3993_v10 = vadd.f32 %v3977_v62, %v9180_v54  ;;  %v3994_v9 = vadd.f32 %v3978_v30, %v9181_v59  ;;  %v3691_v38 = vpop.f32.mrb[127].mxu1  ;;  %v2095_v52 = vadd.f32 %v8405_v39, %v1934_v5  ;;  %v2739_v62 = vmul.f32 0.0, %v9184_v13 }
 0x522   :  { %v8614_v15 = vadd.f32 %v3691_v38, %v3553_v22  ;;  %v4153_v60 = vpop.permute.xlu1 %4152  ;;  %v4148_v45 = vpop.permute.xlu0 %4147  ;;  %v2094_v42 = vadd.f32 %v8407_v29, %v1933_v46  ;;  %v9185_v22 = vld [vmem:[#allocation108_spill] sm:$0xff]  ;;  %v1935_v46 = vmul.f32 0.0, %v9189_v21 }
 0x523   :  { %v4218_v44 = vmul.f32 %v4153_v60, %v2898_v35  ;;  %v4217_v28 = vmul.f32 %v4148_v45, %v2897_v43  ;;  %v2738_v54 = vmul.f32 0.0, %v9185_v22  ;;  %v2900_v53 = vadd.f32 %v8501_v57, %v2739_v62  ;;  %v9186_v43 = vld [vmem:[#allocation24_spill] sm:$0xff]  ;;  %v9187_v60 = vld [vmem:[#allocation26_spill] sm:$0xff] }
 0x525   :  { %v8620_v56 = vadd.f32 %v4218_v44, %v3994_v9  ;;  %v8622_v48 = vadd.f32 %v4217_v28, %v3993_v10  ;;  %v2899_v35 = vadd.f32 %v8507_v20, %v2738_v54  ;;  %v9188_v10 = vld [vmem:[#allocation109_spill] sm:$0xff] }
 0x526   :  { %v3918_v30 = vpop.permute.xlu1 %3917  ;;  %v3923_v41 = vpop.permute.xlu0 %3922  ;;  %v1936_v5 = vmul.f32 0.0, %v9188_v10 }
 0x527   :  { %v3979_v59 = vmul.f32 %v3918_v30, %v2094_v42  ;;  %v3980_v38 = vmul.f32 %v3923_v41, %v2095_v52  ;;  %v2096_v52 = vadd.f32 %v8421_v4, %v1935_v46  ;;  %v9190_v41 = vld [vmem:[#allocation65_spill] sm:$0xff]  ;;  %v9194_v4 = vld [vmem:[#allocation23_spill] sm:$0xff] }
 0x528   :  { %v2097_v13 = vadd.f32 %v8418_v8, %v1936_v5  ;;  %v2741_v62 = vmul.f32 0.0, %v9190_v41  ;;  %v9193_v8 = vld [vmem:[#allocation64_spill] sm:$0xff] }
 0x529   :  { %v3995_v39 = vadd.f32 %v3979_v59, %v9186_v43  ;;  %v3996_v29 = vadd.f32 %v3980_v38, %v9187_v60  ;;  %v9191_v38 = vld [vmem:[#allocation28_spill] sm:$0xff] }
 0x52a   :  { %v4163_v9 = vpop.permute.xlu1 %4162  ;;  %v4158_v45 = vpop.permute.xlu0 %4157  ;;  %v2902_v59 = vadd.f32 %v8512_v0, %v2741_v62  ;;  %v1937_v0 = vmul.f32 0.0, %v8250_v61  ;;  %v9196_v62 = vld [vmem:[#allocation69_spill] sm:$0xff] }
 0x52b   :  { %v4220_v44 = vmul.f32 %v4163_v9, %v2900_v53  ;;  %v4219_v28 = vmul.f32 %v4158_v45, %v2899_v35  ;;  %v9192_v53 = vld [vmem:[#allocation30_spill] sm:$0xff]  ;;  %v1938_v9 = vmul.f32 0.0, %v9193_v8 }
 0x52d   :  { %v8634_v42 = vadd.f32 %v4220_v44, %v3996_v29  ;;  %v8636_v57 = vadd.f32 %v4219_v28, %v3995_v39  ;;  %v2740_v29 = vmul.f32 0.0, %v9194_v4  ;;  %v2099_v39 = vadd.f32 %v8438_v6, %v1938_v9  ;;  %v9198_v9 = vld [vmem:[#allocation38_spill] sm:$0xff] }
 0x52e   :  { %v3928_v20 = vpop.permute.xlu1 %3927  ;;  %v3933_v30 = vpop.permute.xlu0 %3932  ;;  %v2743_v6 = vmul.f32 0.0, %v8260_v51 }
 0x52f   :  { %v3981_v22 = vmul.f32 %v3928_v20, %v2096_v52  ;;  %v3982_v54 = vmul.f32 %v3933_v30, %v2097_v13  ;;  %v2901_v10 = vadd.f32 %v8515_v32, %v2740_v29  ;;  %v2098_v13 = vadd.f32 %v8441_v40, %v1937_v0  ;;  %v9195_v52 = vld [vmem:[#allocation34_spill] sm:$0xff] }
 0x530   :  { %v2742_v40 = vmul.f32 0.0, %v8268_v63 }
 0x531   :  { %v3997_v43 = vadd.f32 %v3981_v22, %v9191_v38  ;;  %v3998_v35 = vadd.f32 %v3982_v54, %v9192_v53  ;;  %v1940_v22 = vmul.f32 0.0, %v9196_v62  ;;  %v9197_v38 = vld [vmem:[#allocation32_spill] sm:$0xff]  ;;  %v9201_v62 = vld [vmem:[#allocation58_spill] sm:$0xff] }
 0x532   :  { %v4173_v60 = vpop.permute.xlu0 %4172 }
 0x533   :  { %v4222_v45 = vmul.f32 %v4173_v60, %v2902_v59  ;;  %v2101_v54 = vadd.f32 %v8449_v2, %v1940_v22  ;;  %v2904_v59 = vadd.f32 %v8520_v3, %v2743_v6  ;;  %v1939_v2 = vmul.f32 0.0, %v8280_v58 }
 0x535   :  { %v8646_v5 = vadd.f32 %v4222_v45, %v3998_v35  ;;  %v1942_v45 = vmul.f32 0.0, %v8248_v36  ;;  %v9200_v36 = vld [vmem:[#allocation36_spill] sm:$0xff] }
 0x536   :  { %v3943_v21 = vpop.permute.xlu1 %3942  ;;  %v4168_v46 = vpop.permute.xlu0 %4167 }
 0x537   :  { %v3984_v44 = vmul.f32 %v3943_v21, %v2099_v39  ;;  %v4221_v28 = vmul.f32 %v4168_v46, %v2901_v10  ;;  %v2100_v39 = vadd.f32 %v8452_v1, %v1939_v2  ;;  %v2103_v10 = vadd.f32 %v8461_v19, %v1942_v45 }
 0x538   :  { %v2744_v1 = vmul.f32 0.0, %v8297_v23 }
 0x539   :  { %v4000_v20 = vadd.f32 %v3984_v44, %v9195_v52  ;;  %v8651_v30 = vadd.f32 %v4221_v28, %v3997_v43  ;;  %v2903_v43 = vadd.f32 %v8524_v24, %v2742_v40  ;;  %v2745_v24 = vmul.f32 0.0, %v8288_v37  ;;  %v9204_v40 = vld [vmem:[#allocation49_spill] sm:$0xff] }
 0x53a   :  { %v3938_v41 = vpop.permute.xlu0 %3937  ;;  %v2905_v6 = vadd.f32 %v8534_v34, %v2744_v1  ;;  %v9206_v34 = vld [vmem:[#allocation68_spill] sm:$0xff] }
 0x53b   :  { %v3983_v32 = vmul.f32 %v3938_v41, %v2098_v13  ;;  %v2906_v28 = vadd.f32 %v8531_v31, %v2745_v24  ;;  %v9199_v13 = vld [vmem:[#allocation44_spill] sm:$0xff]  ;;  %v1944_v41 = vmul.f32 0.0, %v8263_v50 }
 0x53d   :  { %v3999_v61 = vadd.f32 %v3983_v32, %v9197_v38  ;;  %v2105_v22 = vadd.f32 %v9201_v62, %v1944_v41 }
 0x53e   :  { %v3953_v53 = vpop.permute.xlu1 %3952  ;;  %v4183_v35 = vpop.permute.xlu0 %4182 }
 0x53f   :  { %v3986_v60 = vmul.f32 %v3953_v53, %v2101_v54  ;;  %v4224_v8 = vmul.f32 %v4183_v35, %v2904_v59  ;;  %v9202_v59 = vld [vmem:[#allocation31_spill] sm:$0xff] }
 0x540   :  { %v1941_v31 = vmul.f32 0.0, %v9202_v59  ;;  %v9203_v53 = vld [vmem:[#allocation75_spill] sm:$0xff]  ;;  %v9213_v59 = vld [vmem:[#allocation72_spill] sm:$0xff] }
 0x541   :  { %v4002_v4 = vadd.f32 %v3986_v60, %v9198_v9  ;;  %v8661_v29 = vadd.f32 %v4224_v8, %v4000_v20 }
 0x542   :  { %v4178_v51 = vpop.permute.xlu0 %4177  ;;  %v2102_v35 = vadd.f32 %v9203_v53, %v1941_v31  ;;  %v2748_v31 = vmul.f32 0.0, %v9213_v59 }
 0x543   :  { %v4223_v3 = vmul.f32 %v4178_v51, %v2903_v43  ;;  %v9205_v43 = vld [vmem:[#allocation17_spill] sm:$0xff] }
 0x544   :  { %v3540_v9 = vmul.f32 0.0, %v9205_v43  ;;  %v9216_v43 = vld [vmem:[#allocation63_spill] sm:$0xff] }
 0x545   :  { %v8667_v21 = vadd.f32 %v4223_v3, %v3999_v61  ;;  %v9207_v3 = vld [vmem:[#allocation40_spill] sm:$0xff] }
 0x546   :  { %v3963_v63 = vpop.permute.xlu1 %3962  ;;  %v3948_v46 = vpop.permute.xlu0 %3947  ;;  %v3701_v2 = vadd.f32 %v8558_v7, %v3540_v9  ;;  %v3545_v9 = vmul.f32 0.0, %v9216_v43 }
 0x547   :  { %v3988_v0 = vmul.f32 %v3963_v63, %v2103_v10  ;;  %v3985_v44 = vmul.f32 %v3948_v46, %v2100_v39  ;;  %v9208_v46 = vld [vmem:[#allocation39_spill] sm:$0xff] }
 0x548   :  { %v2746_v24 = vmul.f32 0.0, %v9208_v46  ;;  %v9218_v46 = vld [vmem:[#allocation66_spill] sm:$0xff] }
 0x549   :  { %v4004_v52 = vadd.f32 %v3988_v0, %v9199_v13  ;;  %v4001_v20 = vadd.f32 %v3985_v44, %v9200_v36  ;;  %v9209_v0 = vld [vmem:[#allocation33_spill] sm:$0xff]  ;;  %v9210_v36 = vld [vmem:[#allocation42_spill] sm:$0xff] }
 0x54a   :  { %v4193_v58 = vpop.permute.xlu0 %4192  ;;  %v3542_v44 = vmul.f32 0.0, %v9209_v0 }
 0x54b   :  { %v4226_v19 = vmul.f32 %v4193_v58, %v2906_v28 }
 0x54c   :  { %v3703_v58 = vadd.f32 %v8562_v16, %v3542_v44 }
 0x54d   :  { %v8677_v32 = vadd.f32 %v4226_v19, %v4002_v4  ;;  %v2747_v4 = vmul.f32 0.0, %v9206_v34  ;;  %v9211_v19 = vld [vmem:[#allocation73_spill] sm:$0xff]  ;;  %v2909_v34 = vadd.f32 %v8551_v49, %v2748_v31 }
 0x54e   :  { %v3973_v37 = vpop.permute.xlu1 %3972  ;;  %v4188_v54 = vpop.permute.xlu0 %4187  ;;  %v1943_v62 = vmul.f32 0.0, %v9211_v19 }
 0x54f   :  { %v3990_v38 = vmul.f32 %v3973_v37, %v2105_v22  ;;  %v4225_v61 = vmul.f32 %v4188_v54, %v2905_v6  ;;  %v2908_v45 = vadd.f32 %v8539_v33, %v2747_v4  ;;  %v9212_v22 = vld [vmem:[#allocation70_spill] sm:$0xff] }
 0x550   :  { %v3544_v6 = vmul.f32 0.0, %v9212_v22 }
 0x551   :  { %v8682_v60 = vadd.f32 %v3990_v38, %v9204_v40  ;;  %v8684_v50 = vadd.f32 %v4225_v61, %v4001_v20  ;;  %v2907_v20 = vadd.f32 %v9210_v36, %v2746_v24  ;;  %v9214_v38 = vld [vmem:[#allocation15_spill] sm:$0xff]  ;;  %v3541_v24 = vmul.f32 0.0, %v9218_v46  ;;  %v9230_v46 = vld [vmem:[#allocation78_spill] sm:$0xff] }
 0x552   :  { %v4208_v23 = vpop.permute.xlu1 %4207  ;;  %v3958_v8 = vpop.permute.xlu0 %3957  ;;  %v2104_v61 = vadd.f32 %v9214_v38, %v1943_v62  ;;  %v3705_v53 = vadd.f32 %v8566_v25, %v3544_v6 }
 0x553   :  { %v3987_v51 = vmul.f32 %v3958_v8, %v2102_v35  ;;  %v3702_v49 = vadd.f32 %v8564_v26, %v3541_v24 }
 0x555   :  { %v4003_v39 = vadd.f32 %v3987_v51, %v9207_v3  ;;  %v4229_v3 = vmul.f32 %v4208_v23, %v2909_v34  ;;  %v9219_v23 = vld [vmem:[#allocation43_spill] sm:$0xff] }
 0x556   :  { %v4383_v10 = vpop.permute.xlu1 %4382  ;;  %v4203_v63 = vpop.permute.xlu0 %4202 }
 0x557   :  { %v4456_v28 = vmul.f32 %v4383_v10, %v3701_v2  ;;  %v4228_v13 = vmul.f32 %v4203_v63, %v2908_v45  ;;  %v3706_v2 = vadd.f32 %v8572_v11, %v3545_v9  ;;  %v9217_v10 = vld [vmem:[#allocation46_spill] sm:$0xff]  ;;  %v9226_v9 = vld [vmem:[#allocation76_spill] sm:$0xff] }
 0x559   :  { %v4472_v41 = vadd.f32 %v4456_v28, %v8601_v18  ;;  %v8696_v1 = vadd.f32 %v4228_v13, %v4004_v52  ;;  %v9215_v18 = vld [vmem:[#allocation25_spill] sm:$0xff] }
 0x55a   :  { %v4393_v33 = vpop.permute.xlu1 %4392  ;;  %v4198_v7 = vpop.permute.xlu0 %4197  ;;  %v3539_v52 = vmul.f32 0.0, %v9215_v18 }
 0x55b   :  { %v4458_v37 = vmul.f32 %v4393_v33, %v3703_v58  ;;  %v4227_v54 = vmul.f32 %v4198_v7, %v2907_v20  ;;  %v3543_v20 = vmul.f32 0.0, %v9219_v23 }
 0x55c   :  { %v3700_v45 = vadd.f32 %v8560_v27, %v3539_v52 }
 0x55d   :  { %v4474_v16 = vadd.f32 %v4458_v37, %v8620_v56  ;;  %v4243_v35 = vadd.f32 %v4227_v54, %v4003_v39  ;;  %v3704_v33 = vadd.f32 %v8568_v12, %v3543_v20  ;;  %v9221_v37 = vld [vmem:[#allocation59_spill] sm:$0xff] }
 0x55e   :  { %v4403_v40 = vpop.permute.xlu1 %4402  ;;  %v3968_v8 = vpop.permute.xlu0 %3967 }
 0x55f   :  { %v4460_v4 = vmul.f32 %v4403_v40, %v3705_v53  ;;  %v3989_v51 = vmul.f32 %v3968_v8, %v2104_v61  ;;  %v9224_v53 = vld [vmem:[#allocation61_spill] sm:$0xff] }
 0x561   :  { %v4476_v25 = vadd.f32 %v4460_v4, %v8634_v42  ;;  %v4005_v56 = vadd.f32 %v3989_v51, %v9217_v10 }
 0x562   :  { %v4408_v39 = vpop.permute.xlu1 %4407  ;;  %v4378_v63 = vpop.permute.xlu0 %4377 }
 0x563   :  { %v4461_v0 = vmul.f32 %v4408_v39, %v3706_v2  ;;  %v4455_v44 = vmul.f32 %v4378_v63, %v3700_v45  ;;  %v4245_v28 = vadd.f32 %v4229_v3, %v4005_v56  ;;  %v9227_v2 = vld [vmem:[#allocation54_spill] sm:$0xff]  ;;  %v9229_v39 = vld [vmem:[#allocation71_spill] sm:$0xff] }
 0x564   :  { %v3550_v3 = vmul.f32 0.0, %v9227_v2  ;;  %v3552_v63 = vmul.f32 0.0, %v9229_v39 }
 0x565   :  { %v4477_v13 = vadd.f32 %v4461_v0, %v8651_v30  ;;  %v4471_v27 = vadd.f32 %v4455_v44, %v8603_v14  ;;  %v9220_v30 = vld [vmem:[#allocation62_spill] sm:$0xff]  ;;  %v9231_v44 = vld [vmem:[#allocation56_spill] sm:$0xff] }
 0x566   :  { %v4418_v36 = vpop.permute.xlu1 %4417  ;;  %v4388_v11 = vpop.permute.xlu0 %4387  ;;  %v2749_v22 = vmul.f32 0.0, %v9220_v30  ;;  %v3713_v24 = vadd.f32 %v9230_v46, %v3552_v63 }
 0x567   :  { %v4463_v42 = vmul.f32 %v4418_v36, %v8577_v47  ;;  %v4457_v58 = vmul.f32 %v4388_v11, %v3702_v49  ;;  %5401 = vmatprep.mubr.f32.mxu1 %v4471_v27 }
 0x568   :  { %5402 = vmatmul.mubr.f32.vlgmr.msra.gmra.mrb[128].mxu1 %v4472_v41  ;;  %v2910_v47 = vadd.f32 %v9221_v37, %v2749_v22 }
 0x569   :  { %v4479_v7 = vadd.f32 %v4463_v42, %v8667_v21  ;;  %v4473_v19 = vadd.f32 %v4457_v58, %v8622_v48  ;;  %v9222_v21 = vld [vmem:[#allocation67_spill] sm:$0xff] }
 0x56a   :  { %v4428_v26 = vpop.permute.xlu1 %4427  ;;  %v4398_v62 = vpop.permute.xlu0 %4397  ;;  %v3546_v31 = vmul.f32 0.0, %v9222_v21  ;;  %v9223_v48 = vld [vmem:[#allocation79_spill] sm:$0xff] }
 0x56b   :  { %v4465_v14 = vmul.f32 %v4428_v26, %v8582_v55  ;;  %v4459_v6 = vmul.f32 %v4398_v62, %v3704_v33  ;;  %5404 = vmatprep.mubr.f32.mxu1 %v4473_v19 }
 0x56c   :  { %5405 = vmatmul.mubr.f32.gmra.mrb[130].mxu1 %v4474_v16  ;;  %v3707_v55 = vadd.f32 %v9224_v53, %v3546_v31 }
 0x56d   :  { %v4481_v54 = vadd.f32 %v4465_v14, %v8684_v50  ;;  %v4475_v41 = vadd.f32 %v4459_v6, %v8636_v57  ;;  %v9225_v50 = vld [vmem:[#allocation74_spill] sm:$0xff] }
 0x56e   :  { %v4438_v12 = vpop.permute.xlu1 %4437  ;;  %v4213_v59 = vpop.permute.xlu0 %4212  ;;  %v3548_v8 = vmul.f32 0.0, %v9225_v50 }
 0x56f   :  { %v4467_v38 = vmul.f32 %v4438_v12, %v9223_v48  ;;  %v4230_v61 = vmul.f32 %v4213_v59, %v2910_v47  ;;  %5407 = vmatprep.mubr.f32.mxu1 %v4475_v41 }
 0x570   :  { %5408 = vmatmul.mubr.f32.gmra.mrb[132].mxu1 %v4476_v25  ;;  %v3709_v34 = vadd.f32 %v9226_v9, %v3548_v8 }
 0x571   :  { %v4483_v18 = vadd.f32 %v4467_v38, %v4243_v35  ;;  %v4246_v16 = vadd.f32 %v4230_v61, %v8682_v60  ;;  %5410 = vmatprep.mubr.f32.mxu1 %v4477_v13  ;;  %v9228_v60 = vld [vmem:[#allocation77_spill] sm:$0xff] }
 0x572   :  { %v4448_v52 = vpop.permute.xlu1 %4447  ;;  %v4413_v40 = vpop.permute.xlu0 %4412  ;;  %v3711_v35 = vadd.f32 %v9228_v60, %v3550_v3 }
 0x573   :  { %v4469_v57 = vmul.f32 %v4448_v52, %v8614_v15  ;;  %v4462_v43 = vmul.f32 %v4413_v40, %v3707_v55 }
 0x575   :  { %v4485_v4 = vadd.f32 %v4469_v57, %v4245_v28  ;;  %v4478_v51 = vadd.f32 %v4462_v43, %v8646_v5  ;;  %v3554_v28 = vmul.f32 0.0, %v9231_v44 }
 0x576   :  { %v4423_v45 = vpop.permute.xlu0 %4422 }
 0x577   :  { %v4464_v25 = vmul.f32 %v4423_v45, %v3709_v34  ;;  %5411 = vmatmul.mubr.f32.gmra.mrb[134].mxu1 %v4478_v51  ;;  %v3715_v13 = vadd.f32 %v8608_v17, %v3554_v28 }
 0x578   :  { %5413 = vmatprep.mubr.f32.mxu1 %v4479_v7 }
 0x579   :  { %v4480_v10 = vadd.f32 %v4464_v25, %v8661_v29 }
 0x57a   :  { %v4433_v56 = vpop.permute.xlu0 %4432 }
 0x57b   :  { %v4466_v15 = vmul.f32 %v4433_v56, %v3711_v35  ;;  %5414 = vmatmul.mubr.f32.gmra.mrb[136].mxu1 %v4480_v10 }
 0x57c   :  { %5416 = vmatprep.mubr.f32.mxu1 %v4481_v54 }
 0x57d   :  { %v4482_v5 = vadd.f32 %v4466_v15, %v8677_v32  ;;  %v4769_v32 = vld [vmem:[%s8768_s8] ss:$0 sm:$0xff]  ;;  %s6070_s8 = smov [#allocation11]  }
 0x57e   :  { %v4443_v0 = vpop.permute.xlu0 %4442  ;;  %s4676_s27 = sshll.u32 %s6070_s8, 4  ;;  %s4677_s27 = int_to_ptr.vmem [resolvable:$true] %s4676_s27 }
 0x57f   :  { %v4468_v49 = vmul.f32 %v4443_v0, %v3713_v24  ;;  %5417 = vmatmul.mubr.f32.gmra.mrb[138].mxu1 %v4482_v5  ;;  %s6033_s28 = scalar_lea.vmem %s4677_s27, 2048  ;;  %p6038_p3 = scmp.lt.s32.totalorder %s4677_s27, %s4677_s27 }
 0x580   :  { %5419 = vmatprep.mubr.f32.mxu1 %v4483_v18  ;;  %p6034_p2 = scmp.ne.s32.totalorder %s4677_s27, %s6033_s28  ;;  %p6039_p4 = scmp.lt.s32.totalorder %s6033_s28, %s6033_s28 }
 0x581   :  { %v4484_v29 = vadd.f32 %v4468_v49, %v8696_v1 }
 0x582   :  { %v4453_v27 = vpop.permute.xlu0 %4452  ;;  %p6040_p5 = por %p6039_p4, %p6038_p3 }
 0x583   :  { %v4470_v36 = vmul.f32 %v4453_v27, %v3715_v13  ;;  %5420 = vmatmul.mubr.f32.gmra.mrb[140].mxu1 %v4484_v29 }
 0x584   :  { %5422 = vmatprep.mubr.f32.mxu1 %v4485_v4  ;;  %p6041_p6 = pnand %p6040_p5, %p6034_p2 }
 0x585   :  { %v4486_v11 = vadd.f32 %v4470_v36, %v4246_v16 }
 0x587   :  { %5423 = vmatmul.mubr.f32.gmra.mrb[142].mxu1 %v4486_v11 }
 0x63b   :  { %v5403_v23 = vpop.f32.mrb[128].mxu1 }
 0x63c   :  { %v4582_v20 = vadd.f32 %v5403_v23, %v4769_v32  ;;  %v4576_v42 = vpop.f32.mrb[129].mxu1 }
 0x63d   :  { %v4577_v58 = vadd.f32 %v4769_v32, %v4576_v42 }
 0x63e   :  { %4656 = vst [vmem:[#allocation11 + $0x8] sm:$0xff] %v4582_v20 }
 0x63f   :  { %4655 = vst [vmem:[#allocation11] sm:$0xff] %v4577_v58  ;;  %v5406_v33 = vpop.f32.mrb[130].mxu1 }
 0x640   :  { %v4592_v17 = vadd.f32 %v5406_v33, %v4769_v32  ;;  %v4586_v7 = vpop.f32.mrb[131].mxu1 }
 0x641   :  { %v4587_v1 = vadd.f32 %v4769_v32, %v4586_v7 }
 0x642   :  { %4658 = vst [vmem:[#allocation11 + $0x18] sm:$0xff] %v4592_v17 }
 0x643   :  { %4657 = vst [vmem:[#allocation11 + $0x10] sm:$0xff] %v4587_v1  ;;  %v5409_v19 = vpop.f32.mrb[132].mxu1 }
 0x644   :  { %v4602_v26 = vadd.f32 %v5409_v19, %v4769_v32  ;;  %v4596_v62 = vpop.f32.mrb[133].mxu1 }
 0x645   :  { %v4597_v30 = vadd.f32 %v4769_v32, %v4596_v62 }
 0x646   :  { %4660 = vst [vmem:[#allocation11 + $0x28] sm:$0xff] %v4602_v26 }
 0x647   :  { %4659 = vst [vmem:[#allocation11 + $0x20] sm:$0xff] %v4597_v30 }
 0x64a   :  { %v5412_v22 = vpop.f32.mrb[134].mxu1 }
 0x64b   :  { %v4612_v14 = vadd.f32 %v5412_v22, %v4769_v32  ;;  %v4606_v6 = vpop.f32.mrb[135].mxu1 }
 0x64c   :  { %v4607_v37 = vadd.f32 %v4769_v32, %v4606_v6 }
 0x64d   :  { %4662 = vst [vmem:[#allocation11 + $0x38] sm:$0xff] %v4612_v14 }
 0x64e   :  { %4661 = vst [vmem:[#allocation11 + $0x30] sm:$0xff] %v4607_v37  ;;  %v5415_v47 = vpop.f32.mrb[136].mxu1 }
 0x64f   :  { %v4622_v54 = vadd.f32 %v5415_v47, %v4769_v32  ;;  %v4616_v41 = vpop.f32.mrb[137].mxu1 }
 0x650   :  { %v4617_v12 = vadd.f32 %v4769_v32, %v4616_v41 }
 0x651   :  { %4664 = vst [vmem:[#allocation11 + $0x48] sm:$0xff] %v4622_v54 }
 0x652   :  { %4663 = vst [vmem:[#allocation11 + $0x40] sm:$0xff] %v4617_v12  ;;  %v5418_v59 = vpop.f32.mrb[138].mxu1 }
 0x653   :  { %v4632_v21 = vadd.f32 %v5418_v59, %v4769_v32  ;;  %v4626_v31 = vpop.f32.mrb[139].mxu1 }
 0x654   :  { %v4627_v48 = vadd.f32 %v4769_v32, %v4626_v31 }
 0x655   :  { %4666 = vst [vmem:[#allocation11 + $0x58] sm:$0xff] %v4632_v21 }
 0x656   :  { %4665 = vst [vmem:[#allocation11 + $0x50] sm:$0xff] %v4627_v48  ;;  %v5421_v38 = vpop.f32.mrb[140].mxu1 }
 0x657   :  { %v4642_v61 = vadd.f32 %v5421_v38, %v4769_v32  ;;  %v4636_v53 = vpop.f32.mrb[141].mxu1 }
 0x658   :  { %v4637_v55 = vadd.f32 %v4769_v32, %v4636_v53 }
 0x659   :  { %4668 = vst [vmem:[#allocation11 + $0x68] sm:$0xff] %v4642_v61 }
 0x65a   :  { %4667 = vst [vmem:[#allocation11 + $0x60] sm:$0xff] %v4637_v55  ;;  %v5424_v18 = vpop.f32.mrb[142].mxu1 }
 0x65b   :  { %v4652_v16 = vadd.f32 %v5424_v18, %v4769_v32  ;;  %v4646_v52 = vpop.f32.mrb[143].mxu1 }
 0x65c   :  { %v4647_v40 = vadd.f32 %v4769_v32, %v4646_v52 }
 0x65d   :  { %4670 = vst [vmem:[#allocation11 + $0x78] sm:$0xff] %v4652_v16 }
 0x65e   :  { %4669 = vst [vmem:[#allocation11 + $0x70] sm:$0xff] %v4647_v40 }
 0x65f   :  { %6044 = shalt.err (!%p6041_p6)
}
 0x660   :  { %s6045_s30 = scalar_lea.hbm %s8769_s9, 2048 }
 0x661   :  { %p6046_p7 = scmp.ne.s32.totalorder %s8769_s9, %s6045_s30  ;;  %p6049_p8 = scmp.lt.u32.totalorder %s6045_s30, %s8769_s9 }
 0x663   :  { %p6051_p9 = pnand %p6049_p8, %p6046_p7 }
 0x665   :  { %6054 = shalt.err (!%p6051_p9)
}
 0x666   :  { %4682 = dma.vmem_to_hbm [thread:$0]  %s4677_s27, 2048, %s8769_s9, [#allocation8], %s6065_s6, %s6065_s6, %s6066_s10  }
 0x667   :  { %6059 = dma.done.wait [#allocation8], 2048  }
 0x668   :  { %6060 = vsyncadd [#allocation8], 4294965248 }
 0x669   :  { %4686 = vsyncpa [#allocation7], 1 }
 0x66a   :  { %4687 = vsyncpa [#allocation10], 1 }
 0x66b   :  { %4688 = vsyncpa [#allocation8], 1 }

</bundles_post_ra>
